<compile_context>
chip_gen: v7x
topology: tpu7x:2x2x1
jax: 0.10.0
libtpu: 0.0.40
codegen_flags: <defaults>
</compile_context>

<pallas_src>
import math

import jax
import jax.numpy as jnp
import numpy as np
from jax import lax
from jax.experimental import pallas as pl
from jax.experimental.pallas import tpu as pltpu

OP_NAMES = ('none', 'skip_connect', 'nor_conv_1x1', 'nor_conv_3x3', 'avg_pool_3x3')
MAX_NODES = 4
EDGE_KEYS = sorted('{:}<-{:}'.format(i, j) for i in range(1, MAX_NODES) for j in range(i))
EDGE2INDEX = {k: i for i, k in enumerate(EDGE_KEYS)}
NUM_EDGES = len(EDGE_KEYS)

# edge indices used inside the fused kernel (sorted key order)
E_1_0 = EDGE2INDEX['1<-0']
E_2_0 = EDGE2INDEX['2<-0']
E_2_1 = EDGE2INDEX['2<-1']
E_3_0 = EDGE2INDEX['3<-0']
E_3_1 = EDGE2INDEX['3<-1']
E_3_2 = EDGE2INDEX['3<-2']

BN_EPS = 1e-5
BN_SCALE = 1.0 / math.sqrt(1.0 + BN_EPS)  # eval-mode BN, affine=False


# ----------------------------------------------------------------------------
# Fused cell kernel: one batch element per grid step, whole DAG in VMEM.
#   per edge e:  out_e = conv3x3_folded(ReLU(src)) + b_e
#                        + aw_skip[e]*src + aw_pool[e]*avg_pool3x3(src)
#   node1 = E('1<-0');  node2 = E('2<-0')+E('2<-1');
#   node3 = E('3<-0')+E('3<-1')+E('3<-2')  (cell output)
# Conv weights of all edges leaving a source node are stacked along the
# output-channel dim, so each source node needs only 9 accumulated MXU dots.
# ----------------------------------------------------------------------------
def cell_kernel(aw_ref, x_ref, w0_ref, w1_ref, w2_ref, b_ref, inv_ref, out_ref,
                pad_ref, patch_ref):
    H, W, C = x_ref.shape
    HW = H * W
    inv_cnt = inv_ref[...]                      # (HW, 1): 1 / #valid pool taps

    # Zero the padded halo buffer ONCE per grid step.  The border is always
    # zero; the interior is fully overwritten for every source node below.
    pad_ref[...] = jnp.zeros((H + 2, W + 2, C), jnp.float32)

    def prep(src_flat):
        """Shared per-source-node work: write the zero-padded raw source, then
        in a SINGLE sweep over the 9 halo windows accumulate the raw avg-pool
        sum and cache the ReLU'd im2col taps (ReLU(pad(x)) == pad(ReLU(x)))."""
        pad_ref[1:1 + H, 1:1 + W, :] = src_flat.reshape(H, W, C)
        psum = None
        for k in range(9):
            dy, dx = divmod(k, 3)
            tap = pad_ref[dy:dy + H, dx:dx + W, :].reshape(HW, C)
            psum = tap if psum is None else psum + tap
            patch_ref[k] = jnp.maximum(tap, 0.0)
        # avg_pool_3x3, stride 1, pad 1, count_include_pad=False (raw input)
        return psum * inv_cnt

    def conv_stack(w_ref):
        """Folded 3x3 conv of the cached taps against the stacked weights of
        ALL edges leaving the current source node: 9 MXU dots total."""
        acc = jnp.dot(patch_ref[0], w_ref[0], preferred_element_type=jnp.float32)
        for k in range(1, 9):
            acc = acc + jnp.dot(patch_ref[k], w_ref[k],
                                preferred_element_type=jnp.float32)
        return acc

    def mix(conv_e, e, center, pool_avg):
        """One mixed edge: conv slice (arch weight, BN and 1x1 branch folded in
        the wrapper) + folded bias + skip + avg-pool.  'none' contributes 0."""
        return conv_e + b_ref[e] + aw_ref[e, 0] * center + aw_ref[e, 1] * pool_avg

    # ---- source node 0 (cell input): edges 1<-0, 2<-0, 3<-0 ----------------
    c0 = x_ref[...].astype(jnp.float32).reshape(HW, C)
    p0 = prep(c0)
    a0 = conv_stack(w0_ref)                               # (HW, 3C)
    n1 = mix(a0[:, 0 * C:1 * C], E_1_0, c0, p0)
    n2 = mix(a0[:, 1 * C:2 * C], E_2_0, c0, p0)
    n3 = mix(a0[:, 2 * C:3 * C], E_3_0, c0, p0)

    # ---- source node 1: edges 2<-1, 3<-1 ------------------------------------
    p1 = prep(n1)
    a1 = conv_stack(w1_ref)                               # (HW, 2C)
    n2 = n2 + mix(a1[:, 0 * C:1 * C], E_2_1, n1, p1)
    n3 = n3 + mix(a1[:, 1 * C:2 * C], E_3_1, n1, p1)

    # ---- source node 2: edge 3<-2 -------------------------------------------
    p2 = prep(n2)
    a2 = conv_stack(w2_ref)                               # (HW, C)
    n3 = n3 + mix(a2, E_3_2, n2, p2)

    # single whole-block store of the cell output (node3)
    out_ref[...] = n3.reshape(H, W, C).astype(out_ref.dtype)


# ----------------------------------------------------------------------------
# Cell wrapper (mirrors NAS201SearchCell.forward). NCHW in/out, NHWC inside.
# ----------------------------------------------------------------------------
def nas201_cell_forward(x_nchw, params, weightss):
    x = jnp.transpose(x_nchw, (0, 2, 3, 1)).astype(jnp.float32)   # NHWC
    N, H, W, C = x.shape
    # NOTE: W is assumed to be a multiple of 8 (TPU sublane tile) for the cheap
    # (H, W, C) <-> (H*W, C) reshapes used inside the kernel.

    # Fold arch weights + eval-mode BN scale into the conv weights/biases:
    #   w_e = aw3*BN*w3  with centre tap += aw2*BN*w1 ;  b_e = aw2*BN*b1 + aw3*BN*b3
    w_fold, b_list, aw_list = [], [], []
    for e in range(NUM_EDGES):
        p, aw = params[e], weightss[e]
        s2 = aw[2] * BN_SCALE
        s3 = aw[3] * BN_SCALE
        w = s3 * p['w3']                         # (3, 3, C, C)
        w = w.at[1, 1].add(s2 * p['w1'])         # merge 1x1 branch into centre tap
        w_fold.append(w.reshape(9, C, C))
        b_list.append(s2 * p['b1'] + s3 * p['b3'])          # (1, C)
        aw_list.append(jnp.stack([aw[1], aw[4]]))           # [skip, pool]
    # Stack all edges leaving the same source node along the output-channel dim
    # -> one 9-dot conv chain per source node inside the kernel.
    w_src0 = jnp.concatenate([w_fold[E_1_0], w_fold[E_2_0], w_fold[E_3_0]], axis=-1)  # (9,C,3C)
    w_src1 = jnp.concatenate([w_fold[E_2_1], w_fold[E_3_1]], axis=-1)                 # (9,C,2C)
    w_src2 = w_fold[E_3_2]                                                            # (9,C, C)
    b_all = jnp.stack(b_list)                    # (6, 1, C)
    aw_sp = jnp.stack(aw_list)                   # (6, 2)  -> SMEM scalars

    # avg_pool_3x3 count_include_pad=False divisor, hoisted out of the kernel
    rv = (3.0 - (jnp.arange(H) == 0).astype(jnp.float32)
              - (jnp.arange(H) == H - 1).astype(jnp.float32))
    cv = (3.0 - (jnp.arange(W) == 0).astype(jnp.float32)
              - (jnp.arange(W) == W - 1).astype(jnp.float32))
    inv_cnt = (1.0 / (rv[:, None] * cv[None, :])).reshape(H * W, 1)

    out = pl.pallas_call(
        cell_kernel,
        out_shape=jax.ShapeDtypeStruct((N, H, W, C), jnp.float32),
        grid=(N,),
        in_specs=[
            pl.BlockSpec(memory_space=pltpu.MemorySpace.SMEM),                 # aw_sp (6,2)
            pl.BlockSpec((pl.Squeezed(), H, W, C), lambda n: (n, 0, 0, 0)),    # x
            pl.BlockSpec((9, C, 3 * C), lambda n: (0, 0, 0)),                  # src-node0 conv w
            pl.BlockSpec((9, C, 2 * C), lambda n: (0, 0, 0)),                  # src-node1 conv w
            pl.BlockSpec((9, C, C), lambda n: (0, 0, 0)),                      # src-node2 conv w
            pl.BlockSpec((NUM_EDGES, 1, C), lambda n: (0, 0, 0)),              # folded bias
            pl.BlockSpec((H * W, 1), lambda n: (0, 0)),                        # pool inv counts
        ],
        out_specs=pl.BlockSpec((pl.Squeezed(), H, W, C), lambda n: (n, 0, 0, 0)),
        scratch_shapes=[
            pltpu.VMEM((H + 2, W + 2, C), jnp.float32),   # zero-bordered source buffer
            pltpu.VMEM((9, H * W, C), jnp.float32),       # cached ReLU'd conv taps
        ],
        compiler_params=pltpu.CompilerParams(dimension_semantics=("parallel",)),
    )(aw_sp, x, w_src0, w_src1, w_src2, b_all, inv_cnt)

    return jnp.transpose(out, (0, 3, 1, 2))


# ----------------------------------------------------------------------------
# Pure-JAX reference (unfused, unfolded ops) for verification only.
# ----------------------------------------------------------------------------
def _ref_edge(x, p, aw):
    dn = ('NHWC', 'HWIO', 'NHWC')
    r = jnp.maximum(x, 0.0)
    y1 = lax.conv_general_dilated(r, p['w1'][None, None], (1, 1), 'VALID',
                                  dimension_numbers=dn,
                                  precision=lax.Precision.HIGHEST) + p['b1'][0]
    y3 = lax.conv_general_dilated(r, p['w3'], (1, 1), ((1, 1), (1, 1)),
                                  dimension_numbers=dn,
                                  precision=lax.Precision.HIGHEST) + p['b3'][0]
    s = lax.reduce_window(x, 0.0, lax.add, (1, 3, 3, 1), (1, 1, 1, 1), 'SAME')
    c = lax.reduce_window(jnp.ones_like(x), 0.0, lax.add, (1, 3, 3, 1), (1, 1, 1, 1), 'SAME')
    pool = s / c
    return aw[1] * x + aw[2] * y1 * BN_SCALE + aw[3] * y3 * BN_SCALE + aw[4] * pool


def _ref_forward(x_nchw, params, weightss):
    x = jnp.transpose(x_nchw, (0, 2, 3, 1)).astype(jnp.float32)
    nodes = [x]
    for i in range(1, MAX_NODES):
        acc = None
        for j in range(i):
            e = EDGE2INDEX['{:}<-{:}'.format(i, j)]
            y = _ref_edge(nodes[j], params[e], weightss[e])
            acc = y if acc is None else acc + y
        nodes.append(acc)
    return jnp.transpose(nodes[-1], (0, 3, 1, 2))


def init_params(key, C):
    params = []
    for _ in range(NUM_EDGES):
        k1, k2, k3, k4, key = jax.random.split(key, 5)
        params.append(dict(
            w1=0.2 * jax.random.normal(k1, (C, C), jnp.float32),
            b1=0.05 * jax.random.normal(k2, (1, C), jnp.float32),
            w3=0.1 * jax.random.normal(k3, (3, 3, C, C), jnp.float32),
            b3=0.05 * jax.random.normal(k4, (1, C), jnp.float32),
        ))
    return params


if __name__ == "__main__":
    N, C, H, W = 2, 8, 8, 8

    key = jax.random.PRNGKey(0)
    kx, kw, kp = jax.random.split(key, 3)
    x_nchw = jax.random.normal(kx, (N, C, H, W), jnp.float32)
    # architecture weights: one softmax row per edge (num_edges=6, num_ops=5)
    weightss = jax.nn.softmax(
        jax.random.normal(kw, (NUM_EDGES, len(OP_NAMES)), jnp.float32), axis=-1)
    params = init_params(kp, C)

    out = jax.jit(nas201_cell_forward)(x_nchw, params, weightss)
    out = jax.block_until_ready(out)

    ref = jax.block_until_ready(_ref_forward(x_nchw, params, weightss))
    np.testing.assert_allclose(np.asarray(out), np.asarray(ref), atol=2e-3, rtol=2e-3)

    print("KERNEL_OK")
</pallas_src>

<mosaic_0001>
module attributes {stable_mosaic.version = 11 : i64} {
  func.func @cell_kernel(%arg0: i32, %arg1: memref<6x2xf32, #tpu.memory_space<smem>>, %arg2: memref<1x8x8x8xf32, #tpu.memory_space<vmem>>, %arg3: memref<9x8x24xf32, #tpu.memory_space<vmem>>, %arg4: memref<9x8x16xf32, #tpu.memory_space<vmem>>, %arg5: memref<9x8x8xf32, #tpu.memory_space<vmem>>, %arg6: memref<6x1x8xf32, #tpu.memory_space<vmem>>, %arg7: memref<64x1xf32, #tpu.memory_space<vmem>>, %arg8: memref<1x8x8x8xf32, #tpu.memory_space<vmem>>, %arg9: memref<10x10x8xf32, #tpu.memory_space<vmem>>, %arg10: memref<9x64x8xf32, #tpu.memory_space<vmem>>) attributes {dimension_semantics = [#tpu.dimension_semantics<parallel>], iteration_bounds = array<i64: 2>, scalar_prefetch = 0 : i64, scratch_operands = 2 : i64, tpu.core_type = #tpu.core_type<tc>, window_params = [{transform_indices = @transform_0, window_bounds = array<i64: 6, 2>}, {transform_indices = @transform_1, window_bounds = array<i64: 1, 8, 8, 8>}, {pipeline_mode = #tpu.pipeline_mode<synchronous>, transform_indices = @transform_2, window_bounds = array<i64: 9, 8, 24>}, {pipeline_mode = #tpu.pipeline_mode<synchronous>, transform_indices = @transform_3, window_bounds = array<i64: 9, 8, 16>}, {pipeline_mode = #tpu.pipeline_mode<synchronous>, transform_indices = @transform_4, window_bounds = array<i64: 9, 8, 8>}, {pipeline_mode = #tpu.pipeline_mode<synchronous>, transform_indices = @transform_5, window_bounds = array<i64: 6, 1, 8>}, {pipeline_mode = #tpu.pipeline_mode<synchronous>, transform_indices = @transform_6, window_bounds = array<i64: 64, 1>}, {transform_indices = @transform_7, window_bounds = array<i64: 1, 8, 8, 8>}]} {
    %c0 = arith.constant 0 : index
    %c0_0 = arith.constant 0 : index
    %0 = vector.load %arg7[%c0, %c0_0] : memref<64x1xf32, #tpu.memory_space<vmem>>, vector<64x1xf32>
    %cst = arith.constant 0.000000e+00 : f32
    %1 = vector.broadcast %cst : f32 to vector<10x10x8xf32>
    %c0_1 = arith.constant 0 : index
    %c0_2 = arith.constant 0 : index
    %c0_3 = arith.constant 0 : index
    %2 = vector.load %arg9[%c0_1, %c0_2, %c0_3] : memref<10x10x8xf32, #tpu.memory_space<vmem>>, vector<10x10x8xf32>
    tpu.vector_store %arg9[%c0_1, %c0_2, %c0_3], %1 {strides = array<i32>} : memref<10x10x8xf32, #tpu.memory_space<vmem>>, vector<10x10x8xf32>,
    %c0_4 = arith.constant 0 : index
    %c0_5 = arith.constant 0 : index
    %c0_6 = arith.constant 0 : index
    %c0_7 = arith.constant 0 : index
    %3 = vector.load %arg2[%c0_4, %c0_5, %c0_6, %c0_7] : memref<1x8x8x8xf32, #tpu.memory_space<vmem>>, vector<1x8x8x8xf32>
    %4 = vector.shape_cast %3 : vector<1x8x8x8xf32> to vector<8x8x8xf32>
    %5 = vector.shape_cast %4 : vector<8x8x8xf32> to vector<64x8xf32>
    %6 = vector.shape_cast %5 : vector<64x8xf32> to vector<8x8x8xf32>
    %c1 = arith.constant 1 : index
    %c1_8 = arith.constant 1 : index
    %c0_9 = arith.constant 0 : index
    %7 = vector.load %arg9[%c1, %c1_8, %c0_9] : memref<10x10x8xf32, #tpu.memory_space<vmem>>, vector<8x8x8xf32>
    tpu.vector_store %arg9[%c1, %c1_8, %c0_9], %6 {strides = array<i32>} : memref<10x10x8xf32, #tpu.memory_space<vmem>>, vector<8x8x8xf32>,
    %c0_10 = arith.constant 0 : index
    %c0_11 = arith.constant 0 : index
    %c0_12 = arith.constant 0 : index
    %8 = vector.load %arg9[%c0_10, %c0_11, %c0_12] : memref<10x10x8xf32, #tpu.memory_space<vmem>>, vector<8x8x8xf32>
    %9 = vector.shape_cast %8 : vector<8x8x8xf32> to vector<64x8xf32>
    %cst_13 = arith.constant 0.000000e+00 : f32
    %10 = vector.broadcast %cst_13 : f32 to vector<64x8xf32>
    %11 = arith.maximumf %9, %10 : vector<64x8xf32>
    %c0_14 = arith.constant 0 : index
    %c0_15 = arith.constant 0 : index
    %c0_16 = arith.constant 0 : index
    %12 = vector.load %arg10[%c0_14, %c0_15, %c0_16] : memref<9x64x8xf32, #tpu.memory_space<vmem>>, vector<1x64x8xf32>
    %13 = vector.shape_cast %12 : vector<1x64x8xf32> to vector<64x8xf32>
    %14 = vector.shape_cast %11 : vector<64x8xf32> to vector<1x64x8xf32>
    tpu.vector_store %arg10[%c0_14, %c0_15, %c0_16], %14 {strides = array<i32>} : memref<9x64x8xf32, #tpu.memory_space<vmem>>, vector<1x64x8xf32>,
    %c0_17 = arith.constant 0 : index
    %c1_18 = arith.constant 1 : index
    %c0_19 = arith.constant 0 : index
    %15 = vector.load %arg9[%c0_17, %c1_18, %c0_19] : memref<10x10x8xf32, #tpu.memory_space<vmem>>, vector<8x8x8xf32>
    %16 = vector.shape_cast %15 : vector<8x8x8xf32> to vector<64x8xf32>
    %17 = arith.addf %9, %16 : vector<64x8xf32>
    %cst_20 = arith.constant 0.000000e+00 : f32
    %18 = vector.broadcast %cst_20 : f32 to vector<64x8xf32>
    %19 = arith.maximumf %16, %18 : vector<64x8xf32>
    %c1_21 = arith.constant 1 : index
    %c0_22 = arith.constant 0 : index
    %c0_23 = arith.constant 0 : index
    %20 = vector.load %arg10[%c1_21, %c0_22, %c0_23] : memref<9x64x8xf32, #tpu.memory_space<vmem>>, vector<1x64x8xf32>
    %21 = vector.shape_cast %20 : vector<1x64x8xf32> to vector<64x8xf32>
    %22 = vector.shape_cast %19 : vector<64x8xf32> to vector<1x64x8xf32>
    tpu.vector_store %arg10[%c1_21, %c0_22, %c0_23], %22 {strides = array<i32>} : memref<9x64x8xf32, #tpu.memory_space<vmem>>, vector<1x64x8xf32>,
    %c0_24 = arith.constant 0 : index
    %c2 = arith.constant 2 : index
    %c0_25 = arith.constant 0 : index
    %23 = vector.load %arg9[%c0_24, %c2, %c0_25] : memref<10x10x8xf32, #tpu.memory_space<vmem>>, vector<8x8x8xf32>
    %24 = vector.shape_cast %23 : vector<8x8x8xf32> to vector<64x8xf32>
    %25 = arith.addf %17, %24 : vector<64x8xf32>
    %cst_26 = arith.constant 0.000000e+00 : f32
    %26 = vector.broadcast %cst_26 : f32 to vector<64x8xf32>
    %27 = arith.maximumf %24, %26 : vector<64x8xf32>
    %c2_27 = arith.constant 2 : index
    %c0_28 = arith.constant 0 : index
    %c0_29 = arith.constant 0 : index
    %28 = vector.load %arg10[%c2_27, %c0_28, %c0_29] : memref<9x64x8xf32, #tpu.memory_space<vmem>>, vector<1x64x8xf32>
    %29 = vector.shape_cast %28 : vector<1x64x8xf32> to vector<64x8xf32>
    %30 = vector.shape_cast %27 : vector<64x8xf32> to vector<1x64x8xf32>
    tpu.vector_store %arg10[%c2_27, %c0_28, %c0_29], %30 {strides = array<i32>} : memref<9x64x8xf32, #tpu.memory_space<vmem>>, vector<1x64x8xf32>,
    %c1_30 = arith.constant 1 : index
    %c0_31 = arith.constant 0 : index
    %c0_32 = arith.constant 0 : index
    %31 = vector.load %arg9[%c1_30, %c0_31, %c0_32] : memref<10x10x8xf32, #tpu.memory_space<vmem>>, vector<8x8x8xf32>
    %32 = vector.shape_cast %31 : vector<8x8x8xf32> to vector<64x8xf32>
    %33 = arith.addf %25, %32 : vector<64x8xf32>
    %cst_33 = arith.constant 0.000000e+00 : f32
    %34 = vector.broadcast %cst_33 : f32 to vector<64x8xf32>
    %35 = arith.maximumf %32, %34 : vector<64x8xf32>
    %c3 = arith.constant 3 : index
    %c0_34 = arith.constant 0 : index
    %c0_35 = arith.constant 0 : index
    %36 = vector.load %arg10[%c3, %c0_34, %c0_35] : memref<9x64x8xf32, #tpu.memory_space<vmem>>, vector<1x64x8xf32>
    %37 = vector.shape_cast %36 : vector<1x64x8xf32> to vector<64x8xf32>
    %38 = vector.shape_cast %35 : vector<64x8xf32> to vector<1x64x8xf32>
    tpu.vector_store %arg10[%c3, %c0_34, %c0_35], %38 {strides = array<i32>} : memref<9x64x8xf32, #tpu.memory_space<vmem>>, vector<1x64x8xf32>,
    %c1_36 = arith.constant 1 : index
    %c1_37 = arith.constant 1 : index
    %c0_38 = arith.constant 0 : index
    %39 = vector.load %arg9[%c1_36, %c1_37, %c0_38] : memref<10x10x8xf32, #tpu.memory_space<vmem>>, vector<8x8x8xf32>
    %40 = vector.shape_cast %39 : vector<8x8x8xf32> to vector<64x8xf32>
    %41 = arith.addf %33, %40 : vector<64x8xf32>
    %cst_39 = arith.constant 0.000000e+00 : f32
    %42 = vector.broadcast %cst_39 : f32 to vector<64x8xf32>
    %43 = arith.maximumf %40, %42 : vector<64x8xf32>
    %c4 = arith.constant 4 : index
    %c0_40 = arith.constant 0 : index
    %c0_41 = arith.constant 0 : index
    %44 = vector.load %arg10[%c4, %c0_40, %c0_41] : memref<9x64x8xf32, #tpu.memory_space<vmem>>, vector<1x64x8xf32>
    %45 = vector.shape_cast %44 : vector<1x64x8xf32> to vector<64x8xf32>
    %46 = vector.shape_cast %43 : vector<64x8xf32> to vector<1x64x8xf32>
    tpu.vector_store %arg10[%c4, %c0_40, %c0_41], %46 {strides = array<i32>} : memref<9x64x8xf32, #tpu.memory_space<vmem>>, vector<1x64x8xf32>,
    %c1_42 = arith.constant 1 : index
    %c2_43 = arith.constant 2 : index
    %c0_44 = arith.constant 0 : index
    %47 = vector.load %arg9[%c1_42, %c2_43, %c0_44] : memref<10x10x8xf32, #tpu.memory_space<vmem>>, vector<8x8x8xf32>
    %48 = vector.shape_cast %47 : vector<8x8x8xf32> to vector<64x8xf32>
    %49 = arith.addf %41, %48 : vector<64x8xf32>
    %cst_45 = arith.constant 0.000000e+00 : f32
    %50 = vector.broadcast %cst_45 : f32 to vector<64x8xf32>
    %51 = arith.maximumf %48, %50 : vector<64x8xf32>
    %c5 = arith.constant 5 : index
    %c0_46 = arith.constant 0 : index
    %c0_47 = arith.constant 0 : index
    %52 = vector.load %arg10[%c5, %c0_46, %c0_47] : memref<9x64x8xf32, #tpu.memory_space<vmem>>, vector<1x64x8xf32>
    %53 = vector.shape_cast %52 : vector<1x64x8xf32> to vector<64x8xf32>
    %54 = vector.shape_cast %51 : vector<64x8xf32> to vector<1x64x8xf32>
    tpu.vector_store %arg10[%c5, %c0_46, %c0_47], %54 {strides = array<i32>} : memref<9x64x8xf32, #tpu.memory_space<vmem>>, vector<1x64x8xf32>,
    %c2_48 = arith.constant 2 : index
    %c0_49 = arith.constant 0 : index
    %c0_50 = arith.constant 0 : index
    %55 = vector.load %arg9[%c2_48, %c0_49, %c0_50] : memref<10x10x8xf32, #tpu.memory_space<vmem>>, vector<8x8x8xf32>
    %56 = vector.shape_cast %55 : vector<8x8x8xf32> to vector<64x8xf32>
    %57 = arith.addf %49, %56 : vector<64x8xf32>
    %cst_51 = arith.constant 0.000000e+00 : f32
    %58 = vector.broadcast %cst_51 : f32 to vector<64x8xf32>
    %59 = arith.maximumf %56, %58 : vector<64x8xf32>
    %c6 = arith.constant 6 : index
    %c0_52 = arith.constant 0 : index
    %c0_53 = arith.constant 0 : index
    %60 = vector.load %arg10[%c6, %c0_52, %c0_53] : memref<9x64x8xf32, #tpu.memory_space<vmem>>, vector<1x64x8xf32>
    %61 = vector.shape_cast %60 : vector<1x64x8xf32> to vector<64x8xf32>
    %62 = vector.shape_cast %59 : vector<64x8xf32> to vector<1x64x8xf32>
    tpu.vector_store %arg10[%c6, %c0_52, %c0_53], %62 {strides = array<i32>} : memref<9x64x8xf32, #tpu.memory_space<vmem>>, vector<1x64x8xf32>,
    %c2_54 = arith.constant 2 : index
    %c1_55 = arith.constant 1 : index
    %c0_56 = arith.constant 0 : index
    %63 = vector.load %arg9[%c2_54, %c1_55, %c0_56] : memref<10x10x8xf32, #tpu.memory_space<vmem>>, vector<8x8x8xf32>
    %64 = vector.shape_cast %63 : vector<8x8x8xf32> to vector<64x8xf32>
    %65 = arith.addf %57, %64 : vector<64x8xf32>
    %cst_57 = arith.constant 0.000000e+00 : f32
    %66 = vector.broadcast %cst_57 : f32 to vector<64x8xf32>
    %67 = arith.maximumf %64, %66 : vector<64x8xf32>
    %c7 = arith.constant 7 : index
    %c0_58 = arith.constant 0 : index
    %c0_59 = arith.constant 0 : index
    %68 = vector.load %arg10[%c7, %c0_58, %c0_59] : memref<9x64x8xf32, #tpu.memory_space<vmem>>, vector<1x64x8xf32>
    %69 = vector.shape_cast %68 : vector<1x64x8xf32> to vector<64x8xf32>
    %70 = vector.shape_cast %67 : vector<64x8xf32> to vector<1x64x8xf32>
    tpu.vector_store %arg10[%c7, %c0_58, %c0_59], %70 {strides = array<i32>} : memref<9x64x8xf32, #tpu.memory_space<vmem>>, vector<1x64x8xf32>,
    %c2_60 = arith.constant 2 : index
    %c2_61 = arith.constant 2 : index
    %c0_62 = arith.constant 0 : index
    %71 = vector.load %arg9[%c2_60, %c2_61, %c0_62] : memref<10x10x8xf32, #tpu.memory_space<vmem>>, vector<8x8x8xf32>
    %72 = vector.shape_cast %71 : vector<8x8x8xf32> to vector<64x8xf32>
    %73 = arith.addf %65, %72 : vector<64x8xf32>
    %cst_63 = arith.constant 0.000000e+00 : f32
    %74 = vector.broadcast %cst_63 : f32 to vector<64x8xf32>
    %75 = arith.maximumf %72, %74 : vector<64x8xf32>
    %c8 = arith.constant 8 : index
    %c0_64 = arith.constant 0 : index
    %c0_65 = arith.constant 0 : index
    %76 = vector.load %arg10[%c8, %c0_64, %c0_65] : memref<9x64x8xf32, #tpu.memory_space<vmem>>, vector<1x64x8xf32>
    %77 = vector.shape_cast %76 : vector<1x64x8xf32> to vector<64x8xf32>
    %78 = vector.shape_cast %75 : vector<64x8xf32> to vector<1x64x8xf32>
    tpu.vector_store %arg10[%c8, %c0_64, %c0_65], %78 {strides = array<i32>} : memref<9x64x8xf32, #tpu.memory_space<vmem>>, vector<1x64x8xf32>,
    %79 = vector.broadcast %0 : vector<64x1xf32> to vector<64x8xf32>
    %80 = arith.mulf %73, %79 : vector<64x8xf32>
    %c0_66 = arith.constant 0 : index
    %c0_67 = arith.constant 0 : index
    %c0_68 = arith.constant 0 : index
    %81 = vector.load %arg10[%c0_66, %c0_67, %c0_68] : memref<9x64x8xf32, #tpu.memory_space<vmem>>, vector<1x64x8xf32>
    %82 = vector.shape_cast %81 : vector<1x64x8xf32> to vector<64x8xf32>
    %c0_69 = arith.constant 0 : index
    %c0_70 = arith.constant 0 : index
    %c0_71 = arith.constant 0 : index
    %83 = vector.load %arg3[%c0_69, %c0_70, %c0_71] : memref<9x8x24xf32, #tpu.memory_space<vmem>>, vector<1x8x24xf32>
    %84 = vector.shape_cast %83 : vector<1x8x24xf32> to vector<8x24xf32>
    %cst_72 = arith.constant dense<0.000000e+00> : vector<64x24xf32>
    %85 = tpu.matmul %82, %84, %cst_72 {dimension_numbers = #tpu.dot_dimension_numbers<[1], [0], [0], [1], [0, 0, 1, 1], [], []>} : vector<64x8xf32>, vector<8x24xf32>, vector<64x24xf32> -> vector<64x24xf32>
    %c1_73 = arith.constant 1 : index
    %c0_74 = arith.constant 0 : index
    %c0_75 = arith.constant 0 : index
    %86 = vector.load %arg10[%c1_73, %c0_74, %c0_75] : memref<9x64x8xf32, #tpu.memory_space<vmem>>, vector<1x64x8xf32>
    %87 = vector.shape_cast %86 : vector<1x64x8xf32> to vector<64x8xf32>
    %c1_76 = arith.constant 1 : index
    %c0_77 = arith.constant 0 : index
    %c0_78 = arith.constant 0 : index
    %88 = vector.load %arg3[%c1_76, %c0_77, %c0_78] : memref<9x8x24xf32, #tpu.memory_space<vmem>>, vector<1x8x24xf32>
    %89 = vector.shape_cast %88 : vector<1x8x24xf32> to vector<8x24xf32>
    %cst_79 = arith.constant dense<0.000000e+00> : vector<64x24xf32>
    %90 = tpu.matmul %87, %89, %cst_79 {dimension_numbers = #tpu.dot_dimension_numbers<[1], [0], [0], [1], [0, 0, 1, 1], [], []>} : vector<64x8xf32>, vector<8x24xf32>, vector<64x24xf32> -> vector<64x24xf32>
    %91 = arith.addf %85, %90 : vector<64x24xf32>
    %c2_80 = arith.constant 2 : index
    %c0_81 = arith.constant 0 : index
    %c0_82 = arith.constant 0 : index
    %92 = vector.load %arg10[%c2_80, %c0_81, %c0_82] : memref<9x64x8xf32, #tpu.memory_space<vmem>>, vector<1x64x8xf32>
    %93 = vector.shape_cast %92 : vector<1x64x8xf32> to vector<64x8xf32>
    %c2_83 = arith.constant 2 : index
    %c0_84 = arith.constant 0 : index
    %c0_85 = arith.constant 0 : index
    %94 = vector.load %arg3[%c2_83, %c0_84, %c0_85] : memref<9x8x24xf32, #tpu.memory_space<vmem>>, vector<1x8x24xf32>
    %95 = vector.shape_cast %94 : vector<1x8x24xf32> to vector<8x24xf32>
    %cst_86 = arith.constant dense<0.000000e+00> : vector<64x24xf32>
    %96 = tpu.matmul %93, %95, %cst_86 {dimension_numbers = #tpu.dot_dimension_numbers<[1], [0], [0], [1], [0, 0, 1, 1], [], []>} : vector<64x8xf32>, vector<8x24xf32>, vector<64x24xf32> -> vector<64x24xf32>
    %97 = arith.addf %91, %96 : vector<64x24xf32>
    %c3_87 = arith.constant 3 : index
    %c0_88 = arith.constant 0 : index
    %c0_89 = arith.constant 0 : index
    %98 = vector.load %arg10[%c3_87, %c0_88, %c0_89] : memref<9x64x8xf32, #tpu.memory_space<vmem>>, vector<1x64x8xf32>
    %99 = vector.shape_cast %98 : vector<1x64x8xf32> to vector<64x8xf32>
    %c3_90 = arith.constant 3 : index
    %c0_91 = arith.constant 0 : index
    %c0_92 = arith.constant 0 : index
    %100 = vector.load %arg3[%c3_90, %c0_91, %c0_92] : memref<9x8x24xf32, #tpu.memory_space<vmem>>, vector<1x8x24xf32>
    %101 = vector.shape_cast %100 : vector<1x8x24xf32> to vector<8x24xf32>
    %cst_93 = arith.constant dense<0.000000e+00> : vector<64x24xf32>
    %102 = tpu.matmul %99, %101, %cst_93 {dimension_numbers = #tpu.dot_dimension_numbers<[1], [0], [0], [1], [0, 0, 1, 1], [], []>} : vector<64x8xf32>, vector<8x24xf32>, vector<64x24xf32> -> vector<64x24xf32>
    %103 = arith.addf %97, %102 : vector<64x24xf32>
    %c4_94 = arith.constant 4 : index
    %c0_95 = arith.constant 0 : index
    %c0_96 = arith.constant 0 : index
    %104 = vector.load %arg10[%c4_94, %c0_95, %c0_96] : memref<9x64x8xf32, #tpu.memory_space<vmem>>, vector<1x64x8xf32>
    %105 = vector.shape_cast %104 : vector<1x64x8xf32> to vector<64x8xf32>
    %c4_97 = arith.constant 4 : index
    %c0_98 = arith.constant 0 : index
    %c0_99 = arith.constant 0 : index
    %106 = vector.load %arg3[%c4_97, %c0_98, %c0_99] : memref<9x8x24xf32, #tpu.memory_space<vmem>>, vector<1x8x24xf32>
    %107 = vector.shape_cast %106 : vector<1x8x24xf32> to vector<8x24xf32>
    %cst_100 = arith.constant dense<0.000000e+00> : vector<64x24xf32>
    %108 = tpu.matmul %105, %107, %cst_100 {dimension_numbers = #tpu.dot_dimension_numbers<[1], [0], [0], [1], [0, 0, 1, 1], [], []>} : vector<64x8xf32>, vector<8x24xf32>, vector<64x24xf32> -> vector<64x24xf32>
    %109 = arith.addf %103, %108 : vector<64x24xf32>
    %c5_101 = arith.constant 5 : index
    %c0_102 = arith.constant 0 : index
    %c0_103 = arith.constant 0 : index
    %110 = vector.load %arg10[%c5_101, %c0_102, %c0_103] : memref<9x64x8xf32, #tpu.memory_space<vmem>>, vector<1x64x8xf32>
    %111 = vector.shape_cast %110 : vector<1x64x8xf32> to vector<64x8xf32>
    %c5_104 = arith.constant 5 : index
    %c0_105 = arith.constant 0 : index
    %c0_106 = arith.constant 0 : index
    %112 = vector.load %arg3[%c5_104, %c0_105, %c0_106] : memref<9x8x24xf32, #tpu.memory_space<vmem>>, vector<1x8x24xf32>
    %113 = vector.shape_cast %112 : vector<1x8x24xf32> to vector<8x24xf32>
    %cst_107 = arith.constant dense<0.000000e+00> : vector<64x24xf32>
    %114 = tpu.matmul %111, %113, %cst_107 {dimension_numbers = #tpu.dot_dimension_numbers<[1], [0], [0], [1], [0, 0, 1, 1], [], []>} : vector<64x8xf32>, vector<8x24xf32>, vector<64x24xf32> -> vector<64x24xf32>
    %115 = arith.addf %109, %114 : vector<64x24xf32>
    %c6_108 = arith.constant 6 : index
    %c0_109 = arith.constant 0 : index
    %c0_110 = arith.constant 0 : index
    %116 = vector.load %arg10[%c6_108, %c0_109, %c0_110] : memref<9x64x8xf32, #tpu.memory_space<vmem>>, vector<1x64x8xf32>
    %117 = vector.shape_cast %116 : vector<1x64x8xf32> to vector<64x8xf32>
    %c6_111 = arith.constant 6 : index
    %c0_112 = arith.constant 0 : index
    %c0_113 = arith.constant 0 : index
    %118 = vector.load %arg3[%c6_111, %c0_112, %c0_113] : memref<9x8x24xf32, #tpu.memory_space<vmem>>, vector<1x8x24xf32>
    %119 = vector.shape_cast %118 : vector<1x8x24xf32> to vector<8x24xf32>
    %cst_114 = arith.constant dense<0.000000e+00> : vector<64x24xf32>
    %120 = tpu.matmul %117, %119, %cst_114 {dimension_numbers = #tpu.dot_dimension_numbers<[1], [0], [0], [1], [0, 0, 1, 1], [], []>} : vector<64x8xf32>, vector<8x24xf32>, vector<64x24xf32> -> vector<64x24xf32>
    %121 = arith.addf %115, %120 : vector<64x24xf32>
    %c7_115 = arith.constant 7 : index
    %c0_116 = arith.constant 0 : index
    %c0_117 = arith.constant 0 : index
    %122 = vector.load %arg10[%c7_115, %c0_116, %c0_117] : memref<9x64x8xf32, #tpu.memory_space<vmem>>, vector<1x64x8xf32>
    %123 = vector.shape_cast %122 : vector<1x64x8xf32> to vector<64x8xf32>
    %c7_118 = arith.constant 7 : index
    %c0_119 = arith.constant 0 : index
    %c0_120 = arith.constant 0 : index
    %124 = vector.load %arg3[%c7_118, %c0_119, %c0_120] : memref<9x8x24xf32, #tpu.memory_space<vmem>>, vector<1x8x24xf32>
    %125 = vector.shape_cast %124 : vector<1x8x24xf32> to vector<8x24xf32>
    %cst_121 = arith.constant dense<0.000000e+00> : vector<64x24xf32>
    %126 = tpu.matmul %123, %125, %cst_121 {dimension_numbers = #tpu.dot_dimension_numbers<[1], [0], [0], [1], [0, 0, 1, 1], [], []>} : vector<64x8xf32>, vector<8x24xf32>, vector<64x24xf32> -> vector<64x24xf32>
    %127 = arith.addf %121, %126 : vector<64x24xf32>
    %c8_122 = arith.constant 8 : index
    %c0_123 = arith.constant 0 : index
    %c0_124 = arith.constant 0 : index
    %128 = vector.load %arg10[%c8_122, %c0_123, %c0_124] : memref<9x64x8xf32, #tpu.memory_space<vmem>>, vector<1x64x8xf32>
    %129 = vector.shape_cast %128 : vector<1x64x8xf32> to vector<64x8xf32>
    %c8_125 = arith.constant 8 : index
    %c0_126 = arith.constant 0 : index
    %c0_127 = arith.constant 0 : index
    %130 = vector.load %arg3[%c8_125, %c0_126, %c0_127] : memref<9x8x24xf32, #tpu.memory_space<vmem>>, vector<1x8x24xf32>
    %131 = vector.shape_cast %130 : vector<1x8x24xf32> to vector<8x24xf32>
    %cst_128 = arith.constant dense<0.000000e+00> : vector<64x24xf32>
    %132 = tpu.matmul %129, %131, %cst_128 {dimension_numbers = #tpu.dot_dimension_numbers<[1], [0], [0], [1], [0, 0, 1, 1], [], []>} : vector<64x8xf32>, vector<8x24xf32>, vector<64x24xf32> -> vector<64x24xf32>
    %133 = arith.addf %127, %132 : vector<64x24xf32>
    %134 = vector.extract_strided_slice %133 {offsets = [0, 0], sizes = [64, 8], strides = [1, 1]} : vector<64x24xf32> to vector<64x8xf32>
    %c0_129 = arith.constant 0 : index
    %c0_130 = arith.constant 0 : index
    %c0_131 = arith.constant 0 : index
    %135 = vector.load %arg6[%c0_129, %c0_130, %c0_131] : memref<6x1x8xf32, #tpu.memory_space<vmem>>, vector<1x1x8xf32>
    %136 = vector.shape_cast %135 : vector<1x1x8xf32> to vector<1x8xf32>
    %137 = vector.broadcast %136 : vector<1x8xf32> to vector<64x8xf32>
    %138 = arith.addf %134, %137 : vector<64x8xf32>
    %c0_132 = arith.constant 0 : index
    %c0_133 = arith.constant 0 : index
    %139 = memref.load %arg1[%c0_132, %c0_133] : memref<6x2xf32, #tpu.memory_space<smem>>
    %140 = vector.broadcast %139 : f32 to vector<64x8xf32>
    %141 = arith.mulf %140, %5 : vector<64x8xf32>
    %142 = arith.addf %138, %141 : vector<64x8xf32>
    %c0_134 = arith.constant 0 : index
    %c1_135 = arith.constant 1 : index
    %143 = memref.load %arg1[%c0_134, %c1_135] : memref<6x2xf32, #tpu.memory_space<smem>>
    %144 = vector.broadcast %143 : f32 to vector<64x8xf32>
    %145 = arith.mulf %144, %80 : vector<64x8xf32>
    %146 = arith.addf %142, %145 : vector<64x8xf32>
    %147 = vector.extract_strided_slice %133 {offsets = [0, 8], sizes = [64, 8], strides = [1, 1]} : vector<64x24xf32> to vector<64x8xf32>
    %c1_136 = arith.constant 1 : index
    %c0_137 = arith.constant 0 : index
    %c0_138 = arith.constant 0 : index
    %148 = vector.load %arg6[%c1_136, %c0_137, %c0_138] : memref<6x1x8xf32, #tpu.memory_space<vmem>>, vector<1x1x8xf32>
    %149 = vector.shape_cast %148 : vector<1x1x8xf32> to vector<1x8xf32>
    %150 = vector.broadcast %149 : vector<1x8xf32> to vector<64x8xf32>
    %151 = arith.addf %147, %150 : vector<64x8xf32>
    %c1_139 = arith.constant 1 : index
    %c0_140 = arith.constant 0 : index
    %152 = memref.load %arg1[%c1_139, %c0_140] : memref<6x2xf32, #tpu.memory_space<smem>>
    %153 = vector.broadcast %152 : f32 to vector<64x8xf32>
    %154 = arith.mulf %153, %5 : vector<64x8xf32>
    %155 = arith.addf %151, %154 : vector<64x8xf32>
    %c1_141 = arith.constant 1 : index
    %c1_142 = arith.constant 1 : index
    %156 = memref.load %arg1[%c1_141, %c1_142] : memref<6x2xf32, #tpu.memory_space<smem>>
    %157 = vector.broadcast %156 : f32 to vector<64x8xf32>
    %158 = arith.mulf %157, %80 : vector<64x8xf32>
    %159 = arith.addf %155, %158 : vector<64x8xf32>
    %160 = vector.extract_strided_slice %133 {offsets = [0, 16], sizes = [64, 8], strides = [1, 1]} : vector<64x24xf32> to vector<64x8xf32>
    %c3_143 = arith.constant 3 : index
    %c0_144 = arith.constant 0 : index
    %c0_145 = arith.constant 0 : index
    %161 = vector.load %arg6[%c3_143, %c0_144, %c0_145] : memref<6x1x8xf32, #tpu.memory_space<vmem>>, vector<1x1x8xf32>
    %162 = vector.shape_cast %161 : vector<1x1x8xf32> to vector<1x8xf32>
    %163 = vector.broadcast %162 : vector<1x8xf32> to vector<64x8xf32>
    %164 = arith.addf %160, %163 : vector<64x8xf32>
    %c3_146 = arith.constant 3 : index
    %c0_147 = arith.constant 0 : index
    %165 = memref.load %arg1[%c3_146, %c0_147] : memref<6x2xf32, #tpu.memory_space<smem>>
    %166 = vector.broadcast %165 : f32 to vector<64x8xf32>
    %167 = arith.mulf %166, %5 : vector<64x8xf32>
    %168 = arith.addf %164, %167 : vector<64x8xf32>
    %c3_148 = arith.constant 3 : index
    %c1_149 = arith.constant 1 : index
    %169 = memref.load %arg1[%c3_148, %c1_149] : memref<6x2xf32, #tpu.memory_space<smem>>
    %170 = vector.broadcast %169 : f32 to vector<64x8xf32>
    %171 = arith.mulf %170, %80 : vector<64x8xf32>
    %172 = arith.addf %168, %171 : vector<64x8xf32>
    %173 = vector.shape_cast %146 : vector<64x8xf32> to vector<8x8x8xf32>
    %c1_150 = arith.constant 1 : index
    %c1_151 = arith.constant 1 : index
    %c0_152 = arith.constant 0 : index
    %174 = vector.load %arg9[%c1_150, %c1_151, %c0_152] : memref<10x10x8xf32, #tpu.memory_space<vmem>>, vector<8x8x8xf32>
    tpu.vector_store %arg9[%c1_150, %c1_151, %c0_152], %173 {strides = array<i32>} : memref<10x10x8xf32, #tpu.memory_space<vmem>>, vector<8x8x8xf32>,
    %c0_153 = arith.constant 0 : index
    %c0_154 = arith.constant 0 : index
    %c0_155 = arith.constant 0 : index
    %175 = vector.load %arg9[%c0_153, %c0_154, %c0_155] : memref<10x10x8xf32, #tpu.memory_space<vmem>>, vector<8x8x8xf32>
    %176 = vector.shape_cast %175 : vector<8x8x8xf32> to vector<64x8xf32>
    %cst_156 = arith.constant 0.000000e+00 : f32
    %177 = vector.broadcast %cst_156 : f32 to vector<64x8xf32>
    %178 = arith.maximumf %176, %177 : vector<64x8xf32>
    %c0_157 = arith.constant 0 : index
    %c0_158 = arith.constant 0 : index
    %c0_159 = arith.constant 0 : index
    %179 = vector.load %arg10[%c0_157, %c0_158, %c0_159] : memref<9x64x8xf32, #tpu.memory_space<vmem>>, vector<1x64x8xf32>
    %180 = vector.shape_cast %179 : vector<1x64x8xf32> to vector<64x8xf32>
    %181 = vector.shape_cast %178 : vector<64x8xf32> to vector<1x64x8xf32>
    tpu.vector_store %arg10[%c0_157, %c0_158, %c0_159], %181 {strides = array<i32>} : memref<9x64x8xf32, #tpu.memory_space<vmem>>, vector<1x64x8xf32>,
    %c0_160 = arith.constant 0 : index
    %c1_161 = arith.constant 1 : index
    %c0_162 = arith.constant 0 : index
    %182 = vector.load %arg9[%c0_160, %c1_161, %c0_162] : memref<10x10x8xf32, #tpu.memory_space<vmem>>, vector<8x8x8xf32>
    %183 = vector.shape_cast %182 : vector<8x8x8xf32> to vector<64x8xf32>
    %184 = arith.addf %176, %183 : vector<64x8xf32>
    %cst_163 = arith.constant 0.000000e+00 : f32
    %185 = vector.broadcast %cst_163 : f32 to vector<64x8xf32>
    %186 = arith.maximumf %183, %185 : vector<64x8xf32>
    %c1_164 = arith.constant 1 : index
    %c0_165 = arith.constant 0 : index
    %c0_166 = arith.constant 0 : index
    %187 = vector.load %arg10[%c1_164, %c0_165, %c0_166] : memref<9x64x8xf32, #tpu.memory_space<vmem>>, vector<1x64x8xf32>
    %188 = vector.shape_cast %187 : vector<1x64x8xf32> to vector<64x8xf32>
    %189 = vector.shape_cast %186 : vector<64x8xf32> to vector<1x64x8xf32>
    tpu.vector_store %arg10[%c1_164, %c0_165, %c0_166], %189 {strides = array<i32>} : memref<9x64x8xf32, #tpu.memory_space<vmem>>, vector<1x64x8xf32>,
    %c0_167 = arith.constant 0 : index
    %c2_168 = arith.constant 2 : index
    %c0_169 = arith.constant 0 : index
    %190 = vector.load %arg9[%c0_167, %c2_168, %c0_169] : memref<10x10x8xf32, #tpu.memory_space<vmem>>, vector<8x8x8xf32>
    %191 = vector.shape_cast %190 : vector<8x8x8xf32> to vector<64x8xf32>
    %192 = arith.addf %184, %191 : vector<64x8xf32>
    %cst_170 = arith.constant 0.000000e+00 : f32
    %193 = vector.broadcast %cst_170 : f32 to vector<64x8xf32>
    %194 = arith.maximumf %191, %193 : vector<64x8xf32>
    %c2_171 = arith.constant 2 : index
    %c0_172 = arith.constant 0 : index
    %c0_173 = arith.constant 0 : index
    %195 = vector.load %arg10[%c2_171, %c0_172, %c0_173] : memref<9x64x8xf32, #tpu.memory_space<vmem>>, vector<1x64x8xf32>
    %196 = vector.shape_cast %195 : vector<1x64x8xf32> to vector<64x8xf32>
    %197 = vector.shape_cast %194 : vector<64x8xf32> to vector<1x64x8xf32>
    tpu.vector_store %arg10[%c2_171, %c0_172, %c0_173], %197 {strides = array<i32>} : memref<9x64x8xf32, #tpu.memory_space<vmem>>, vector<1x64x8xf32>,
    %c1_174 = arith.constant 1 : index
    %c0_175 = arith.constant 0 : index
    %c0_176 = arith.constant 0 : index
    %198 = vector.load %arg9[%c1_174, %c0_175, %c0_176] : memref<10x10x8xf32, #tpu.memory_space<vmem>>, vector<8x8x8xf32>
    %199 = vector.shape_cast %198 : vector<8x8x8xf32> to vector<64x8xf32>
    %200 = arith.addf %192, %199 : vector<64x8xf32>
    %cst_177 = arith.constant 0.000000e+00 : f32
    %201 = vector.broadcast %cst_177 : f32 to vector<64x8xf32>
    %202 = arith.maximumf %199, %201 : vector<64x8xf32>
    %c3_178 = arith.constant 3 : index
    %c0_179 = arith.constant 0 : index
    %c0_180 = arith.constant 0 : index
    %203 = vector.load %arg10[%c3_178, %c0_179, %c0_180] : memref<9x64x8xf32, #tpu.memory_space<vmem>>, vector<1x64x8xf32>
    %204 = vector.shape_cast %203 : vector<1x64x8xf32> to vector<64x8xf32>
    %205 = vector.shape_cast %202 : vector<64x8xf32> to vector<1x64x8xf32>
    tpu.vector_store %arg10[%c3_178, %c0_179, %c0_180], %205 {strides = array<i32>} : memref<9x64x8xf32, #tpu.memory_space<vmem>>, vector<1x64x8xf32>,
    %c1_181 = arith.constant 1 : index
    %c1_182 = arith.constant 1 : index
    %c0_183 = arith.constant 0 : index
    %206 = vector.load %arg9[%c1_181, %c1_182, %c0_183] : memref<10x10x8xf32, #tpu.memory_space<vmem>>, vector<8x8x8xf32>
    %207 = vector.shape_cast %206 : vector<8x8x8xf32> to vector<64x8xf32>
    %208 = arith.addf %200, %207 : vector<64x8xf32>
    %cst_184 = arith.constant 0.000000e+00 : f32
    %209 = vector.broadcast %cst_184 : f32 to vector<64x8xf32>
    %210 = arith.maximumf %207, %209 : vector<64x8xf32>
    %c4_185 = arith.constant 4 : index
    %c0_186 = arith.constant 0 : index
    %c0_187 = arith.constant 0 : index
    %211 = vector.load %arg10[%c4_185, %c0_186, %c0_187] : memref<9x64x8xf32, #tpu.memory_space<vmem>>, vector<1x64x8xf32>
    %212 = vector.shape_cast %211 : vector<1x64x8xf32> to vector<64x8xf32>
    %213 = vector.shape_cast %210 : vector<64x8xf32> to vector<1x64x8xf32>
    tpu.vector_store %arg10[%c4_185, %c0_186, %c0_187], %213 {strides = array<i32>} : memref<9x64x8xf32, #tpu.memory_space<vmem>>, vector<1x64x8xf32>,
    %c1_188 = arith.constant 1 : index
    %c2_189 = arith.constant 2 : index
    %c0_190 = arith.constant 0 : index
    %214 = vector.load %arg9[%c1_188, %c2_189, %c0_190] : memref<10x10x8xf32, #tpu.memory_space<vmem>>, vector<8x8x8xf32>
    %215 = vector.shape_cast %214 : vector<8x8x8xf32> to vector<64x8xf32>
    %216 = arith.addf %208, %215 : vector<64x8xf32>
    %cst_191 = arith.constant 0.000000e+00 : f32
    %217 = vector.broadcast %cst_191 : f32 to vector<64x8xf32>
    %218 = arith.maximumf %215, %217 : vector<64x8xf32>
    %c5_192 = arith.constant 5 : index
    %c0_193 = arith.constant 0 : index
    %c0_194 = arith.constant 0 : index
    %219 = vector.load %arg10[%c5_192, %c0_193, %c0_194] : memref<9x64x8xf32, #tpu.memory_space<vmem>>, vector<1x64x8xf32>
    %220 = vector.shape_cast %219 : vector<1x64x8xf32> to vector<64x8xf32>
    %221 = vector.shape_cast %218 : vector<64x8xf32> to vector<1x64x8xf32>
    tpu.vector_store %arg10[%c5_192, %c0_193, %c0_194], %221 {strides = array<i32>} : memref<9x64x8xf32, #tpu.memory_space<vmem>>, vector<1x64x8xf32>,
    %c2_195 = arith.constant 2 : index
    %c0_196 = arith.constant 0 : index
    %c0_197 = arith.constant 0 : index
    %222 = vector.load %arg9[%c2_195, %c0_196, %c0_197] : memref<10x10x8xf32, #tpu.memory_space<vmem>>, vector<8x8x8xf32>
    %223 = vector.shape_cast %222 : vector<8x8x8xf32> to vector<64x8xf32>
    %224 = arith.addf %216, %223 : vector<64x8xf32>
    %cst_198 = arith.constant 0.000000e+00 : f32
    %225 = vector.broadcast %cst_198 : f32 to vector<64x8xf32>
    %226 = arith.maximumf %223, %225 : vector<64x8xf32>
    %c6_199 = arith.constant 6 : index
    %c0_200 = arith.constant 0 : index
    %c0_201 = arith.constant 0 : index
    %227 = vector.load %arg10[%c6_199, %c0_200, %c0_201] : memref<9x64x8xf32, #tpu.memory_space<vmem>>, vector<1x64x8xf32>
    %228 = vector.shape_cast %227 : vector<1x64x8xf32> to vector<64x8xf32>
    %229 = vector.shape_cast %226 : vector<64x8xf32> to vector<1x64x8xf32>
    tpu.vector_store %arg10[%c6_199, %c0_200, %c0_201], %229 {strides = array<i32>} : memref<9x64x8xf32, #tpu.memory_space<vmem>>, vector<1x64x8xf32>,
    %c2_202 = arith.constant 2 : index
    %c1_203 = arith.constant 1 : index
    %c0_204 = arith.constant 0 : index
    %230 = vector.load %arg9[%c2_202, %c1_203, %c0_204] : memref<10x10x8xf32, #tpu.memory_space<vmem>>, vector<8x8x8xf32>
    %231 = vector.shape_cast %230 : vector<8x8x8xf32> to vector<64x8xf32>
    %232 = arith.addf %224, %231 : vector<64x8xf32>
    %cst_205 = arith.constant 0.000000e+00 : f32
    %233 = vector.broadcast %cst_205 : f32 to vector<64x8xf32>
    %234 = arith.maximumf %231, %233 : vector<64x8xf32>
    %c7_206 = arith.constant 7 : index
    %c0_207 = arith.constant 0 : index
    %c0_208 = arith.constant 0 : index
    %235 = vector.load %arg10[%c7_206, %c0_207, %c0_208] : memref<9x64x8xf32, #tpu.memory_space<vmem>>, vector<1x64x8xf32>
    %236 = vector.shape_cast %235 : vector<1x64x8xf32> to vector<64x8xf32>
    %237 = vector.shape_cast %234 : vector<64x8xf32> to vector<1x64x8xf32>
    tpu.vector_store %arg10[%c7_206, %c0_207, %c0_208], %237 {strides = array<i32>} : memref<9x64x8xf32, #tpu.memory_space<vmem>>, vector<1x64x8xf32>,
    %c2_209 = arith.constant 2 : index
    %c2_210 = arith.constant 2 : index
    %c0_211 = arith.constant 0 : index
    %238 = vector.load %arg9[%c2_209, %c2_210, %c0_211] : memref<10x10x8xf32, #tpu.memory_space<vmem>>, vector<8x8x8xf32>
    %239 = vector.shape_cast %238 : vector<8x8x8xf32> to vector<64x8xf32>
    %240 = arith.addf %232, %239 : vector<64x8xf32>
    %cst_212 = arith.constant 0.000000e+00 : f32
    %241 = vector.broadcast %cst_212 : f32 to vector<64x8xf32>
    %242 = arith.maximumf %239, %241 : vector<64x8xf32>
    %c8_213 = arith.constant 8 : index
    %c0_214 = arith.constant 0 : index
    %c0_215 = arith.constant 0 : index
    %243 = vector.load %arg10[%c8_213, %c0_214, %c0_215] : memref<9x64x8xf32, #tpu.memory_space<vmem>>, vector<1x64x8xf32>
    %244 = vector.shape_cast %243 : vector<1x64x8xf32> to vector<64x8xf32>
    %245 = vector.shape_cast %242 : vector<64x8xf32> to vector<1x64x8xf32>
    tpu.vector_store %arg10[%c8_213, %c0_214, %c0_215], %245 {strides = array<i32>} : memref<9x64x8xf32, #tpu.memory_space<vmem>>, vector<1x64x8xf32>,
    %246 = vector.broadcast %0 : vector<64x1xf32> to vector<64x8xf32>
    %247 = arith.mulf %240, %246 : vector<64x8xf32>
    %c0_216 = arith.constant 0 : index
    %c0_217 = arith.constant 0 : index
    %c0_218 = arith.constant 0 : index
    %248 = vector.load %arg10[%c0_216, %c0_217, %c0_218] : memref<9x64x8xf32, #tpu.memory_space<vmem>>, vector<1x64x8xf32>
    %249 = vector.shape_cast %248 : vector<1x64x8xf32> to vector<64x8xf32>
    %c0_219 = arith.constant 0 : index
    %c0_220 = arith.constant 0 : index
    %c0_221 = arith.constant 0 : index
    %250 = vector.load %arg4[%c0_219, %c0_220, %c0_221] : memref<9x8x16xf32, #tpu.memory_space<vmem>>, vector<1x8x16xf32>
    %251 = vector.shape_cast %250 : vector<1x8x16xf32> to vector<8x16xf32>
    %cst_222 = arith.constant dense<0.000000e+00> : vector<64x16xf32>
    %252 = tpu.matmul %249, %251, %cst_222 {dimension_numbers = #tpu.dot_dimension_numbers<[1], [0], [0], [1], [0, 0, 1, 1], [], []>} : vector<64x8xf32>, vector<8x16xf32>, vector<64x16xf32> -> vector<64x16xf32>
    %c1_223 = arith.constant 1 : index
    %c0_224 = arith.constant 0 : index
    %c0_225 = arith.constant 0 : index
    %253 = vector.load %arg10[%c1_223, %c0_224, %c0_225] : memref<9x64x8xf32, #tpu.memory_space<vmem>>, vector<1x64x8xf32>
    %254 = vector.shape_cast %253 : vector<1x64x8xf32> to vector<64x8xf32>
    %c1_226 = arith.constant 1 : index
    %c0_227 = arith.constant 0 : index
    %c0_228 = arith.constant 0 : index
    %255 = vector.load %arg4[%c1_226, %c0_227, %c0_228] : memref<9x8x16xf32, #tpu.memory_space<vmem>>, vector<1x8x16xf32>
    %256 = vector.shape_cast %255 : vector<1x8x16xf32> to vector<8x16xf32>
    %cst_229 = arith.constant dense<0.000000e+00> : vector<64x16xf32>
    %257 = tpu.matmul %254, %256, %cst_229 {dimension_numbers = #tpu.dot_dimension_numbers<[1], [0], [0], [1], [0, 0, 1, 1], [], []>} : vector<64x8xf32>, vector<8x16xf32>, vector<64x16xf32> -> vector<64x16xf32>
    %258 = arith.addf %252, %257 : vector<64x16xf32>
    %c2_230 = arith.constant 2 : index
    %c0_231 = arith.constant 0 : index
    %c0_232 = arith.constant 0 : index
    %259 = vector.load %arg10[%c2_230, %c0_231, %c0_232] : memref<9x64x8xf32, #tpu.memory_space<vmem>>, vector<1x64x8xf32>
    %260 = vector.shape_cast %259 : vector<1x64x8xf32> to vector<64x8xf32>
    %c2_233 = arith.constant 2 : index
    %c0_234 = arith.constant 0 : index
    %c0_235 = arith.constant 0 : index
    %261 = vector.load %arg4[%c2_233, %c0_234, %c0_235] : memref<9x8x16xf32, #tpu.memory_space<vmem>>, vector<1x8x16xf32>
    %262 = vector.shape_cast %261 : vector<1x8x16xf32> to vector<8x16xf32>
    %cst_236 = arith.constant dense<0.000000e+00> : vector<64x16xf32>
    %263 = tpu.matmul %260, %262, %cst_236 {dimension_numbers = #tpu.dot_dimension_numbers<[1], [0], [0], [1], [0, 0, 1, 1], [], []>} : vector<64x8xf32>, vector<8x16xf32>, vector<64x16xf32> -> vector<64x16xf32>
    %264 = arith.addf %258, %263 : vector<64x16xf32>
    %c3_237 = arith.constant 3 : index
    %c0_238 = arith.constant 0 : index
    %c0_239 = arith.constant 0 : index
    %265 = vector.load %arg10[%c3_237, %c0_238, %c0_239] : memref<9x64x8xf32, #tpu.memory_space<vmem>>, vector<1x64x8xf32>
    %266 = vector.shape_cast %265 : vector<1x64x8xf32> to vector<64x8xf32>
    %c3_240 = arith.constant 3 : index
    %c0_241 = arith.constant 0 : index
    %c0_242 = arith.constant 0 : index
    %267 = vector.load %arg4[%c3_240, %c0_241, %c0_242] : memref<9x8x16xf32, #tpu.memory_space<vmem>>, vector<1x8x16xf32>
    %268 = vector.shape_cast %267 : vector<1x8x16xf32> to vector<8x16xf32>
    %cst_243 = arith.constant dense<0.000000e+00> : vector<64x16xf32>
    %269 = tpu.matmul %266, %268, %cst_243 {dimension_numbers = #tpu.dot_dimension_numbers<[1], [0], [0], [1], [0, 0, 1, 1], [], []>} : vector<64x8xf32>, vector<8x16xf32>, vector<64x16xf32> -> vector<64x16xf32>
    %270 = arith.addf %264, %269 : vector<64x16xf32>
    %c4_244 = arith.constant 4 : index
    %c0_245 = arith.constant 0 : index
    %c0_246 = arith.constant 0 : index
    %271 = vector.load %arg10[%c4_244, %c0_245, %c0_246] : memref<9x64x8xf32, #tpu.memory_space<vmem>>, vector<1x64x8xf32>
    %272 = vector.shape_cast %271 : vector<1x64x8xf32> to vector<64x8xf32>
    %c4_247 = arith.constant 4 : index
    %c0_248 = arith.constant 0 : index
    %c0_249 = arith.constant 0 : index
    %273 = vector.load %arg4[%c4_247, %c0_248, %c0_249] : memref<9x8x16xf32, #tpu.memory_space<vmem>>, vector<1x8x16xf32>
    %274 = vector.shape_cast %273 : vector<1x8x16xf32> to vector<8x16xf32>
    %cst_250 = arith.constant dense<0.000000e+00> : vector<64x16xf32>
    %275 = tpu.matmul %272, %274, %cst_250 {dimension_numbers = #tpu.dot_dimension_numbers<[1], [0], [0], [1], [0, 0, 1, 1], [], []>} : vector<64x8xf32>, vector<8x16xf32>, vector<64x16xf32> -> vector<64x16xf32>
    %276 = arith.addf %270, %275 : vector<64x16xf32>
    %c5_251 = arith.constant 5 : index
    %c0_252 = arith.constant 0 : index
    %c0_253 = arith.constant 0 : index
    %277 = vector.load %arg10[%c5_251, %c0_252, %c0_253] : memref<9x64x8xf32, #tpu.memory_space<vmem>>, vector<1x64x8xf32>
    %278 = vector.shape_cast %277 : vector<1x64x8xf32> to vector<64x8xf32>
    %c5_254 = arith.constant 5 : index
    %c0_255 = arith.constant 0 : index
    %c0_256 = arith.constant 0 : index
    %279 = vector.load %arg4[%c5_254, %c0_255, %c0_256] : memref<9x8x16xf32, #tpu.memory_space<vmem>>, vector<1x8x16xf32>
    %280 = vector.shape_cast %279 : vector<1x8x16xf32> to vector<8x16xf32>
    %cst_257 = arith.constant dense<0.000000e+00> : vector<64x16xf32>
    %281 = tpu.matmul %278, %280, %cst_257 {dimension_numbers = #tpu.dot_dimension_numbers<[1], [0], [0], [1], [0, 0, 1, 1], [], []>} : vector<64x8xf32>, vector<8x16xf32>, vector<64x16xf32> -> vector<64x16xf32>
    %282 = arith.addf %276, %281 : vector<64x16xf32>
    %c6_258 = arith.constant 6 : index
    %c0_259 = arith.constant 0 : index
    %c0_260 = arith.constant 0 : index
    %283 = vector.load %arg10[%c6_258, %c0_259, %c0_260] : memref<9x64x8xf32, #tpu.memory_space<vmem>>, vector<1x64x8xf32>
    %284 = vector.shape_cast %283 : vector<1x64x8xf32> to vector<64x8xf32>
    %c6_261 = arith.constant 6 : index
    %c0_262 = arith.constant 0 : index
    %c0_263 = arith.constant 0 : index
    %285 = vector.load %arg4[%c6_261, %c0_262, %c0_263] : memref<9x8x16xf32, #tpu.memory_space<vmem>>, vector<1x8x16xf32>
    %286 = vector.shape_cast %285 : vector<1x8x16xf32> to vector<8x16xf32>
    %cst_264 = arith.constant dense<0.000000e+00> : vector<64x16xf32>
    %287 = tpu.matmul %284, %286, %cst_264 {dimension_numbers = #tpu.dot_dimension_numbers<[1], [0], [0], [1], [0, 0, 1, 1], [], []>} : vector<64x8xf32>, vector<8x16xf32>, vector<64x16xf32> -> vector<64x16xf32>
    %288 = arith.addf %282, %287 : vector<64x16xf32>
    %c7_265 = arith.constant 7 : index
    %c0_266 = arith.constant 0 : index
    %c0_267 = arith.constant 0 : index
    %289 = vector.load %arg10[%c7_265, %c0_266, %c0_267] : memref<9x64x8xf32, #tpu.memory_space<vmem>>, vector<1x64x8xf32>
    %290 = vector.shape_cast %289 : vector<1x64x8xf32> to vector<64x8xf32>
    %c7_268 = arith.constant 7 : index
    %c0_269 = arith.constant 0 : index
    %c0_270 = arith.constant 0 : index
    %291 = vector.load %arg4[%c7_268, %c0_269, %c0_270] : memref<9x8x16xf32, #tpu.memory_space<vmem>>, vector<1x8x16xf32>
    %292 = vector.shape_cast %291 : vector<1x8x16xf32> to vector<8x16xf32>
    %cst_271 = arith.constant dense<0.000000e+00> : vector<64x16xf32>
    %293 = tpu.matmul %290, %292, %cst_271 {dimension_numbers = #tpu.dot_dimension_numbers<[1], [0], [0], [1], [0, 0, 1, 1], [], []>} : vector<64x8xf32>, vector<8x16xf32>, vector<64x16xf32> -> vector<64x16xf32>
    %294 = arith.addf %288, %293 : vector<64x16xf32>
    %c8_272 = arith.constant 8 : index
    %c0_273 = arith.constant 0 : index
    %c0_274 = arith.constant 0 : index
    %295 = vector.load %arg10[%c8_272, %c0_273, %c0_274] : memref<9x64x8xf32, #tpu.memory_space<vmem>>, vector<1x64x8xf32>
    %296 = vector.shape_cast %295 : vector<1x64x8xf32> to vector<64x8xf32>
    %c8_275 = arith.constant 8 : index
    %c0_276 = arith.constant 0 : index
    %c0_277 = arith.constant 0 : index
    %297 = vector.load %arg4[%c8_275, %c0_276, %c0_277] : memref<9x8x16xf32, #tpu.memory_space<vmem>>, vector<1x8x16xf32>
    %298 = vector.shape_cast %297 : vector<1x8x16xf32> to vector<8x16xf32>
    %cst_278 = arith.constant dense<0.000000e+00> : vector<64x16xf32>
    %299 = tpu.matmul %296, %298, %cst_278 {dimension_numbers = #tpu.dot_dimension_numbers<[1], [0], [0], [1], [0, 0, 1, 1], [], []>} : vector<64x8xf32>, vector<8x16xf32>, vector<64x16xf32> -> vector<64x16xf32>
    %300 = arith.addf %294, %299 : vector<64x16xf32>
    %301 = vector.extract_strided_slice %300 {offsets = [0, 0], sizes = [64, 8], strides = [1, 1]} : vector<64x16xf32> to vector<64x8xf32>
    %c2_279 = arith.constant 2 : index
    %c0_280 = arith.constant 0 : index
    %c0_281 = arith.constant 0 : index
    %302 = vector.load %arg6[%c2_279, %c0_280, %c0_281] : memref<6x1x8xf32, #tpu.memory_space<vmem>>, vector<1x1x8xf32>
    %303 = vector.shape_cast %302 : vector<1x1x8xf32> to vector<1x8xf32>
    %304 = vector.broadcast %303 : vector<1x8xf32> to vector<64x8xf32>
    %305 = arith.addf %301, %304 : vector<64x8xf32>
    %c2_282 = arith.constant 2 : index
    %c0_283 = arith.constant 0 : index
    %306 = memref.load %arg1[%c2_282, %c0_283] : memref<6x2xf32, #tpu.memory_space<smem>>
    %307 = vector.broadcast %306 : f32 to vector<64x8xf32>
    %308 = arith.mulf %307, %146 : vector<64x8xf32>
    %309 = arith.addf %305, %308 : vector<64x8xf32>
    %c2_284 = arith.constant 2 : index
    %c1_285 = arith.constant 1 : index
    %310 = memref.load %arg1[%c2_284, %c1_285] : memref<6x2xf32, #tpu.memory_space<smem>>
    %311 = vector.broadcast %310 : f32 to vector<64x8xf32>
    %312 = arith.mulf %311, %247 : vector<64x8xf32>
    %313 = arith.addf %309, %312 : vector<64x8xf32>
    %314 = arith.addf %159, %313 : vector<64x8xf32>
    %315 = vector.extract_strided_slice %300 {offsets = [0, 8], sizes = [64, 8], strides = [1, 1]} : vector<64x16xf32> to vector<64x8xf32>
    %c4_286 = arith.constant 4 : index
    %c0_287 = arith.constant 0 : index
    %c0_288 = arith.constant 0 : index
    %316 = vector.load %arg6[%c4_286, %c0_287, %c0_288] : memref<6x1x8xf32, #tpu.memory_space<vmem>>, vector<1x1x8xf32>
    %317 = vector.shape_cast %316 : vector<1x1x8xf32> to vector<1x8xf32>
    %318 = vector.broadcast %317 : vector<1x8xf32> to vector<64x8xf32>
    %319 = arith.addf %315, %318 : vector<64x8xf32>
    %c4_289 = arith.constant 4 : index
    %c0_290 = arith.constant 0 : index
    %320 = memref.load %arg1[%c4_289, %c0_290] : memref<6x2xf32, #tpu.memory_space<smem>>
    %321 = vector.broadcast %320 : f32 to vector<64x8xf32>
    %322 = arith.mulf %321, %146 : vector<64x8xf32>
    %323 = arith.addf %319, %322 : vector<64x8xf32>
    %c4_291 = arith.constant 4 : index
    %c1_292 = arith.constant 1 : index
    %324 = memref.load %arg1[%c4_291, %c1_292] : memref<6x2xf32, #tpu.memory_space<smem>>
    %325 = vector.broadcast %324 : f32 to vector<64x8xf32>
    %326 = arith.mulf %325, %247 : vector<64x8xf32>
    %327 = arith.addf %323, %326 : vector<64x8xf32>
    %328 = arith.addf %172, %327 : vector<64x8xf32>
    %329 = vector.shape_cast %314 : vector<64x8xf32> to vector<8x8x8xf32>
    %c1_293 = arith.constant 1 : index
    %c1_294 = arith.constant 1 : index
    %c0_295 = arith.constant 0 : index
    %330 = vector.load %arg9[%c1_293, %c1_294, %c0_295] : memref<10x10x8xf32, #tpu.memory_space<vmem>>, vector<8x8x8xf32>
    tpu.vector_store %arg9[%c1_293, %c1_294, %c0_295], %329 {strides = array<i32>} : memref<10x10x8xf32, #tpu.memory_space<vmem>>, vector<8x8x8xf32>,
    %c0_296 = arith.constant 0 : index
    %c0_297 = arith.constant 0 : index
    %c0_298 = arith.constant 0 : index
    %331 = vector.load %arg9[%c0_296, %c0_297, %c0_298] : memref<10x10x8xf32, #tpu.memory_space<vmem>>, vector<8x8x8xf32>
    %332 = vector.shape_cast %331 : vector<8x8x8xf32> to vector<64x8xf32>
    %cst_299 = arith.constant 0.000000e+00 : f32
    %333 = vector.broadcast %cst_299 : f32 to vector<64x8xf32>
    %334 = arith.maximumf %332, %333 : vector<64x8xf32>
    %c0_300 = arith.constant 0 : index
    %c0_301 = arith.constant 0 : index
    %c0_302 = arith.constant 0 : index
    %335 = vector.load %arg10[%c0_300, %c0_301, %c0_302] : memref<9x64x8xf32, #tpu.memory_space<vmem>>, vector<1x64x8xf32>
    %336 = vector.shape_cast %335 : vector<1x64x8xf32> to vector<64x8xf32>
    %337 = vector.shape_cast %334 : vector<64x8xf32> to vector<1x64x8xf32>
    tpu.vector_store %arg10[%c0_300, %c0_301, %c0_302], %337 {strides = array<i32>} : memref<9x64x8xf32, #tpu.memory_space<vmem>>, vector<1x64x8xf32>,
    %c0_303 = arith.constant 0 : index
    %c1_304 = arith.constant 1 : index
    %c0_305 = arith.constant 0 : index
    %338 = vector.load %arg9[%c0_303, %c1_304, %c0_305] : memref<10x10x8xf32, #tpu.memory_space<vmem>>, vector<8x8x8xf32>
    %339 = vector.shape_cast %338 : vector<8x8x8xf32> to vector<64x8xf32>
    %340 = arith.addf %332, %339 : vector<64x8xf32>
    %cst_306 = arith.constant 0.000000e+00 : f32
    %341 = vector.broadcast %cst_306 : f32 to vector<64x8xf32>
    %342 = arith.maximumf %339, %341 : vector<64x8xf32>
    %c1_307 = arith.constant 1 : index
    %c0_308 = arith.constant 0 : index
    %c0_309 = arith.constant 0 : index
    %343 = vector.load %arg10[%c1_307, %c0_308, %c0_309] : memref<9x64x8xf32, #tpu.memory_space<vmem>>, vector<1x64x8xf32>
    %344 = vector.shape_cast %343 : vector<1x64x8xf32> to vector<64x8xf32>
    %345 = vector.shape_cast %342 : vector<64x8xf32> to vector<1x64x8xf32>
    tpu.vector_store %arg10[%c1_307, %c0_308, %c0_309], %345 {strides = array<i32>} : memref<9x64x8xf32, #tpu.memory_space<vmem>>, vector<1x64x8xf32>,
    %c0_310 = arith.constant 0 : index
    %c2_311 = arith.constant 2 : index
    %c0_312 = arith.constant 0 : index
    %346 = vector.load %arg9[%c0_310, %c2_311, %c0_312] : memref<10x10x8xf32, #tpu.memory_space<vmem>>, vector<8x8x8xf32>
    %347 = vector.shape_cast %346 : vector<8x8x8xf32> to vector<64x8xf32>
    %348 = arith.addf %340, %347 : vector<64x8xf32>
    %cst_313 = arith.constant 0.000000e+00 : f32
    %349 = vector.broadcast %cst_313 : f32 to vector<64x8xf32>
    %350 = arith.maximumf %347, %349 : vector<64x8xf32>
    %c2_314 = arith.constant 2 : index
    %c0_315 = arith.constant 0 : index
    %c0_316 = arith.constant 0 : index
    %351 = vector.load %arg10[%c2_314, %c0_315, %c0_316] : memref<9x64x8xf32, #tpu.memory_space<vmem>>, vector<1x64x8xf32>
    %352 = vector.shape_cast %351 : vector<1x64x8xf32> to vector<64x8xf32>
    %353 = vector.shape_cast %350 : vector<64x8xf32> to vector<1x64x8xf32>
    tpu.vector_store %arg10[%c2_314, %c0_315, %c0_316], %353 {strides = array<i32>} : memref<9x64x8xf32, #tpu.memory_space<vmem>>, vector<1x64x8xf32>,
    %c1_317 = arith.constant 1 : index
    %c0_318 = arith.constant 0 : index
    %c0_319 = arith.constant 0 : index
    %354 = vector.load %arg9[%c1_317, %c0_318, %c0_319] : memref<10x10x8xf32, #tpu.memory_space<vmem>>, vector<8x8x8xf32>
    %355 = vector.shape_cast %354 : vector<8x8x8xf32> to vector<64x8xf32>
    %356 = arith.addf %348, %355 : vector<64x8xf32>
    %cst_320 = arith.constant 0.000000e+00 : f32
    %357 = vector.broadcast %cst_320 : f32 to vector<64x8xf32>
    %358 = arith.maximumf %355, %357 : vector<64x8xf32>
    %c3_321 = arith.constant 3 : index
    %c0_322 = arith.constant 0 : index
    %c0_323 = arith.constant 0 : index
    %359 = vector.load %arg10[%c3_321, %c0_322, %c0_323] : memref<9x64x8xf32, #tpu.memory_space<vmem>>, vector<1x64x8xf32>
    %360 = vector.shape_cast %359 : vector<1x64x8xf32> to vector<64x8xf32>
    %361 = vector.shape_cast %358 : vector<64x8xf32> to vector<1x64x8xf32>
    tpu.vector_store %arg10[%c3_321, %c0_322, %c0_323], %361 {strides = array<i32>} : memref<9x64x8xf32, #tpu.memory_space<vmem>>, vector<1x64x8xf32>,
    %c1_324 = arith.constant 1 : index
    %c1_325 = arith.constant 1 : index
    %c0_326 = arith.constant 0 : index
    %362 = vector.load %arg9[%c1_324, %c1_325, %c0_326] : memref<10x10x8xf32, #tpu.memory_space<vmem>>, vector<8x8x8xf32>
    %363 = vector.shape_cast %362 : vector<8x8x8xf32> to vector<64x8xf32>
    %364 = arith.addf %356, %363 : vector<64x8xf32>
    %cst_327 = arith.constant 0.000000e+00 : f32
    %365 = vector.broadcast %cst_327 : f32 to vector<64x8xf32>
    %366 = arith.maximumf %363, %365 : vector<64x8xf32>
    %c4_328 = arith.constant 4 : index
    %c0_329 = arith.constant 0 : index
    %c0_330 = arith.constant 0 : index
    %367 = vector.load %arg10[%c4_328, %c0_329, %c0_330] : memref<9x64x8xf32, #tpu.memory_space<vmem>>, vector<1x64x8xf32>
    %368 = vector.shape_cast %367 : vector<1x64x8xf32> to vector<64x8xf32>
    %369 = vector.shape_cast %366 : vector<64x8xf32> to vector<1x64x8xf32>
    tpu.vector_store %arg10[%c4_328, %c0_329, %c0_330], %369 {strides = array<i32>} : memref<9x64x8xf32, #tpu.memory_space<vmem>>, vector<1x64x8xf32>,
    %c1_331 = arith.constant 1 : index
    %c2_332 = arith.constant 2 : index
    %c0_333 = arith.constant 0 : index
    %370 = vector.load %arg9[%c1_331, %c2_332, %c0_333] : memref<10x10x8xf32, #tpu.memory_space<vmem>>, vector<8x8x8xf32>
    %371 = vector.shape_cast %370 : vector<8x8x8xf32> to vector<64x8xf32>
    %372 = arith.addf %364, %371 : vector<64x8xf32>
    %cst_334 = arith.constant 0.000000e+00 : f32
    %373 = vector.broadcast %cst_334 : f32 to vector<64x8xf32>
    %374 = arith.maximumf %371, %373 : vector<64x8xf32>
    %c5_335 = arith.constant 5 : index
    %c0_336 = arith.constant 0 : index
    %c0_337 = arith.constant 0 : index
    %375 = vector.load %arg10[%c5_335, %c0_336, %c0_337] : memref<9x64x8xf32, #tpu.memory_space<vmem>>, vector<1x64x8xf32>
    %376 = vector.shape_cast %375 : vector<1x64x8xf32> to vector<64x8xf32>
    %377 = vector.shape_cast %374 : vector<64x8xf32> to vector<1x64x8xf32>
    tpu.vector_store %arg10[%c5_335, %c0_336, %c0_337], %377 {strides = array<i32>} : memref<9x64x8xf32, #tpu.memory_space<vmem>>, vector<1x64x8xf32>,
    %c2_338 = arith.constant 2 : index
    %c0_339 = arith.constant 0 : index
    %c0_340 = arith.constant 0 : index
    %378 = vector.load %arg9[%c2_338, %c0_339, %c0_340] : memref<10x10x8xf32, #tpu.memory_space<vmem>>, vector<8x8x8xf32>
    %379 = vector.shape_cast %378 : vector<8x8x8xf32> to vector<64x8xf32>
    %380 = arith.addf %372, %379 : vector<64x8xf32>
    %cst_341 = arith.constant 0.000000e+00 : f32
    %381 = vector.broadcast %cst_341 : f32 to vector<64x8xf32>
    %382 = arith.maximumf %379, %381 : vector<64x8xf32>
    %c6_342 = arith.constant 6 : index
    %c0_343 = arith.constant 0 : index
    %c0_344 = arith.constant 0 : index
    %383 = vector.load %arg10[%c6_342, %c0_343, %c0_344] : memref<9x64x8xf32, #tpu.memory_space<vmem>>, vector<1x64x8xf32>
    %384 = vector.shape_cast %383 : vector<1x64x8xf32> to vector<64x8xf32>
    %385 = vector.shape_cast %382 : vector<64x8xf32> to vector<1x64x8xf32>
    tpu.vector_store %arg10[%c6_342, %c0_343, %c0_344], %385 {strides = array<i32>} : memref<9x64x8xf32, #tpu.memory_space<vmem>>, vector<1x64x8xf32>,
    %c2_345 = arith.constant 2 : index
    %c1_346 = arith.constant 1 : index
    %c0_347 = arith.constant 0 : index
    %386 = vector.load %arg9[%c2_345, %c1_346, %c0_347] : memref<10x10x8xf32, #tpu.memory_space<vmem>>, vector<8x8x8xf32>
    %387 = vector.shape_cast %386 : vector<8x8x8xf32> to vector<64x8xf32>
    %388 = arith.addf %380, %387 : vector<64x8xf32>
    %cst_348 = arith.constant 0.000000e+00 : f32
    %389 = vector.broadcast %cst_348 : f32 to vector<64x8xf32>
    %390 = arith.maximumf %387, %389 : vector<64x8xf32>
    %c7_349 = arith.constant 7 : index
    %c0_350 = arith.constant 0 : index
    %c0_351 = arith.constant 0 : index
    %391 = vector.load %arg10[%c7_349, %c0_350, %c0_351] : memref<9x64x8xf32, #tpu.memory_space<vmem>>, vector<1x64x8xf32>
    %392 = vector.shape_cast %391 : vector<1x64x8xf32> to vector<64x8xf32>
    %393 = vector.shape_cast %390 : vector<64x8xf32> to vector<1x64x8xf32>
    tpu.vector_store %arg10[%c7_349, %c0_350, %c0_351], %393 {strides = array<i32>} : memref<9x64x8xf32, #tpu.memory_space<vmem>>, vector<1x64x8xf32>,
    %c2_352 = arith.constant 2 : index
    %c2_353 = arith.constant 2 : index
    %c0_354 = arith.constant 0 : index
    %394 = vector.load %arg9[%c2_352, %c2_353, %c0_354] : memref<10x10x8xf32, #tpu.memory_space<vmem>>, vector<8x8x8xf32>
    %395 = vector.shape_cast %394 : vector<8x8x8xf32> to vector<64x8xf32>
    %396 = arith.addf %388, %395 : vector<64x8xf32>
    %cst_355 = arith.constant 0.000000e+00 : f32
    %397 = vector.broadcast %cst_355 : f32 to vector<64x8xf32>
    %398 = arith.maximumf %395, %397 : vector<64x8xf32>
    %c8_356 = arith.constant 8 : index
    %c0_357 = arith.constant 0 : index
    %c0_358 = arith.constant 0 : index
    %399 = vector.load %arg10[%c8_356, %c0_357, %c0_358] : memref<9x64x8xf32, #tpu.memory_space<vmem>>, vector<1x64x8xf32>
    %400 = vector.shape_cast %399 : vector<1x64x8xf32> to vector<64x8xf32>
    %401 = vector.shape_cast %398 : vector<64x8xf32> to vector<1x64x8xf32>
    tpu.vector_store %arg10[%c8_356, %c0_357, %c0_358], %401 {strides = array<i32>} : memref<9x64x8xf32, #tpu.memory_space<vmem>>, vector<1x64x8xf32>,
    %402 = vector.broadcast %0 : vector<64x1xf32> to vector<64x8xf32>
    %403 = arith.mulf %396, %402 : vector<64x8xf32>
    %c0_359 = arith.constant 0 : index
    %c0_360 = arith.constant 0 : index
    %c0_361 = arith.constant 0 : index
    %404 = vector.load %arg10[%c0_359, %c0_360, %c0_361] : memref<9x64x8xf32, #tpu.memory_space<vmem>>, vector<1x64x8xf32>
    %405 = vector.shape_cast %404 : vector<1x64x8xf32> to vector<64x8xf32>
    %c0_362 = arith.constant 0 : index
    %c0_363 = arith.constant 0 : index
    %c0_364 = arith.constant 0 : index
    %406 = vector.load %arg5[%c0_362, %c0_363, %c0_364] : memref<9x8x8xf32, #tpu.memory_space<vmem>>, vector<1x8x8xf32>
    %407 = vector.shape_cast %406 : vector<1x8x8xf32> to vector<8x8xf32>
    %cst_365 = arith.constant dense<0.000000e+00> : vector<64x8xf32>
    %408 = tpu.matmul %405, %407, %cst_365 {dimension_numbers = #tpu.dot_dimension_numbers<[1], [0], [0], [1], [0, 0, 1, 1], [], []>} : vector<64x8xf32>, vector<8x8xf32>, vector<64x8xf32> -> vector<64x8xf32>
    %c1_366 = arith.constant 1 : index
    %c0_367 = arith.constant 0 : index
    %c0_368 = arith.constant 0 : index
    %409 = vector.load %arg10[%c1_366, %c0_367, %c0_368] : memref<9x64x8xf32, #tpu.memory_space<vmem>>, vector<1x64x8xf32>
    %410 = vector.shape_cast %409 : vector<1x64x8xf32> to vector<64x8xf32>
    %c1_369 = arith.constant 1 : index
    %c0_370 = arith.constant 0 : index
    %c0_371 = arith.constant 0 : index
    %411 = vector.load %arg5[%c1_369, %c0_370, %c0_371] : memref<9x8x8xf32, #tpu.memory_space<vmem>>, vector<1x8x8xf32>
    %412 = vector.shape_cast %411 : vector<1x8x8xf32> to vector<8x8xf32>
    %cst_372 = arith.constant dense<0.000000e+00> : vector<64x8xf32>
    %413 = tpu.matmul %410, %412, %cst_372 {dimension_numbers = #tpu.dot_dimension_numbers<[1], [0], [0], [1], [0, 0, 1, 1], [], []>} : vector<64x8xf32>, vector<8x8xf32>, vector<64x8xf32> -> vector<64x8xf32>
    %414 = arith.addf %408, %413 : vector<64x8xf32>
    %c2_373 = arith.constant 2 : index
    %c0_374 = arith.constant 0 : index
    %c0_375 = arith.constant 0 : index
    %415 = vector.load %arg10[%c2_373, %c0_374, %c0_375] : memref<9x64x8xf32, #tpu.memory_space<vmem>>, vector<1x64x8xf32>
    %416 = vector.shape_cast %415 : vector<1x64x8xf32> to vector<64x8xf32>
    %c2_376 = arith.constant 2 : index
    %c0_377 = arith.constant 0 : index
    %c0_378 = arith.constant 0 : index
    %417 = vector.load %arg5[%c2_376, %c0_377, %c0_378] : memref<9x8x8xf32, #tpu.memory_space<vmem>>, vector<1x8x8xf32>
    %418 = vector.shape_cast %417 : vector<1x8x8xf32> to vector<8x8xf32>
    %cst_379 = arith.constant dense<0.000000e+00> : vector<64x8xf32>
    %419 = tpu.matmul %416, %418, %cst_379 {dimension_numbers = #tpu.dot_dimension_numbers<[1], [0], [0], [1], [0, 0, 1, 1], [], []>} : vector<64x8xf32>, vector<8x8xf32>, vector<64x8xf32> -> vector<64x8xf32>
    %420 = arith.addf %414, %419 : vector<64x8xf32>
    %c3_380 = arith.constant 3 : index
    %c0_381 = arith.constant 0 : index
    %c0_382 = arith.constant 0 : index
    %421 = vector.load %arg10[%c3_380, %c0_381, %c0_382] : memref<9x64x8xf32, #tpu.memory_space<vmem>>, vector<1x64x8xf32>
    %422 = vector.shape_cast %421 : vector<1x64x8xf32> to vector<64x8xf32>
    %c3_383 = arith.constant 3 : index
    %c0_384 = arith.constant 0 : index
    %c0_385 = arith.constant 0 : index
    %423 = vector.load %arg5[%c3_383, %c0_384, %c0_385] : memref<9x8x8xf32, #tpu.memory_space<vmem>>, vector<1x8x8xf32>
    %424 = vector.shape_cast %423 : vector<1x8x8xf32> to vector<8x8xf32>
    %cst_386 = arith.constant dense<0.000000e+00> : vector<64x8xf32>
    %425 = tpu.matmul %422, %424, %cst_386 {dimension_numbers = #tpu.dot_dimension_numbers<[1], [0], [0], [1], [0, 0, 1, 1], [], []>} : vector<64x8xf32>, vector<8x8xf32>, vector<64x8xf32> -> vector<64x8xf32>
    %426 = arith.addf %420, %425 : vector<64x8xf32>
    %c4_387 = arith.constant 4 : index
    %c0_388 = arith.constant 0 : index
    %c0_389 = arith.constant 0 : index
    %427 = vector.load %arg10[%c4_387, %c0_388, %c0_389] : memref<9x64x8xf32, #tpu.memory_space<vmem>>, vector<1x64x8xf32>
    %428 = vector.shape_cast %427 : vector<1x64x8xf32> to vector<64x8xf32>
    %c4_390 = arith.constant 4 : index
    %c0_391 = arith.constant 0 : index
    %c0_392 = arith.constant 0 : index
    %429 = vector.load %arg5[%c4_390, %c0_391, %c0_392] : memref<9x8x8xf32, #tpu.memory_space<vmem>>, vector<1x8x8xf32>
    %430 = vector.shape_cast %429 : vector<1x8x8xf32> to vector<8x8xf32>
    %cst_393 = arith.constant dense<0.000000e+00> : vector<64x8xf32>
    %431 = tpu.matmul %428, %430, %cst_393 {dimension_numbers = #tpu.dot_dimension_numbers<[1], [0], [0], [1], [0, 0, 1, 1], [], []>} : vector<64x8xf32>, vector<8x8xf32>, vector<64x8xf32> -> vector<64x8xf32>
    %432 = arith.addf %426, %431 : vector<64x8xf32>
    %c5_394 = arith.constant 5 : index
    %c0_395 = arith.constant 0 : index
    %c0_396 = arith.constant 0 : index
    %433 = vector.load %arg10[%c5_394, %c0_395, %c0_396] : memref<9x64x8xf32, #tpu.memory_space<vmem>>, vector<1x64x8xf32>
    %434 = vector.shape_cast %433 : vector<1x64x8xf32> to vector<64x8xf32>
    %c5_397 = arith.constant 5 : index
    %c0_398 = arith.constant 0 : index
    %c0_399 = arith.constant 0 : index
    %435 = vector.load %arg5[%c5_397, %c0_398, %c0_399] : memref<9x8x8xf32, #tpu.memory_space<vmem>>, vector<1x8x8xf32>
    %436 = vector.shape_cast %435 : vector<1x8x8xf32> to vector<8x8xf32>
    %cst_400 = arith.constant dense<0.000000e+00> : vector<64x8xf32>
    %437 = tpu.matmul %434, %436, %cst_400 {dimension_numbers = #tpu.dot_dimension_numbers<[1], [0], [0], [1], [0, 0, 1, 1], [], []>} : vector<64x8xf32>, vector<8x8xf32>, vector<64x8xf32> -> vector<64x8xf32>
    %438 = arith.addf %432, %437 : vector<64x8xf32>
    %c6_401 = arith.constant 6 : index
    %c0_402 = arith.constant 0 : index
    %c0_403 = arith.constant 0 : index
    %439 = vector.load %arg10[%c6_401, %c0_402, %c0_403] : memref<9x64x8xf32, #tpu.memory_space<vmem>>, vector<1x64x8xf32>
    %440 = vector.shape_cast %439 : vector<1x64x8xf32> to vector<64x8xf32>
    %c6_404 = arith.constant 6 : index
    %c0_405 = arith.constant 0 : index
    %c0_406 = arith.constant 0 : index
    %441 = vector.load %arg5[%c6_404, %c0_405, %c0_406] : memref<9x8x8xf32, #tpu.memory_space<vmem>>, vector<1x8x8xf32>
    %442 = vector.shape_cast %441 : vector<1x8x8xf32> to vector<8x8xf32>
    %cst_407 = arith.constant dense<0.000000e+00> : vector<64x8xf32>
    %443 = tpu.matmul %440, %442, %cst_407 {dimension_numbers = #tpu.dot_dimension_numbers<[1], [0], [0], [1], [0, 0, 1, 1], [], []>} : vector<64x8xf32>, vector<8x8xf32>, vector<64x8xf32> -> vector<64x8xf32>
    %444 = arith.addf %438, %443 : vector<64x8xf32>
    %c7_408 = arith.constant 7 : index
    %c0_409 = arith.constant 0 : index
    %c0_410 = arith.constant 0 : index
    %445 = vector.load %arg10[%c7_408, %c0_409, %c0_410] : memref<9x64x8xf32, #tpu.memory_space<vmem>>, vector<1x64x8xf32>
    %446 = vector.shape_cast %445 : vector<1x64x8xf32> to vector<64x8xf32>
    %c7_411 = arith.constant 7 : index
    %c0_412 = arith.constant 0 : index
    %c0_413 = arith.constant 0 : index
    %447 = vector.load %arg5[%c7_411, %c0_412, %c0_413] : memref<9x8x8xf32, #tpu.memory_space<vmem>>, vector<1x8x8xf32>
    %448 = vector.shape_cast %447 : vector<1x8x8xf32> to vector<8x8xf32>
    %cst_414 = arith.constant dense<0.000000e+00> : vector<64x8xf32>
    %449 = tpu.matmul %446, %448, %cst_414 {dimension_numbers = #tpu.dot_dimension_numbers<[1], [0], [0], [1], [0, 0, 1, 1], [], []>} : vector<64x8xf32>, vector<8x8xf32>, vector<64x8xf32> -> vector<64x8xf32>
    %450 = arith.addf %444, %449 : vector<64x8xf32>
    %c8_415 = arith.constant 8 : index
    %c0_416 = arith.constant 0 : index
    %c0_417 = arith.constant 0 : index
    %451 = vector.load %arg10[%c8_415, %c0_416, %c0_417] : memref<9x64x8xf32, #tpu.memory_space<vmem>>, vector<1x64x8xf32>
    %452 = vector.shape_cast %451 : vector<1x64x8xf32> to vector<64x8xf32>
    %c8_418 = arith.constant 8 : index
    %c0_419 = arith.constant 0 : index
    %c0_420 = arith.constant 0 : index
    %453 = vector.load %arg5[%c8_418, %c0_419, %c0_420] : memref<9x8x8xf32, #tpu.memory_space<vmem>>, vector<1x8x8xf32>
    %454 = vector.shape_cast %453 : vector<1x8x8xf32> to vector<8x8xf32>
    %cst_421 = arith.constant dense<0.000000e+00> : vector<64x8xf32>
    %455 = tpu.matmul %452, %454, %cst_421 {dimension_numbers = #tpu.dot_dimension_numbers<[1], [0], [0], [1], [0, 0, 1, 1], [], []>} : vector<64x8xf32>, vector<8x8xf32>, vector<64x8xf32> -> vector<64x8xf32>
    %456 = arith.addf %450, %455 : vector<64x8xf32>
    %c5_422 = arith.constant 5 : index
    %c0_423 = arith.constant 0 : index
    %c0_424 = arith.constant 0 : index
    %457 = vector.load %arg6[%c5_422, %c0_423, %c0_424] : memref<6x1x8xf32, #tpu.memory_space<vmem>>, vector<1x1x8xf32>
    %458 = vector.shape_cast %457 : vector<1x1x8xf32> to vector<1x8xf32>
    %459 = vector.broadcast %458 : vector<1x8xf32> to vector<64x8xf32>
    %460 = arith.addf %456, %459 : vector<64x8xf32>
    %c5_425 = arith.constant 5 : index
    %c0_426 = arith.constant 0 : index
    %461 = memref.load %arg1[%c5_425, %c0_426] : memref<6x2xf32, #tpu.memory_space<smem>>
    %462 = vector.broadcast %461 : f32 to vector<64x8xf32>
    %463 = arith.mulf %462, %314 : vector<64x8xf32>
    %464 = arith.addf %460, %463 : vector<64x8xf32>
    %c5_427 = arith.constant 5 : index
    %c1_428 = arith.constant 1 : index
    %465 = memref.load %arg1[%c5_427, %c1_428] : memref<6x2xf32, #tpu.memory_space<smem>>
    %466 = vector.broadcast %465 : f32 to vector<64x8xf32>
    %467 = arith.mulf %466, %403 : vector<64x8xf32>
    %468 = arith.addf %464, %467 : vector<64x8xf32>
    %469 = arith.addf %328, %468 : vector<64x8xf32>
    %470 = vector.shape_cast %469 : vector<64x8xf32> to vector<8x8x8xf32>
    %c0_429 = arith.constant 0 : index
    %c0_430 = arith.constant 0 : index
    %c0_431 = arith.constant 0 : index
    %c0_432 = arith.constant 0 : index
    %471 = vector.load %arg8[%c0_429, %c0_430, %c0_431, %c0_432] : memref<1x8x8x8xf32, #tpu.memory_space<vmem>>, vector<1x8x8x8xf32>
    %472 = vector.shape_cast %471 : vector<1x8x8x8xf32> to vector<8x8x8xf32>
    %473 = vector.shape_cast %470 : vector<8x8x8xf32> to vector<1x8x8x8xf32>
    tpu.vector_store %arg8[%c0_429, %c0_430, %c0_431, %c0_432], %473 {strides = array<i32>} : memref<1x8x8x8xf32, #tpu.memory_space<vmem>>, vector<1x8x8x8xf32>,
    return
  }
  func.func @transform_0(%arg0: i32) -> (i32, i32) {
    %c0_i32 = arith.constant 0 : i32
    %c0_i32_0 = arith.constant 0 : i32
    %c0_i32_1 = arith.constant 0 : i32
    return %c0_i32, %c0_i32_0 : i32, i32
  }
  func.func @transform_1(%arg0: i32) -> (i32, i32, i32, i32) {
    %c0_i32 = arith.constant 0 : i32
    %c0_i32_0 = arith.constant 0 : i32
    %c0_i32_1 = arith.constant 0 : i32
    %c0_i32_2 = arith.constant 0 : i32
    return %arg0, %c0_i32, %c0_i32_0, %c0_i32_1 : i32, i32, i32, i32
  }
  func.func @transform_2(%arg0: i32) -> (i32, i32, i32) {
    %c0_i32 = arith.constant 0 : i32
    %c0_i32_0 = arith.constant 0 : i32
    %c0_i32_1 = arith.constant 0 : i32
    %c0_i32_2 = arith.constant 0 : i32
    return %c0_i32, %c0_i32_0, %c0_i32_1 : i32, i32, i32
  }
  func.func @transform_3(%arg0: i32) -> (i32, i32, i32) {
    %c0_i32 = arith.constant 0 : i32
    %c0_i32_0 = arith.constant 0 : i32
    %c0_i32_1 = arith.constant 0 : i32
    %c0_i32_2 = arith.constant 0 : i32
    return %c0_i32, %c0_i32_0, %c0_i32_1 : i32, i32, i32
  }
  func.func @transform_4(%arg0: i32) -> (i32, i32, i32) {
    %c0_i32 = arith.constant 0 : i32
    %c0_i32_0 = arith.constant 0 : i32
    %c0_i32_1 = arith.constant 0 : i32
    %c0_i32_2 = arith.constant 0 : i32
    return %c0_i32, %c0_i32_0, %c0_i32_1 : i32, i32, i32
  }
  func.func @transform_5(%arg0: i32) -> (i32, i32, i32) {
    %c0_i32 = arith.constant 0 : i32
    %c0_i32_0 = arith.constant 0 : i32
    %c0_i32_1 = arith.constant 0 : i32
    %c0_i32_2 = arith.constant 0 : i32
    return %c0_i32, %c0_i32_0, %c0_i32_1 : i32, i32, i32
  }
  func.func @transform_6(%arg0: i32) -> (i32, i32) {
    %c0_i32 = arith.constant 0 : i32
    %c0_i32_0 = arith.constant 0 : i32
    %c0_i32_1 = arith.constant 0 : i32
    return %c0_i32, %c0_i32_0 : i32, i32
  }
  func.func @transform_7(%arg0: i32) -> (i32, i32, i32, i32) {
    %c0_i32 = arith.constant 0 : i32
    %c0_i32_0 = arith.constant 0 : i32
    %c0_i32_1 = arith.constant 0 : i32
    %c0_i32_2 = arith.constant 0 : i32
    return %arg0, %c0_i32, %c0_i32_0, %c0_i32_1 : i32, i32, i32, i32
  }
}

</mosaic_0001>

<bundles_post_ra>
// kernel: nas201_cell_forward.1
= control target key start
LH: loop header
LB: loop body
LE: loop exit
PB: predicated region body
PF: predicated region fallthrough
CT: control target
= control target key end

     0   :  { %12 = vsyncpa [#allocation5], 0  ;;  %s7186_s24 = smov 0   ;;  %s8860_s0 = inlined_call_operand.vmem [shape: f32[6,2], index: 0, kind: input, shape index: {}]   ;;  %s8861_s1 = inlined_call_operand.vmem [shape: f32[2,8,8,8], index: 1, kind: input, shape index: {}]   ;;  %s8862_s2 = inlined_call_operand.vmem [shape: f32[9,8,24], index: 2, kind: input, shape index: {}]   ;;  %s8863_s3 = inlined_call_operand.vmem [shape: f32[9,8,16], index: 3, kind: input, shape index: {}]   ;;  %s8864_s4 = inlined_call_operand.vmem [shape: f32[9,8,8], index: 4, kind: input, shape index: {}]   ;;  %s8865_s5 = inlined_call_operand.vmem [shape: f32[6,1,8], index: 5, kind: input, shape index: {}]   ;;  %s8866_s6 = inlined_call_operand.vmem [shape: f32[64,1], index: 6, kind: input, shape index: {}]   ;;  %s8867_s7 = inlined_call_operand.vmem [shape: f32[2,8,8,8], index: 7, kind: output, shape index: {}]  }
   0x1 LB: > { %s7192_s25 = sadd.s32 4294967295, %s7137_s24   ;;  %p5989_p0 = scmp.ge.s32.totalorder %s7137_s24, 1  ;;  %s7137_s24 = sphi %s7186_s24, %s18_s24  }
   0x2   : > { %p201_p1 = scmp.lt.s32.totalorder %s7137_s24, 3  ;;  %s214_s28 = sshll.u32 %s8860_s0, 4  ;;  %s215_s28 = int_to_ptr.vmem [resolvable:$true] %s214_s28 }
   0x3   : > { %p7087_p3 = scmp.eq.s32.totalorder %s7192_s25, 0  ;;  %s7112_s30 = scalar_lea.vmem %s215_s28, 128 }
   0x4   : > { %p7199_p2 = pnand %p5989_p0, %p201_p1  ;;  %p7113_p6 = scmp.ne.s32.totalorder %s215_s28, %s7112_s30 }
   0x5   : > { %p7120_p10 = scmp.lt.s32.totalorder %s215_s28, %s215_s28  ;;  %p7121_p11 = scmp.lt.s32.totalorder %s7112_s30, %s7112_s30 }
   0x6   : > { %p7083_p4 = pneg %p7199_p2 }
   0x7   : > { %p7122_p12 = por %p7121_p11, %p7120_p10 }
   0x8   : > { %p7084_p5 = pnand %p7087_p3, %p7083_p4 }
   0xa   : > { %p7114_p7 = pneg %p7084_p5 }
   0xc   : > { %p7115_p8 = pnand %p7114_p7, %p7113_p6 }
   0xe   : > { %p7116_p9 = pneg %p7115_p8 }
  0x10   : > { %p7123_p13 = pnand %p7122_p12, %p7116_p9 }
  0x12   : > { %7126 = shalt.err (!%p7123_p13)
}
  0x13   : > { %s7139_s8 = smov [#allocation4]   ;;  %250 = sbr.rel (%p7199_p2) target bundleno = 1590 (0x636), region = 48 }
  0x14   : > { %7086 = dma.vmem_to_smem (!%p7084_p5), %s215_s28, 128, %s7139_s8, [#allocation5]  }
  0x1a   : > { %7132 = dma.done.wait (%p7087_p3), [#allocation5], 128  }
  0x1b   : > { %7134 = vsyncadd (%p7087_p3), [#allocation5], 4294967168 }
  0x1c   : > { %256 = sfence }
  0x1d   : > { %v5998_v0 = vld [vmem:[%s8862_s2 + $0x8] sm:$0xff]  ;;  %v7220_v1 = vld [vmem:[%s8862_s2 + $0x20] sm:$0xff]  ;;  %p283_p0 = scmp.lt.s32.totalorder %s7192_s25, 1  ;;  %vm301_vm0 = vcmask 64512   ;;  %vm303_vm1 = vcmask 58368   ;;  %v7140_v2 = vmov 0.0  }
  0x1e   : > { %6507 = vmatprep.subr.mxu1 %v5998_v0  ;;  %6563 = vmatprep.subr.mxu0 %v7220_v1  ;;  %302 = vst.msk [vmem:[#allocation2] sm:$0xff] %vm301_vm0, %v7140_v2  ;;  %305 = vst.msk [vmem:[#allocation2 + $0x10] sm:$0xff] %vm301_vm0, %v7140_v2  ;;  %v7247_v3 = vld [vmem:[%s8862_s2] sm:$0xff]  ;;  %v7252_v4 = vld [vmem:[%s8862_s2 + $0x28] sm:$0xff]  ;;  %v7141_v7 = vmov 0   ;;  %s7313_s10 = sld [smem:[#allocation4 + $0x80]] }
  0x1f   : > { %304 = vst.msk [vmem:[#allocation2 + $0x8] sm:$0x3] %vm303_vm1, %v7140_v2  ;;  %306 = vst.msk [vmem:[#allocation2 + $0x18] sm:$0x3] %vm303_vm1, %v7140_v2  ;;  %6508 = vmatpush3.msra.mxu1 %v5998_v0  ;;  %s8933_s25 = smov (!%p283_p0, %s7192_s25), 1  ;;  %6564 = vmatpush3.msra.mxu0 %v7220_v1  ;;  %v293_v5 = vld [vmem:[%s8866_s6] sm:$0xff] }
  0x20   : > { %308 = vst.msk [vmem:[#allocation2 + $0x28] sm:$0x3] %vm303_vm1, %v7140_v2  ;;  %310 = vst.msk [vmem:[#allocation2 + $0x38] sm:$0x3] %vm303_vm1, %v7140_v2  ;;  %6521 = vmatprep.subr.mxu1 %v7247_v3  ;;  %6577 = vmatprep.subr.mxu0 %v7252_v4  ;;  %v295_v6 = vld [vmem:[%s8866_s6 + $0x10] sm:$0xff]  ;;  %s6262_s21 = sshll.u32 %s8933_s25, 6 }
  0x21   : > { %312 = vst.msk [vmem:[#allocation2 + $0x48] sm:$0x3] %vm303_vm1, %v7140_v2  ;;  %314 = vst.msk [vmem:[#allocation2 + $0x58] sm:$0x3] %vm303_vm1, %v7140_v2  ;;  %7104 = vset.pattern.permute.xlu0 %v7141_v7  ;;  %7105 = vset.pattern.permute.xlu1 %v7141_v7  ;;  %s287_s26 = scalar_lea.vmem %s8861_s1, %s6262_s21  ;;  %v294_v8 = vld [vmem:[%s8866_s6 + $0x8] sm:$0xff]  ;;  %v296_v9 = vld [vmem:[%s8866_s6 + $0x18] sm:$0xff] }
  0x22   : > { %316 = vst.msk [vmem:[#allocation2 + $0x68] sm:$0x3] %vm303_vm1, %v7140_v2  ;;  %318 = vst.msk [vmem:[#allocation2 + $0x78] sm:$0x3] %vm303_vm1, %v7140_v2  ;;  %631 = vperm.xlu0 %7104, %v293_v5   ;;  %641 = vperm.xlu1 %7105, %v295_v6   ;;  %v7280_v10 = vld [vmem:[%s287_s26] sm:$0xff]  ;;  %v7282_v11 = vld [vmem:[%s287_s26 + $0x8] sm:$0xff] }
  0x23   : > { %307 = vst.msk [vmem:[#allocation2 + $0x20] sm:$0xff] %vm301_vm0, %v7140_v2  ;;  %309 = vst.msk [vmem:[#allocation2 + $0x30] sm:$0xff] %vm301_vm0, %v7140_v2  ;;  %v7284_v12 = vld [vmem:[%s287_s26 + $0x10] sm:$0xff]  ;;  %v7292_v13 = vld [vmem:[%s287_s26 + $0x18] sm:$0xff]  ;;  %s7142_s19 = smov 8   ;;  %s1998_s15 = sld [smem:[#allocation4]] }
  0x24   : > { %311 = vst.msk [vmem:[#allocation2 + $0x40] sm:$0xff] %vm301_vm0, %v7140_v2  ;;  %313 = vst.msk [vmem:[#allocation2 + $0x50] sm:$0xff] %vm301_vm0, %v7140_v2  ;;  %v7294_v14 = vld [vmem:[%s287_s26 + $0x20] sm:$0xff]  ;;  %v7296_v15 = vld [vmem:[%s287_s26 + $0x28] sm:$0xff]  ;;  %v7397_v52 = vstv %s7313_s10  ;;  %s6083_s10 = sld [smem:[#allocation4 + $0x81]]  ;;  %s6170_s14 = sld [smem:[#allocation4 + $0x100]] }
  0x25   : > { %315 = vst.msk [vmem:[#allocation2 + $0x60] sm:$0xff] %vm301_vm0, %v7140_v2  ;;  %317 = vst.msk [vmem:[#allocation2 + $0x70] sm:$0xff] %vm301_vm0, %v7140_v2  ;;  %v7298_v16 = vld [vmem:[#allocation2] sm:$0xff]  ;;  %v298_v19 = vld [vmem:[%s8866_s6 + $0x28] sm:$0xff]  ;;  %v2054_v59 = vmul.f32 %v7397_v52, %v7280_v10  ;;  %s6079_s16 = sld [smem:[#allocation4 + $0x1]]  ;;  %s7143_s22 = smov 120  }
  0x26   : > { %319 = vst.msk [vmem:[#allocation2 + $0x80] sm:$0xff] %vm301_vm0, %v7140_v2  ;;  %321 = vst.msk [vmem:[#allocation2 + $0x90] sm:$0xff] %vm301_vm0, %v7140_v2  ;;  %v7300_v17 = vld [vmem:[#allocation2 + $0x1] sm:$0xff]  ;;  %v7318_v22 = vld [vmem:[%s287_s26 + $0x30] sm:$0xff]  ;;  %v348_v23 = vmax.f32 %v7298_v16, 0.0  ;;  %636 = vperm.xlu0 %7104, %v294_v8   ;;  %646 = vperm.xlu1 %7105, %v296_v9   ;;  %s6174_s27 = sld [smem:[#allocation4 + $0x200]] }
  0x27   : > { %320 = vst.msk [vmem:[#allocation2 + $0x88] sm:$0x3] %vm303_vm1, %v7140_v2  ;;  %322 = vst.msk [vmem:[#allocation2 + $0x98] sm:$0x3] %vm303_vm1, %v7140_v2  ;;  %v7302_v18 = vld [vmem:[#allocation2 + $0x2] sm:$0xff]  ;;  %v372_v20 = vadd.f32 %v7300_v17, %v7298_v16  ;;  %v380_v21 = vmax.f32 %v7300_v17, 0.0 }
  0x28   : > { %8890 = vst [vmem:[#allocation7_spill] sm:$0xff] %v7280_v10  ;;  %8891 = vst [vmem:[#allocation8_spill] sm:$0xff] %v7282_v11  ;;  %v7321_v24 = vld [vmem:[%s287_s26 + $0x38] sm:$0xff]  ;;  %v413_v25 = vmax.f32 %v7302_v18, 0.0  ;;  %v297_v27 = vld [vmem:[%s8866_s6 + $0x20] sm:$0xff]  ;;  %s6175_s30 = sld [smem:[#allocation4 + $0x201]] }
  0x29   : > { %8892 = vst [vmem:[#allocation9_spill] sm:$0xff] %v7284_v12  ;;  %332 = vst.msk [vmem:[#allocation2 + $0x11] sm:$0xff] %vm301_vm0, %v7280_v10  ;;  %v7342_v31 = vadd.f32 %v7302_v18, %v372_v20  ;;  %v299_v34 = vld [vmem:[%s8866_s6 + $0x30] sm:$0xff]  ;;  %v300_v35 = vld [vmem:[%s8866_s6 + $0x38] sm:$0xff]  ;;  %s6258_s8 = sld [smem:[#allocation4 + $0x280]]  ;;  %s7144_s12 = smov 16  }
  0x2a   : > { %333 = vst.msk [vmem:[#allocation2 + $0x21] sm:$0xff] %vm301_vm0, %v7282_v11  ;;  %334 = vst.msk [vmem:[#allocation2 + $0x31] sm:$0xff] %vm301_vm0, %v7284_v12  ;;  %656 = vperm.xlu1 %7105, %v298_v19   ;;  %651 = vperm.xlu0 %7104, %v297_v27   ;;  %v7394_v51 = vld [vmem:[%s8865_s5 + $0x1] ss:$0 sm:$0xff]  ;;  %s6086_s9 = sld [smem:[#allocation4 + $0x180]]  ;;  %s6087_s13 = sld [smem:[#allocation4 + $0x181]] }
  0x2b   : > { %8893 = vst [vmem:[#allocation10_spill] sm:$0xff] %v7292_v13  ;;  %8894 = vst [vmem:[#allocation11_spill] sm:$0xff] %v7294_v14  ;;  %s7145_s11 = smov 112  }
  0x2c   : > { %8895 = vst [vmem:[#allocation12_spill] sm:$0xff] %v7296_v15  ;;  %335 = vst.msk [vmem:[#allocation2 + $0x41] sm:$0xff] %vm301_vm0, %v7292_v13 }
  0x2d   : > { %336 = vst.msk [vmem:[#allocation2 + $0x51] sm:$0xff] %vm301_vm0, %v7294_v14  ;;  %337 = vst.msk [vmem:[#allocation2 + $0x61] sm:$0xff] %vm301_vm0, %v7296_v15  ;;  %v7324_v26 = vld [vmem:[#allocation2 + $0x90] sm:$0xff] }
  0x2e   : > { %8896 = vst [vmem:[#allocation13_spill] sm:$0xff] %v7318_v22  ;;  %338 = vst.msk [vmem:[#allocation2 + $0x71] sm:$0xff] %vm301_vm0, %v7318_v22  ;;  %v553_v28 = vmax.f32 %v7324_v26, 0.0  ;;  %v7334_v29 = vld [vmem:[#allocation2 + $0x91] sm:$0xff]  ;;  %661 = vperm.xlu0 %7104, %v299_v34   ;;  %666 = vperm.xlu1 %7105, %v300_v35  }
  0x2f   : > { %339 = vst.msk [vmem:[#allocation2 + $0x81] sm:$0xff] %vm301_vm0, %v7321_v24  ;;  %v7336_v30 = vld [vmem:[#allocation2 + $0x92] sm:$0xff]  ;;  %389 = vst.msk [vmem:[#allocation3 + $0x40] sm:$0xff] %vm301_vm0, %v380_v21  ;;  %v586_v32 = vmax.f32 %v7334_v29, 0.0 }
  0x30   : > { %356 = vst.msk [vmem:[#allocation3] sm:$0xff] %vm301_vm0, %v348_v23  ;;  %422 = vst.msk [vmem:[#allocation3 + $0x80] sm:$0xff] %vm301_vm0, %v413_v25  ;;  %v619_v33 = vmax.f32 %v7336_v30, 0.0  ;;  %v7367_v36 = vld [vmem:[#allocation2 + $0x10] sm:$0xff] }
  0x31   : > { %562 = vst.msk [vmem:[#allocation3 + $0x1b8] sm:$0xff] %vm301_vm0, %v553_v28  ;;  %595 = vst.msk [vmem:[#allocation3 + $0x1f8] sm:$0xff] %vm301_vm0, %v586_v32  ;;  %v7369_v37 = vld [vmem:[#allocation2 + $0x11] sm:$0xff]  ;;  %v7371_v38 = vld [vmem:[#allocation2 + $0x21] sm:$0xff]  ;;  %v446_v39 = vmax.f32 %v7367_v36, 0.0 }
  0x32   : > { %628 = vst.msk [vmem:[#allocation3 + $0x238] sm:$0xff] %vm301_vm0, %v619_v33  ;;  %v381_v40 = vmax.f32 %v7369_v37, 0.0  ;;  %v480_v41 = vmax.f32 %v7371_v38, 0.0  ;;  %v7376_v42 = vld [vmem:[#allocation2 + $0x31] sm:$0xff]  ;;  %v7387_v49 = vld [vmem:[#allocation2 + $0x22] sm:$0xff]  ;;  %2041 = vrot.lane.b32.xlu0 %v7394_v51, %s7142_s19  ;;  %2070 = vrot.lane.b32.xlu1 %v2054_v59, %s7142_s19 }
  0x33   : > { %v7378_v43 = vld [vmem:[#allocation2 + $0x41] sm:$0xff]  ;;  %v383_v45 = vmax.f32 %v7376_v42, 0.0  ;;  %v7385_v48 = vld [vmem:[#allocation2 + $0x12] sm:$0xff]  ;;  %455 = vst.msk [vmem:[#allocation3 + $0xc0] sm:$0xff] %vm301_vm0, %v446_v39  ;;  %v513_v54 = vmax.f32 %v7387_v49, 0.0  ;;  %357 = vst.msk [vmem:[#allocation3 + $0x8] sm:$0xff] %vm301_vm0, %v446_v39 }
  0x34   : > { %v7380_v44 = vld [vmem:[#allocation2 + $0x51] sm:$0xff]  ;;  %v482_v46 = vmax.f32 %v7378_v43, 0.0  ;;  %v7389_v50 = vld [vmem:[#allocation2 + $0x61] sm:$0xff]  ;;  %390 = vst.msk [vmem:[#allocation3 + $0x48] sm:$0xff] %vm301_vm0, %v381_v40  ;;  %488 = vst.msk [vmem:[#allocation3 + $0x100] sm:$0xff] %vm301_vm0, %v381_v40  ;;  %v512_v53 = vmax.f32 %v7385_v48, 0.0 }
  0x35   : > { %v385_v47 = vmax.f32 %v7380_v44, 0.0  ;;  %489 = vst.msk [vmem:[#allocation3 + $0x108] sm:$0xff] %vm301_vm0, %v480_v41  ;;  %391 = vst.msk [vmem:[#allocation3 + $0x50] sm:$0xff] %vm301_vm0, %v480_v41  ;;  %v386_v55 = vmax.f32 %v7389_v50, 0.0  ;;  %v7407_v56 = vld [vmem:[#allocation2 + $0x71] sm:$0xff]  ;;  %v7411_v58 = vld [vmem:[#allocation2 + $0x42] sm:$0xff] }
  0x36   : > { %v7409_v57 = vld [vmem:[#allocation2 + $0x32] sm:$0xff]  ;;  %588 = vst.msk [vmem:[#allocation3 + $0x1c0] sm:$0xff] %vm301_vm0, %v480_v41  ;;  %v686_v60 = vld [vmem:[#allocation3 + $0x40] sm:$0xff]  ;;  %392 = vst.msk [vmem:[#allocation3 + $0x58] sm:$0xff] %vm301_vm0, %v383_v45  ;;  %v387_v61 = vmax.f32 %v7407_v56, 0.0  ;;  %v515_v63 = vmax.f32 %v7411_v58, 0.0 }
  0x37   : > { %490 = vst.msk [vmem:[#allocation3 + $0x110] sm:$0xff] %vm301_vm0, %v383_v45  ;;  %491 = vst.msk [vmem:[#allocation3 + $0x118] sm:$0xff] %vm301_vm0, %v482_v46  ;;  %v514_v62 = vmax.f32 %v7409_v57, 0.0  ;;  %v7425_v0 = vld [vmem:[#allocation3] sm:$0xff]  ;;  %v7427_v2 = vld [vmem:[#allocation2 + $0x52] sm:$0xff]  ;;  %6509 = vmatprep.mubr.msk.f32.mxu1 %vm301_vm0, %v686_v60 }
  0x38   : > { %393 = vst.msk [vmem:[#allocation3 + $0x60] sm:$0xff] %vm301_vm0, %v482_v46  ;;  %394 = vst.msk [vmem:[#allocation3 + $0x68] sm:$0xff] %vm301_vm0, %v385_v47  ;;  %v516_v5 = vmax.f32 %v7427_v2, 0.0  ;;  %v7444_v6 = vld [vmem:[#allocation2 + $0x62] sm:$0xff]  ;;  %v7448_v8 = vld [vmem:[#allocation2 + $0x30] sm:$0xff] }
  0x39   : > { %589 = vst.msk [vmem:[#allocation3 + $0x1c8] sm:$0xff] %vm301_vm0, %v383_v45  ;;  %590 = vst.msk [vmem:[#allocation3 + $0x1d0] sm:$0xff] %vm301_vm0, %v482_v46  ;;  %v7446_v7 = vld [vmem:[#allocation2 + $0x20] sm:$0xff]  ;;  %v517_v9 = vmax.f32 %v7444_v6, 0.0  ;;  %v351_v17 = vmax.f32 %v7448_v8, 0.0  ;;  %v7461_v19 = vld [vmem:[#allocation2 + $0x72] sm:$0xff] }
  0x3a   : > { %591 = vst.msk [vmem:[#allocation3 + $0x1d8] sm:$0xff] %vm301_vm0, %v385_v47  ;;  %492 = vst.msk [vmem:[#allocation3 + $0x120] sm:$0xff] %vm301_vm0, %v385_v47  ;;  %v350_v16 = vmax.f32 %v7446_v7, 0.0  ;;  %v7463_v20 = vld [vmem:[#allocation2 + $0x82] sm:$0xff]  ;;  %v7477_v35 = vld [vmem:[#allocation2 + $0x50] sm:$0xff] }
  0x3b   : > { %2326 = vst.msk [vmem:[#allocation3 + $0x40] sm:$0xff] %vm301_vm0, %v380_v21  ;;  %521 = vst.msk [vmem:[#allocation3 + $0x140] sm:$0xff] %vm301_vm0, %v512_v53  ;;  %v7465_v21 = vld [vmem:[#allocation2 + $0x40] sm:$0xff]  ;;  %v519_v27 = vmax.f32 %v7463_v20, 0.0  ;;  %v7481_v40 = vld [vmem:[#allocation2 + $0x70] sm:$0xff]  ;;  %v353_v41 = vmax.f32 %v7477_v35, 0.0 }
  0x3c   : > { %522 = vst.msk [vmem:[#allocation3 + $0x148] sm:$0xff] %vm301_vm0, %v513_v54  ;;  %395 = vst.msk [vmem:[#allocation3 + $0x70] sm:$0xff] %vm301_vm0, %v386_v55  ;;  %v352_v34 = vmax.f32 %v7465_v21, 0.0  ;;  %v7479_v39 = vld [vmem:[#allocation2 + $0x60] sm:$0xff]  ;;  %v355_v46 = vmax.f32 %v7481_v40, 0.0  ;;  %v7521_v59 = vld [vmem:[#allocation3 + $0x1f8] sm:$0xff] }
  0x3d   : > { %2294 = vst.msk [vmem:[#allocation3] sm:$0xff] %vm301_vm0, %v348_v23  ;;  %423 = vst.msk [vmem:[#allocation3 + $0x88] sm:$0xff] %vm301_vm0, %v512_v53  ;;  %v518_v23 = vmax.f32 %v7461_v19, 0.0  ;;  %v354_v45 = vmax.f32 %v7479_v39, 0.0  ;;  %v7496_v47 = vld [vmem:[#allocation3 + $0x80] sm:$0xff]  ;;  %v7500_v53 = vld [vmem:[#allocation3 + $0x1b8] sm:$0xff] }
  0x3e   : > { %424 = vst.msk [vmem:[#allocation3 + $0x90] sm:$0xff] %vm301_vm0, %v513_v54  ;;  %592 = vst.msk [vmem:[#allocation3 + $0x1e0] sm:$0xff] %vm301_vm0, %v386_v55  ;;  %v7498_v51 = vld [vmem:[#allocation2 + $0x80] sm:$0xff]  ;;  %v7525_v18 = vld [vmem:[#allocation3 + $0x238] sm:$0xff] }
  0x3f   : > { %621 = vst.msk [vmem:[#allocation3 + $0x200] sm:$0xff] %vm301_vm0, %v513_v54  ;;  %493 = vst.msk [vmem:[#allocation3 + $0x128] sm:$0xff] %vm301_vm0, %v386_v55  ;;  %v552_v54 = vmax.f32 %v7498_v51, 0.0  ;;  %v7519_v55 = vld [vmem:[#allocation2 + $0x81] sm:$0xff] }
  0x40   : > { %396 = vst.msk [vmem:[#allocation3 + $0x78] sm:$0xff] %vm301_vm0, %v387_v61  ;;  %523 = vst.msk [vmem:[#allocation3 + $0x150] sm:$0xff] %vm301_vm0, %v514_v62  ;;  %v1248_v60 = vld [vmem:[#allocation3 + $0x100] sm:$0xff] }
  0x41   : > { %524 = vst.msk [vmem:[#allocation3 + $0x158] sm:$0xff] %vm301_vm0, %v515_v63  ;;  %425 = vst.msk [vmem:[#allocation3 + $0x98] sm:$0xff] %vm301_vm0, %v514_v62  ;;  %6565 = vmatprep.mubr.msk.f32.mxu0 %vm301_vm0, %v1248_v60 }
  0x42   : > { %426 = vst.msk [vmem:[#allocation3 + $0xa0] sm:$0xff] %vm301_vm0, %v515_v63  ;;  %593 = vst.msk [vmem:[#allocation3 + $0x1e8] sm:$0xff] %vm301_vm0, %v387_v61 }
  0x43   : > { %622 = vst.msk [vmem:[#allocation3 + $0x208] sm:$0xff] %vm301_vm0, %v514_v62  ;;  %623 = vst.msk [vmem:[#allocation3 + $0x210] sm:$0xff] %vm301_vm0, %v515_v63  ;;  %v688_v62 = vld [vmem:[#allocation3 + $0x50] sm:$0xff] }
  0x44   : > { %494 = vst.msk [vmem:[#allocation3 + $0x130] sm:$0xff] %vm301_vm0, %v387_v61  ;;  %525 = vst.msk [vmem:[#allocation3 + $0x160] sm:$0xff] %vm301_vm0, %v516_v5  ;;  %v1249_v61 = vld [vmem:[#allocation3 + $0x108] sm:$0xff]  ;;  %v1250_v63 = vld [vmem:[#allocation3 + $0x110] sm:$0xff] }
  0x45   : > { %427 = vst.msk [vmem:[#allocation3 + $0xa8] sm:$0xff] %vm301_vm0, %v516_v5  ;;  %624 = vst.msk [vmem:[#allocation3 + $0x218] sm:$0xff] %vm301_vm0, %v516_v5  ;;  %6566 = vmatmul.mubr.msk.f32.vlgmr.msra.gmra.mrb[0].mxu0 %vm301_vm0, %v1249_v61  ;;  %v689_v5 = vld [vmem:[#allocation3 + $0x58] sm:$0xff]  ;;  %v2058_v61 = vmul.f32 %v7397_v52, %v7294_v14 }
  0x46   : > { %526 = vst.msk [vmem:[#allocation3 + $0x168] sm:$0xff] %vm301_vm0, %v517_v9  ;;  %358 = vst.msk [vmem:[#allocation3 + $0x10] sm:$0xff] %vm301_vm0, %v350_v16  ;;  %6578 = vmatpush3.msra.mxu0 %v7252_v4  ;;  %6568 = vmatprep.mubr.msk.f32.mxu0 %vm301_vm0, %v1250_v63  ;;  %v691_v4 = vld [vmem:[#allocation3 + $0x68] sm:$0xff] }
  0x47   : > { %359 = vst.msk [vmem:[#allocation3 + $0x18] sm:$0xff] %vm301_vm0, %v351_v17  ;;  %555 = vst.msk [vmem:[#allocation3 + $0x180] sm:$0xff] %vm301_vm0, %v350_v16 }
  0x48   : > { %556 = vst.msk [vmem:[#allocation3 + $0x188] sm:$0xff] %vm301_vm0, %v351_v17  ;;  %428 = vst.msk [vmem:[#allocation3 + $0xb0] sm:$0xff] %vm301_vm0, %v517_v9 }
  0x49   : > { %456 = vst.msk [vmem:[#allocation3 + $0xc8] sm:$0xff] %vm301_vm0, %v350_v16  ;;  %457 = vst.msk [vmem:[#allocation3 + $0xd0] sm:$0xff] %vm301_vm0, %v351_v17  ;;  %v690_v16 = vld [vmem:[#allocation3 + $0x60] sm:$0xff] }
  0x4a   : > { %625 = vst.msk [vmem:[#allocation3 + $0x220] sm:$0xff] %vm301_vm0, %v517_v9  ;;  %527 = vst.msk [vmem:[#allocation3 + $0x170] sm:$0xff] %vm301_vm0, %v518_v23  ;;  %v1251_v9 = vld [vmem:[#allocation3 + $0x118] sm:$0xff]  ;;  %v1395_v17 = vld [vmem:[#allocation3 + $0x140] sm:$0xff] }
  0x4b   : > { %528 = vst.msk [vmem:[#allocation3 + $0x178] sm:$0xff] %vm301_vm0, %v519_v27  ;;  %360 = vst.msk [vmem:[#allocation3 + $0x20] sm:$0xff] %vm301_vm0, %v352_v34  ;;  %6569 = vmatmul.mubr.msk.f32.gmra.mrb[2].mxu0 %vm301_vm0, %v1251_v9  ;;  %v1399_v60 = vld [vmem:[#allocation3 + $0x160] sm:$0xff]  ;;  %v6024_v9 = vld [vmem:[%s8862_s2 + $0x18] sm:$0xff] }
  0x4c   : > { %557 = vst.msk [vmem:[#allocation3 + $0x190] sm:$0xff] %vm301_vm0, %v352_v34  ;;  %2358 = vst.msk [vmem:[#allocation3 + $0x80] sm:$0xff] %vm301_vm0, %v413_v25  ;;  %v687_v25 = vld [vmem:[#allocation3 + $0x48] sm:$0xff]  ;;  %6579 = vmatprep.mubr.msk.f32.mxu0 %vm301_vm0, %v1395_v17 }
  0x4d   : > { %2493 = vst.msk [vmem:[#allocation3 + $0x1b8] sm:$0xff] %vm301_vm0, %v553_v28  ;;  %429 = vst.msk [vmem:[#allocation3 + $0xb8] sm:$0xff] %vm301_vm0, %v518_v23  ;;  %v585_v28 = vmax.f32 %v7519_v55, 0.0  ;;  %6510 = vmatmul.mubr.msk.f32.vlgmr.msra.gmra.mrb[0].mxu1 %vm301_vm0, %v687_v25  ;;  %v1398_v25 = vld [vmem:[#allocation3 + $0x158] sm:$0xff]  ;;  %v679_v63 = vld [vmem:[#allocation3 + $0x10] sm:$0xff] }
  0x4e   : > { %458 = vst.msk [vmem:[#allocation3 + $0xd8] sm:$0xff] %vm301_vm0, %v352_v34  ;;  %626 = vst.msk [vmem:[#allocation3 + $0x228] sm:$0xff] %vm301_vm0, %v518_v23  ;;  %6522 = vmatpush3.msra.mxu1 %v7247_v3  ;;  %6512 = vmatprep.mubr.msk.f32.mxu1 %vm301_vm0, %v688_v62  ;;  %v2056_v3 = vmul.f32 %v7397_v52, %v7284_v12  ;;  %v2055_v23 = vmul.f32 %v7397_v52, %v7282_v11  ;;  %v692_v34 = vld [vmem:[#allocation3 + $0x70] sm:$0xff]  ;;  %v1400_v62 = vld [vmem:[#allocation3 + $0x168] sm:$0xff] }
  0x4f   : > { %627 = vst.msk [vmem:[#allocation3 + $0x230] sm:$0xff] %vm301_vm0, %v519_v27  ;;  %361 = vst.msk [vmem:[#allocation3 + $0x28] sm:$0xff] %vm301_vm0, %v353_v41  ;;  %v1396_v27 = vld [vmem:[#allocation3 + $0x148] sm:$0xff]  ;;  %v1542_v17 = vld [vmem:[#allocation3 + $0x180] sm:$0xff] }
  0x50   : > { %362 = vst.msk [vmem:[#allocation3 + $0x30] sm:$0xff] %vm301_vm0, %v354_v45  ;;  %363 = vst.msk [vmem:[#allocation3 + $0x38] sm:$0xff] %vm301_vm0, %v355_v46  ;;  %2074 = vrot.lane.b32.xlu0 %v2056_v3, %s7142_s19  ;;  %2072 = vrot.lane.b32.xlu1 %v2055_v23, %s7142_s19  ;;  %v2060_v23 = vmul.f32 %v7397_v52, %v7318_v22 }
  0x51   : > { %558 = vst.msk [vmem:[#allocation3 + $0x198] sm:$0xff] %vm301_vm0, %v353_v41  ;;  %559 = vst.msk [vmem:[#allocation3 + $0x1a0] sm:$0xff] %vm301_vm0, %v354_v45  ;;  %6513 = vmatmul.mubr.msk.f32.gmra.mrb[2].mxu1 %vm301_vm0, %v689_v5  ;;  %6580 = vmatmul.mubr.msk.f32.vlgmr.msra.gmra.mrb[0].mxu0 %vm301_vm0, %v1396_v27  ;;  %v2059_v5 = vmul.f32 %v7397_v52, %v7296_v15 }
  0x52   : > { %560 = vst.msk [vmem:[#allocation3 + $0x1a8] sm:$0xff] %vm301_vm0, %v355_v46  ;;  %2525 = vst.msk [vmem:[#allocation3 + $0x1f8] sm:$0xff] %vm301_vm0, %v586_v32  ;;  %v6051_v32 = vld [vmem:[%s8862_s2 + $0x30] sm:$0xff]  ;;  %6515 = vmatprep.mubr.msk.f32.mxu1 %vm301_vm0, %v690_v16  ;;  %v1402_v16 = vld [vmem:[#allocation3 + $0x178] sm:$0xff] }
  0x53   : > { %459 = vst.msk [vmem:[#allocation3 + $0xe0] sm:$0xff] %vm301_vm0, %v353_v41  ;;  %460 = vst.msk [vmem:[#allocation3 + $0xe8] sm:$0xff] %vm301_vm0, %v354_v45  ;;  %6591 = vmatprep.subr.mxu0 %v6051_v32  ;;  %v1397_v41 = vld [vmem:[#allocation3 + $0x150] sm:$0xff]  ;;  %v2057_v45 = vmul.f32 %v7397_v52, %v7292_v13  ;;  %v681_v3 = vld [vmem:[#allocation3 + $0x20] sm:$0xff] }
  0x54   : > { %461 = vst.msk [vmem:[#allocation3 + $0xf0] sm:$0xff] %vm301_vm0, %v355_v46  ;;  %2557 = vst.msk [vmem:[#allocation3 + $0x238] sm:$0xff] %vm301_vm0, %v619_v33  ;;  %v6015_v33 = vld [vmem:[%s8862_s2 + $0x10] sm:$0xff]  ;;  %v6060_v46 = vld [vmem:[%s8862_s2 + $0x38] sm:$0xff]  ;;  %6592 = vmatpush3.msra.mxu0 %v6051_v32  ;;  %6582 = vmatprep.mubr.msk.f32.mxu0 %vm301_vm0, %v1397_v41 }
  0x55   : > { %561 = vst.msk [vmem:[#allocation3 + $0x1b0] sm:$0xff] %vm301_vm0, %v552_v54  ;;  %462 = vst.msk [vmem:[#allocation3 + $0xf8] sm:$0xff] %vm301_vm0, %v552_v54  ;;  %6535 = vmatprep.subr.mxu1 %v6015_v33  ;;  %6516 = vmatmul.mubr.msk.f32.gmra.mrb[4].mxu1 %vm301_vm0, %v691_v4  ;;  %v693_v54 = vld [vmem:[#allocation3 + $0x78] sm:$0xff]  ;;  %v1401_v32 = vld [vmem:[#allocation3 + $0x170] sm:$0xff] }
  0x56   : > { %594 = vst.msk [vmem:[#allocation3 + $0x1f0] sm:$0xff] %vm301_vm0, %v585_v28  ;;  %495 = vst.msk [vmem:[#allocation3 + $0x138] sm:$0xff] %vm301_vm0, %v585_v28  ;;  %6518 = vmatprep.mubr.msk.f32.mxu1 %vm301_vm0, %v692_v34  ;;  %6605 = vmatprep.subr.mxu0 %v6060_v46  ;;  %v678_v28 = vld [vmem:[#allocation3 + $0x8] sm:$0xff]  ;;  %v1544_v34 = vld [vmem:[#allocation3 + $0x190] sm:$0xff] }
  0x57   : > { %2076 = vrot.lane.b32.xlu0 %v2057_v45, %s7142_s19  ;;  %6583 = vmatmul.mubr.msk.f32.gmra.mrb[2].mxu0 %vm301_vm0, %v1398_v25  ;;  %v1543_v4 = vld [vmem:[#allocation3 + $0x188] sm:$0xff]  ;;  %v683_v27 = vld [vmem:[#allocation3 + $0x30] sm:$0xff]  ;;  %v6069_v41 = vld [vmem:[%s8862_s2 + $0x40] sm:$0xff] }
  0x58   : > { %6585 = vmatprep.mubr.msk.f32.mxu0 %vm301_vm0, %v1399_v60  ;;  %v684_v45 = vld [vmem:[#allocation3 + $0x38] sm:$0xff]  ;;  %v1546_v25 = vld [vmem:[#allocation3 + $0x1a0] sm:$0xff]  ;;  %v955_v60 = vld [vmem:[#allocation3 + $0x88] sm:$0xff] }
  0x59   : > { %6519 = vmatmul.mubr.msk.f32.gmra.mrb[6].mxu1 %vm301_vm0, %v693_v54  ;;  %v1545_v54 = vld [vmem:[#allocation3 + $0x198] sm:$0xff] }
  0x5a   : > { %6523 = vmatprep.mubr.msk.f32.mxu1 %vm301_vm0, %v7425_v0  ;;  %v680_v0 = vld [vmem:[#allocation3 + $0x18] sm:$0xff] }
  0x5b   : > { %2078 = vrot.lane.b32.xlu0 %v2058_v61, %s7142_s19  ;;  %6586 = vmatmul.mubr.msk.f32.gmra.mrb[4].mxu0 %vm301_vm0, %v1400_v62  ;;  %v1547_v61 = vld [vmem:[#allocation3 + $0x1a8] sm:$0xff] }
  0x5c   : > { %6588 = vmatprep.mubr.msk.f32.mxu0 %vm301_vm0, %v1401_v32  ;;  %v1548_v62 = vld [vmem:[#allocation3 + $0x1b0] sm:$0xff]  ;;  %v1689_v32 = vld [vmem:[#allocation3 + $0x1c0] sm:$0xff] }
  0x5d   : > { %6524 = vmatmul.mubr.msk.f32.vlgmr.msra.gmra.mrb[0].mxu1 %vm301_vm0, %v678_v28  ;;  %v956_v28 = vld [vmem:[#allocation3 + $0x90] sm:$0xff] }
  0x5e   : > { %6536 = vmatpush3.msra.mxu1 %v6015_v33  ;;  %6526 = vmatprep.mubr.msk.f32.mxu1 %vm301_vm0, %v679_v63  ;;  %v682_v33 = vld [vmem:[#allocation3 + $0x28] sm:$0xff]  ;;  %v958_v63 = vld [vmem:[#allocation3 + $0xa0] sm:$0xff] }
  0x5f   : > { %6549 = vmatprep.subr.mxu1 %v6024_v9  ;;  %2080 = vrot.lane.b32.xlu0 %v2059_v5, %s7142_s19  ;;  %v1690_v5 = vld [vmem:[#allocation3 + $0x1c8] sm:$0xff] }
  0x60   : > { %6589 = vmatmul.mubr.msk.f32.gmra.mrb[6].mxu0 %vm301_vm0, %v1402_v16  ;;  %v961_v16 = vld [vmem:[#allocation3 + $0xb8] sm:$0xff] }
  0x61   : > { %6527 = vmatmul.mubr.msk.f32.gmra.mrb[2].mxu1 %vm301_vm0, %v680_v0  ;;  %6593 = vmatprep.mubr.msk.f32.mxu0 %vm301_vm0, %v1542_v17  ;;  %v1691_v0 = vld [vmem:[#allocation3 + $0x1d0] sm:$0xff]  ;;  %v1693_v17 = vld [vmem:[#allocation3 + $0x1e0] sm:$0xff] }
  0x62   : > { %6529 = vmatprep.mubr.msk.f32.mxu1 %vm301_vm0, %v681_v3  ;;  %v1692_v3 = vld [vmem:[#allocation3 + $0x1d8] sm:$0xff] }
  0x63   : > { %2082 = vrot.lane.b32.xlu0 %v2060_v23, %s7142_s19  ;;  %v1102_v23 = vld [vmem:[#allocation3 + $0xc8] sm:$0xff] }
  0x64   : > { %6594 = vmatmul.mubr.msk.f32.vlgmr.msra.gmra.mrb[0].mxu0 %vm301_vm0, %v1543_v4  ;;  %v1103_v4 = vld [vmem:[#allocation3 + $0xd0] sm:$0xff] }
  0x65   : > { %6530 = vmatmul.mubr.msk.f32.gmra.mrb[4].mxu1 %vm301_vm0, %v682_v33  ;;  %6606 = vmatpush3.msra.mxu0 %v6060_v46  ;;  %v957_v46 = vld [vmem:[#allocation3 + $0x98] sm:$0xff]  ;;  %v1694_v33 = vld [vmem:[#allocation3 + $0x1e8] sm:$0xff] }
  0x66   : > { %6532 = vmatprep.mubr.msk.f32.mxu1 %vm301_vm0, %v683_v27  ;;  %6596 = vmatprep.mubr.msk.f32.mxu0 %vm301_vm0, %v1544_v34  ;;  %v1695_v27 = vld [vmem:[#allocation3 + $0x1f0] sm:$0xff]  ;;  %v1104_v34 = vld [vmem:[#allocation3 + $0xd8] sm:$0xff] }
  0x67   : > { %6619 = vmatprep.subr.mxu0 %v6069_v41 }
  0x68   : > { %6597 = vmatmul.mubr.msk.f32.gmra.mrb[2].mxu0 %vm301_vm0, %v1545_v54  ;;  %v1106_v54 = vld [vmem:[#allocation3 + $0xe8] sm:$0xff] }
  0x69   : > { %6533 = vmatmul.mubr.msk.f32.gmra.mrb[6].mxu1 %vm301_vm0, %v684_v45  ;;  %6599 = vmatprep.mubr.msk.f32.mxu0 %vm301_vm0, %v1546_v25  ;;  %v1836_v45 = vld [vmem:[#allocation3 + $0x200] sm:$0xff]  ;;  %v1107_v25 = vld [vmem:[#allocation3 + $0xf0] sm:$0xff] }
  0x6a   : > { %6537 = vmatprep.mubr.msk.f32.mxu1 %vm301_vm0, %v7496_v47  ;;  %v959_v47 = vld [vmem:[#allocation3 + $0xa8] sm:$0xff] }
  0x6c   : > { %6600 = vmatmul.mubr.msk.f32.gmra.mrb[4].mxu0 %vm301_vm0, %v1547_v61  ;;  %v1108_v61 = vld [vmem:[#allocation3 + $0xf8] sm:$0xff] }
  0x6d   : > { %6538 = vmatmul.mubr.msk.f32.vlgmr.msra.gmra.mrb[0].mxu1 %vm301_vm0, %v955_v60  ;;  %6602 = vmatprep.mubr.msk.f32.mxu0 %vm301_vm0, %v1548_v62  ;;  %v1838_v60 = vld [vmem:[#allocation3 + $0x210] sm:$0xff]  ;;  %v1252_v62 = vld [vmem:[#allocation3 + $0x120] sm:$0xff] }
  0x6e   : > { %6550 = vmatpush3.msra.mxu1 %v6024_v9  ;;  %6540 = vmatprep.mubr.msk.f32.mxu1 %vm301_vm0, %v956_v28  ;;  %v960_v9 = vld [vmem:[#allocation3 + $0xb0] sm:$0xff]  ;;  %v1839_v28 = vld [vmem:[#allocation3 + $0x218] sm:$0xff] }
  0x6f   : > { %6885 = vmatprep.subr.mxu1 %v7220_v1 }
  0x70   : > { %6603 = vmatmul.mubr.msk.f32.gmra.mrb[6].mxu0 %vm301_vm0, %v7500_v53  ;;  %v1101_v53 = vld [vmem:[#allocation3 + $0xc0] sm:$0xff] }
  0x71   : > { %6541 = vmatmul.mubr.msk.f32.gmra.mrb[2].mxu1 %vm301_vm0, %v957_v46  ;;  %6607 = vmatprep.mubr.msk.f32.mxu0 %vm301_vm0, %v1689_v32  ;;  %v1253_v46 = vld [vmem:[#allocation3 + $0x128] sm:$0xff]  ;;  %v1254_v32 = vld [vmem:[#allocation3 + $0x130] sm:$0xff] }
  0x72   : > { %6543 = vmatprep.mubr.msk.f32.mxu1 %vm301_vm0, %v958_v63  ;;  %v1841_v63 = vld [vmem:[#allocation3 + $0x228] sm:$0xff] }
  0x74   : > { %6608 = vmatmul.mubr.msk.f32.vlgmr.msra.gmra.mrb[0].mxu0 %vm301_vm0, %v1690_v5  ;;  %v1255_v5 = vld [vmem:[#allocation3 + $0x138] sm:$0xff] }
  0x75   : > { %6544 = vmatmul.mubr.msk.f32.gmra.mrb[4].mxu1 %vm301_vm0, %v959_v47  ;;  %6620 = vmatpush3.msra.mxu0 %v6069_v41  ;;  %v1105_v41 = vld [vmem:[#allocation3 + $0xe0] sm:$0xff]  ;;  %v1842_v47 = vld [vmem:[#allocation3 + $0x230] sm:$0xff] }
  0x76   : > { %6546 = vmatprep.mubr.msk.f32.mxu1 %vm301_vm0, %v960_v9  ;;  %6610 = vmatprep.mubr.msk.f32.mxu0 %vm301_vm0, %v1691_v0  ;;  %v374_v9 = vadd.f32 %v7371_v38, %v7446_v7  ;;  %v373_v0 = vadd.f32 %v7367_v36, %v7369_v37 }
  0x78   : > { %6611 = vmatmul.mubr.msk.f32.gmra.mrb[2].mxu0 %vm301_vm0, %v1692_v3  ;;  %v375_v3 = vadd.f32 %v7376_v42, %v7448_v8 }
  0x79   : > { %6547 = vmatmul.mubr.msk.f32.gmra.mrb[6].mxu1 %vm301_vm0, %v961_v16  ;;  %6613 = vmatprep.mubr.msk.f32.mxu0 %vm301_vm0, %v1693_v17  ;;  %v407_v16 = vadd.f32 %v7387_v49, %v374_v9  ;;  %v377_v17 = vadd.f32 %v7380_v44, %v7477_v35 }
  0x7a   : > { %6551 = vmatprep.mubr.msk.f32.mxu1 %vm301_vm0, %v1101_v53  ;;  %v406_v53 = vadd.f32 %v7385_v48, %v373_v0 }
  0x7c   : > { %6614 = vmatmul.mubr.msk.f32.gmra.mrb[4].mxu0 %vm301_vm0, %v1694_v33  ;;  %v440_v33 = vadd.f32 %v407_v16, %v7448_v8 }
  0x7d   : > { %6552 = vmatmul.mubr.msk.f32.vlgmr.msra.gmra.mrb[0].mxu1 %vm301_vm0, %v1102_v23  ;;  %6616 = vmatprep.mubr.msk.f32.mxu0 %vm301_vm0, %v1695_v27  ;;  %v376_v23 = vadd.f32 %v7378_v43, %v7465_v21  ;;  %v439_v27 = vadd.f32 %v406_v53, %v7446_v7 }
  0x7e   : > { %6886 = vmatpush3.msra.mxu1 %v7220_v1  ;;  %6554 = vmatprep.mubr.msk.f32.mxu1 %vm301_vm0, %v1103_v4  ;;  %v1837_v1 = vld [vmem:[#allocation3 + $0x208] sm:$0xff]  ;;  %v408_v4 = vadd.f32 %v7409_v57, %v375_v3 }
  0x80   : > { %6617 = vmatmul.mubr.msk.f32.gmra.mrb[6].mxu0 %vm301_vm0, %v7521_v59  ;;  %v1840_v59 = vld [vmem:[#allocation3 + $0x220] sm:$0xff] }
  0x81   : > { %6555 = vmatmul.mubr.msk.f32.gmra.mrb[2].mxu1 %vm301_vm0, %v1104_v34  ;;  %6621 = vmatprep.mubr.msk.f32.mxu0 %vm301_vm0, %v1836_v45  ;;  %v410_v34 = vadd.f32 %v7427_v2, %v377_v17 }
  0x82   : > { %6557 = vmatprep.mubr.msk.f32.mxu1 %vm301_vm0, %v1105_v41  ;;  %v409_v41 = vadd.f32 %v7411_v58, %v376_v23 }
  0x84   : > { %6622 = vmatmul.mubr.msk.f32.vlgmr.msra.gmra.mrb[0].mxu0 %vm301_vm0, %v1837_v1  ;;  %v441_v1 = vadd.f32 %v408_v4, %v7465_v21 }
  0x85   : > { %6558 = vmatmul.mubr.msk.f32.gmra.mrb[4].mxu1 %vm301_vm0, %v1106_v54  ;;  %6624 = vmatprep.mubr.msk.f32.mxu0 %vm301_vm0, %v1838_v60  ;;  %v473_v54 = vadd.f32 %v440_v33, %v7376_v42  ;;  %v443_v60 = vadd.f32 %v410_v34, %v7479_v39 }
  0x86   : > { %6560 = vmatprep.mubr.msk.f32.mxu1 %vm301_vm0, %v1107_v25  ;;  %v378_v25 = vadd.f32 %v7389_v50, %v7479_v39 }
  0x88   : > { %6625 = vmatmul.mubr.msk.f32.gmra.mrb[2].mxu0 %vm301_vm0, %v1839_v28 }
  0x89   : > { %6561 = vmatmul.mubr.msk.f32.gmra.mrb[6].mxu1 %vm301_vm0, %v1108_v61  ;;  %6627 = vmatprep.mubr.msk.f32.mxu0 %vm301_vm0, %v1840_v59  ;;  %v442_v61 = vadd.f32 %v409_v41, %v7477_v35  ;;  %v474_v59 = vadd.f32 %v7378_v43, %v441_v1  ;;  %v2103_v41 = vstv %s6083_s10 }
  0x8a   : > { %6571 = vmatprep.mubr.msk.f32.mxu1 %vm301_vm0, %v1252_v62  ;;  %v506_v62 = vadd.f32 %v7409_v57, %v473_v54 }
  0x8b   : > { %v507_v9 = vadd.f32 %v7411_v58, %v474_v59 }
  0x8c   : > { %6628 = vmatmul.mubr.msk.f32.gmra.mrb[4].mxu0 %vm301_vm0, %v1841_v63  ;;  %v476_v63 = vadd.f32 %v443_v60, %v7389_v50 }
  0x8d   : > { %6572 = vmatmul.mubr.msk.f32.vlgmr.msra.gmra.mrb[4].mxu1 %vm301_vm0, %v1253_v46  ;;  %6630 = vmatprep.mubr.msk.f32.mxu0 %vm301_vm0, %v1842_v47  ;;  %v541_v23 = vadd.f32 %v507_v9, %v7477_v35 }
  0x8e   : > { %6574 = vmatprep.mubr.msk.f32.mxu1 %vm301_vm0, %v1254_v32  ;;  %v475_v32 = vadd.f32 %v442_v61, %v7380_v44  ;;  %v509_v16 = vadd.f32 %v7444_v6, %v476_v63 }
  0x90   : > { %6631 = vmatmul.mubr.msk.f32.gmra.mrb[6].mxu0 %vm301_vm0, %v7525_v18  ;;  %v438_v18 = vadd.f32 %v7367_v36, %v7342_v31  ;;  %v472_v36 = vadd.f32 %v7371_v38, %v439_v27  ;;  %v508_v3 = vadd.f32 %v7427_v2, %v475_v32  ;;  %v574_v27 = vadd.f32 %v541_v23, %v7380_v44 }
  0x91   : > { %6575 = vmatmul.mubr.msk.f32.gmra.mrb[6].mxu1 %vm301_vm0, %v1255_v5  ;;  %v540_v5 = vadd.f32 %v506_v62, %v7465_v21 }
  0x92   : > { %v471_v45 = vadd.f32 %v438_v18, %v7369_v37  ;;  %v411_v37 = vadd.f32 %v7444_v6, %v378_v25  ;;  %v505_v46 = vadd.f32 %v7387_v49, %v472_v36  ;;  %v543_v18 = vadd.f32 %v509_v16, %v7481_v40 }
  0x93   : > { %v573_v17 = vadd.f32 %v540_v5, %v7378_v43  ;;  %v542_v33 = vadd.f32 %v508_v3, %v7479_v39  ;;  %v607_v44 = vadd.f32 %v574_v27, %v7427_v2 }
  0x94   : > { %v504_v28 = vadd.f32 %v7385_v48, %v471_v45  ;;  %v444_v48 = vadd.f32 %v411_v37, %v7481_v40  ;;  %v539_v0 = vadd.f32 %v505_v46, %v7448_v8 }
  0x95   : > { %v606_v4 = vadd.f32 %v573_v17, %v7411_v58  ;;  %v575_v45 = vadd.f32 %v542_v33, %v7389_v50  ;;  %v2575_v33 = vld [vmem:[#allocation3 + $0x40] sm:$0xff] }
  0x96   : > { %v538_v47 = vadd.f32 %v504_v28, %v7446_v7  ;;  %v477_v7 = vadd.f32 %v444_v48, %v7407_v56  ;;  %v572_v21 = vadd.f32 %v539_v0, %v7376_v42  ;;  %v576_v42 = vadd.f32 %v543_v18, %v7407_v56  ;;  %v6088_v18 = vld [vmem:[%s8863_s3 + $0x8] sm:$0xff]  ;;  %6635 = vmatprep.mubr.msk.f32.mxu1 %vm301_vm0, %v2575_v33 }
  0x97   : > { %v608_v36 = vadd.f32 %v575_v45, %v7444_v6  ;;  %v379_v0 = vadd.f32 %v7407_v56, %v7481_v40  ;;  %v4186_v56 = vld [vmem:[#allocation2 + $0x1] sm:$0xff]  ;;  %6633 = vmatprep.subr.mxu1 %v6088_v18 }
  0x98   : > { %v571_v53 = vadd.f32 %v538_v47, %v7371_v38  ;;  %v510_v38 = vadd.f32 %v7461_v19, %v477_v7  ;;  %v605_v35 = vadd.f32 %v572_v21, %v7409_v57  ;;  %v609_v50 = vadd.f32 %v576_v42, %v7461_v19  ;;  %6634 = vmatpush3.msra.mxu1 %v6088_v18  ;;  %v4162_v40 = vld [vmem:[#allocation2] sm:$0xff] }
  0x99   : > { %v412_v16 = vadd.f32 %v7461_v19, %v379_v0  ;;  %v4202_v19 = vmax.f32 %v4186_v56, 0.0 }
  0x9a   : > { %v604_v8 = vadd.f32 %v571_v53, %v7387_v49  ;;  %v544_v58 = vadd.f32 %v7498_v51, %v510_v38 }
  0x9b   : > { %v445_v3 = vadd.f32 %v7498_v51, %v412_v16  ;;  %4210 = vst.msk [vmem:[#allocation3 + $0x40] sm:$0xff] %vm301_vm0, %v4202_v19  ;;  %v4170_v51 = vmax.f32 %v4162_v40, 0.0 }
  0x9c   : > { %v577_v61 = vadd.f32 %v7519_v55, %v544_v58  ;;  %v1999_v58 = vstv %s1998_s15  ;;  %s6171_s15 = sld [smem:[#allocation4 + $0x101]] }
  0x9d   : > { %v478_v53 = vadd.f32 %v7519_v55, %v445_v3  ;;  %v4194_v55 = vadd.f32 %v4186_v56, %v4162_v40  ;;  %v2002_v18 = vmul.f32 %v1999_v58, %v7284_v12 }
  0x9e   : > { %v610_v63 = vadd.f32 %v577_v61, %v7463_v20  ;;  %v2001_v61 = vmul.f32 %v1999_v58, %v7282_v11 }
  0x9f   : > { %v511_v17 = vadd.f32 %v7463_v20, %v478_v53  ;;  %v7786_v20 = vld [vmem:[%s8863_s3] sm:$0xff] }
  0xa0   : > { %6647 = vmatprep.subr.mxu1 %v7786_v20 }
  0xa1   : > { %v7712_v34 = vpop.permute.xlu0 %631  ;;  %v7714_v43 = vpop.permute.xlu1 %641  ;;  %v545_v23 = vadd.f32 %v7324_v26, %v511_v17  ;;  %v2003_v17 = vmul.f32 %v1999_v58, %v7292_v13 }
  0xa2   : > { %v7720_v39 = vmul.f32 %v7712_v34, %v604_v8  ;;  %v7723_v49 = vmul.f32 %v7714_v43, %v606_v4  ;;  %v7798_v8 = vld [vmem:[#allocation3] sm:$0xff] }
  0xa3   : > { %v578_v7 = vadd.f32 %v7334_v29, %v545_v23  ;;  %4178 = vst.msk [vmem:[#allocation3] sm:$0xff] %vm301_vm0, %v4170_v51  ;;  %v4218_v4 = vld [vmem:[#allocation2 + $0x2] sm:$0xff] }
  0xa4   : > { %8897 = vst [vmem:[#allocation14_spill] sm:$0xff] %v7720_v39  ;;  %8898 = vst [vmem:[#allocation15_spill] sm:$0xff] %v7723_v49  ;;  %v2104_v54 = vmul.f32 %v2103_v41, %v7720_v39  ;;  %v2106_v1 = vmul.f32 %v2103_v41, %v7723_v49  ;;  %v7801_v27 = vadd.f32 %v4218_v4, %v4194_v55  ;;  %v4234_v38 = vmax.f32 %v4218_v4, 0.0 }
  0xa5   : > { %v7729_v57 = vpop.permute.xlu0 %636  ;;  %v7731_v25 = vpop.permute.xlu1 %646  ;;  %v611_v21 = vadd.f32 %v7336_v30, %v578_v7 }
  0xa6   : > { %8899 = vst [vmem:[#allocation16_spill] sm:$0xff] %v7729_v57  ;;  %v7736_v60 = vmul.f32 %v7729_v57, %v605_v35  ;;  %2120 = vrot.lane.b32.xlu0 %v2104_v54, %s7142_s19  ;;  %v7740_v2 = vmul.f32 %v7731_v25, %v607_v44  ;;  %2124 = vrot.lane.b32.xlu1 %v2106_v1, %s7142_s19  ;;  %8906 = vst [vmem:[#allocation23_spill] sm:$0xff] %v7801_v27  ;;  %v7803_v35 = vld [vmem:[#allocation3 + $0x80] sm:$0xff]  ;;  %v7806_v54 = vstv %s6079_s16 }
  0xa7   : > { %4242 = vst.msk [vmem:[#allocation3 + $0x80] sm:$0xff] %vm301_vm0, %v4234_v38  ;;  %v2020_v51 = vmul.f32 %v7806_v54, %v7723_v49 }
  0xa8   : > { %8900 = vst [vmem:[#allocation17_spill] sm:$0xff] %v7736_v60  ;;  %8901 = vst [vmem:[#allocation18_spill] sm:$0xff] %v7740_v2  ;;  %v2105_v28 = vmul.f32 %v2103_v41, %v7736_v60  ;;  %v2107_v46 = vmul.f32 %v2103_v41, %v7740_v2  ;;  %v2021_v33 = vmul.f32 %v7806_v54, %v7740_v2 }
  0xa9   : > { %v7745_v62 = vpop.permute.xlu1 %656  ;;  %v7747_v59 = vpop.permute.xlu0 %651 }
  0xaa   : > { %2122 = vrot.lane.b32.xlu0 %v2105_v28, %s7142_s19  ;;  %v7751_v6 = vmul.f32 %v7745_v62, %v609_v50  ;;  %v7754_v37 = vmul.f32 %v7747_v59, %v608_v36  ;;  %v6078_v50 = vld [vmem:[%s8865_s5] ss:$0 sm:$0xff] }
  0xac   : > { %8902 = vst [vmem:[#allocation19_spill] sm:$0xff] %v7751_v6  ;;  %8903 = vst [vmem:[#allocation20_spill] sm:$0xff] %v7754_v37  ;;  %v2108_v32 = vmul.f32 %v2103_v41, %v7754_v37  ;;  %v2109_v9 = vmul.f32 %v2103_v41, %v7751_v6 }
  0xad   : > { %v7759_v47 = vpop.permute.xlu0 %661  ;;  %v7788_v26 = vpop.permute.xlu1 %666 }
  0xae   : > { %2126 = vrot.lane.b32.xlu0 %v2107_v46, %s7142_s19  ;;  %v7763_v5 = vmul.f32 %v7759_v47, %v610_v63  ;;  %2128 = vrot.lane.b32.xlu1 %v2108_v32, %s7142_s19  ;;  %v7793_v29 = vmul.f32 %v7788_v26, %v611_v21  ;;  %v2000_v63 = vmul.f32 %v1999_v58, %v7280_v10  ;;  %v8051_v10 = vld [vmem:[#allocation3 + $0x1f8] sm:$0xff] }
  0xaf   : > { %v2019_v32 = vmul.f32 %v7806_v54, %v7736_v60 }
  0xb0   : > { %8904 = vst [vmem:[#allocation21_spill] sm:$0xff] %v7763_v5  ;;  %v2110_v48 = vmul.f32 %v2103_v41, %v7763_v5  ;;  %8905 = vst [vmem:[#allocation22_spill] sm:$0xff] %v7793_v29  ;;  %v7796_v30 = vmul.f32 %v2103_v41, %v7793_v29 }
  0xb2   : > { %2130 = vrot.lane.b32.xlu0 %v2109_v9, %s7142_s19  ;;  %2132 = vrot.lane.b32.xlu1 %v2110_v48, %s7142_s19  ;;  %v2018_v48 = vmul.f32 %v7806_v54, %v7720_v39 }
 0x150   : > { %v6553_v42 = vpop.f32.mrb[0].mxu1 }
 0x151   : > { %v1201_v41 = vpop.f32.mrb[1].mxu1 }
 0x154   : > { %v6556_v45 = vpop.f32.mrb[2].mxu1 }
 0x155   : > { %v1211_v44 = vpop.f32.mrb[3].mxu1 }
 0x157   : > { %v6623_v1 = vpop.f32.mrb[0].mxu0 }
 0x158   : > { %v7811_v36 = vadd.f32 %v6623_v1, %v6553_v42  ;;  %v1936_v28 = vpop.f32.mrb[1].mxu0  ;;  %v2005_v1 = vmul.f32 %v1999_v58, %v7296_v15 }
 0x159   : > { %v7814_v46 = vadd.f32 %v1936_v28, %v1201_v41  ;;  %v4353_v41 = vld [vmem:[#allocation2 + $0x90] sm:$0xff] }
 0x15a   : > { %v1991_v9 = vadd.f32 %v7811_v36, %v6078_v50  ;;  %v4369_v28 = vmax.f32 %v4353_v41, 0.0 }
 0x15b   : > { %v1990_v0 = vadd.f32 %v7814_v46, %v6078_v50  ;;  %v6626_v16 = vpop.f32.mrb[2].mxu0 }
 0x15c   : > { %v2009_v3 = vadd.f32 %v2001_v61, %v1991_v9  ;;  %v7823_v53 = vadd.f32 %v6626_v16, %v6556_v45  ;;  %v1946_v23 = vpop.f32.mrb[3].mxu0  ;;  %v2004_v9 = vmul.f32 %v1999_v58, %v7294_v14 }
 0x15d   : > { %v2008_v7 = vadd.f32 %v2000_v63, %v1990_v0  ;;  %v7826_v21 = vadd.f32 %v1946_v23, %v1211_v44 }
 0x15e   : > { %8907 = vst [vmem:[#allocation24_spill] sm:$0xff] %v7823_v53  ;;  %v7831_v56 = vadd.f32 %v2019_v32, %v2009_v3  ;;  %v1993_v19 = vadd.f32 %v7823_v53, %v6078_v50 }
 0x15f   : > { %8908 = vst [vmem:[#allocation25_spill] sm:$0xff] %v7826_v21  ;;  %v7836_v55 = vadd.f32 %v2018_v48, %v2008_v7  ;;  %v1992_v4 = vadd.f32 %v7826_v21, %v6078_v50  ;;  %v6629_v42 = vpop.f32.mrb[4].mxu0  ;;  %v7849_v48 = vld [vmem:[#allocation3 + $0x1b8] sm:$0xff] }
 0x160   : > { %v6573_v40 = vpop.f32.mrb[4].mxu1  ;;  %2271 = vst.msk [vmem:[#allocation2 + $0x21] sm:$0xff] %vm301_vm0, %v7831_v56  ;;  %v2011_v45 = vadd.f32 %v2003_v17, %v1993_v19  ;;  %v1956_v61 = vpop.f32.mrb[5].mxu0  ;;  %4377 = vst.msk [vmem:[#allocation3 + $0x1b8] sm:$0xff] %vm301_vm0, %v4369_v28  ;;  %v2025_v28 = vmul.f32 %v7806_v54, %v7793_v29 }
 0x161   : > { %v1368_v38 = vpop.f32.mrb[5].mxu1  ;;  %v7841_v44 = vadd.f32 %v6629_v42, %v6573_v40  ;;  %2270 = vst.msk [vmem:[#allocation2 + $0x11] sm:$0xff] %vm301_vm0, %v7836_v55  ;;  %v2010_v63 = vadd.f32 %v2002_v18, %v1992_v4  ;;  %v2023_v18 = vmul.f32 %v7806_v54, %v7751_v6  ;;  %v2007_v4 = vmul.f32 %v1999_v58, %v7321_v24 }
 0x162   : > { %v7846_v32 = vadd.f32 %v1956_v61, %v1368_v38  ;;  %v7851_v0 = vadd.f32 %v2021_v33, %v2011_v45  ;;  %v2006_v45 = vmul.f32 %v1999_v58, %v7318_v22 }
 0x163   : > { %8909 = vst [vmem:[#allocation26_spill] sm:$0xff] %v7841_v44  ;;  %v1995_v16 = vadd.f32 %v7841_v44, %v6078_v50  ;;  %v7855_v17 = vadd.f32 %v2020_v51, %v2010_v63  ;;  %v6632_v19 = vpop.f32.mrb[6].mxu0  ;;  %v2022_v51 = vmul.f32 %v7806_v54, %v7754_v37 }
 0x164   : > { %v6576_v3 = vpop.f32.mrb[6].mxu1  ;;  %v1994_v23 = vadd.f32 %v7846_v32, %v6078_v50  ;;  %2273 = vst.msk [vmem:[#allocation2 + $0x41] sm:$0xff] %vm301_vm0, %v7851_v0  ;;  %v1966_v38 = vpop.f32.mrb[7].mxu0 }
 0x165   : > { %v1378_v7 = vpop.f32.mrb[7].mxu1  ;;  %v2013_v40 = vadd.f32 %v2005_v1, %v1995_v16  ;;  %v7862_v33 = vadd.f32 %v6632_v19, %v6576_v3  ;;  %2272 = vst.msk [vmem:[#allocation2 + $0x31] sm:$0xff] %vm301_vm0, %v7855_v17 }
 0x166   : > { %v2012_v42 = vadd.f32 %v2004_v9, %v1994_v23  ;;  %v7869_v41 = vadd.f32 %v1966_v38, %v1378_v7 }
 0x167   : > { %8910 = vst [vmem:[#allocation27_spill] sm:$0xff] %v7862_v33  ;;  %v7872_v61 = vadd.f32 %v2023_v18, %v2013_v40  ;;  %v1997_v1 = vadd.f32 %v7862_v33, %v6078_v50  ;;  %v7880_v3 = vld [vmem:[#allocation2 + $0x21] sm:$0xff] }
 0x168   : > { %v7877_v63 = vadd.f32 %v2022_v51, %v2012_v42  ;;  %v1996_v16 = vadd.f32 %v7869_v41, %v6078_v50  ;;  %v7882_v19 = vld [vmem:[#allocation2 + $0x20] sm:$0xff]  ;;  %v7888_v23 = vld [vmem:[#allocation2 + $0x11] sm:$0xff]  ;;  %v2320_v7 = vmax.f32 %v7880_v3, 0.0  ;;  %v2024_v51 = vmul.f32 %v7806_v54, %v7763_v5 }
 0x169   : > { %v7884_v9 = vld [vmem:[#allocation2 + $0x22] sm:$0xff]  ;;  %2275 = vst.msk [vmem:[#allocation2 + $0x61] sm:$0xff] %vm301_vm0, %v7872_v61  ;;  %v2015_v58 = vadd.f32 %v2007_v4, %v1997_v1  ;;  %v7891_v18 = vld [vmem:[#allocation2 + $0x10] sm:$0xff]  ;;  %v2288_v40 = vmax.f32 %v7882_v19, 0.0  ;;  %v2319_v4 = vmax.f32 %v7888_v23, 0.0 }
 0x16a   : > { %v7894_v38 = vld [vmem:[#allocation2 + $0x12] sm:$0xff]  ;;  %v2352_v50 = vmax.f32 %v7884_v9, 0.0  ;;  %2274 = vst.msk [vmem:[#allocation2 + $0x51] sm:$0xff] %vm301_vm0, %v7877_v63  ;;  %v2014_v42 = vadd.f32 %v2006_v45, %v1996_v16  ;;  %v2287_v1 = vmax.f32 %v7891_v18, 0.0  ;;  %2328 = vst.msk [vmem:[#allocation3 + $0x50] sm:$0xff] %vm301_vm0, %v2320_v7 }
 0x16b   : > { %v7903_v27 = vadd.f32 %v2025_v28, %v2015_v58  ;;  %2296 = vst.msk [vmem:[#allocation3 + $0x10] sm:$0xff] %vm301_vm0, %v2288_v40  ;;  %v2351_v29 = vmax.f32 %v7894_v38, 0.0  ;;  %2391 = vst.msk [vmem:[#allocation3 + $0xc8] sm:$0xff] %vm301_vm0, %v2288_v40  ;;  %v7918_v45 = vld [vmem:[#allocation2 + $0x41] sm:$0xff] }
 0x16c   : > { %2360 = vst.msk [vmem:[#allocation3 + $0x90] sm:$0xff] %vm301_vm0, %v2352_v50  ;;  %2423 = vst.msk [vmem:[#allocation3 + $0x108] sm:$0xff] %vm301_vm0, %v2320_v7  ;;  %v7915_v54 = vadd.f32 %v2024_v51, %v2014_v42  ;;  %v7921_v28 = vld [vmem:[#allocation2 + $0x40] sm:$0xff]  ;;  %v7929_v58 = vld [vmem:[#allocation2 + $0x31] sm:$0xff] }
 0x16d   : > { %2455 = vst.msk [vmem:[#allocation3 + $0x148] sm:$0xff] %vm301_vm0, %v2352_v50  ;;  %2486 = vst.msk [vmem:[#allocation3 + $0x180] sm:$0xff] %vm301_vm0, %v2288_v40  ;;  %v7923_v16 = vld [vmem:[#allocation2 + $0x42] sm:$0xff]  ;;  %v7932_v40 = vld [vmem:[#allocation2 + $0x30] sm:$0xff] }
 0x16e   : > { %2518 = vst.msk [vmem:[#allocation3 + $0x1c0] sm:$0xff] %vm301_vm0, %v2320_v7  ;;  %2550 = vst.msk [vmem:[#allocation3 + $0x200] sm:$0xff] %vm301_vm0, %v2352_v50  ;;  %v2322_v7 = vmax.f32 %v7918_v45, 0.0  ;;  %v2290_v50 = vmax.f32 %v7921_v28, 0.0  ;;  %v7936_v51 = vld [vmem:[#allocation2 + $0x32] sm:$0xff]  ;;  %v2354_v42 = vmax.f32 %v7923_v16, 0.0 }
 0x16f   : > { %2327 = vst.msk [vmem:[#allocation3 + $0x48] sm:$0xff] %vm301_vm0, %v2319_v4  ;;  %2295 = vst.msk [vmem:[#allocation3 + $0x8] sm:$0xff] %vm301_vm0, %v2287_v1  ;;  %v2353_v6 = vmax.f32 %v7936_v51, 0.0 }
 0x170   : > { %2390 = vst.msk [vmem:[#allocation3 + $0xc0] sm:$0xff] %vm301_vm0, %v2287_v1  ;;  %2422 = vst.msk [vmem:[#allocation3 + $0x100] sm:$0xff] %vm301_vm0, %v2319_v4  ;;  %v2321_v4 = vmax.f32 %v7929_v58, 0.0  ;;  %v2289_v1 = vmax.f32 %v7932_v40, 0.0  ;;  %v7958_v5 = vld [vmem:[#allocation2 + $0x60] sm:$0xff] }
 0x171   : > { %2277 = vst.msk [vmem:[#allocation2 + $0x81] sm:$0xff] %vm301_vm0, %v7903_v27  ;;  %2359 = vst.msk [vmem:[#allocation3 + $0x88] sm:$0xff] %vm301_vm0, %v2351_v29  ;;  %v7961_v2 = vld [vmem:[#allocation2 + $0x62] sm:$0xff]  ;;  %v2292_v37 = vmax.f32 %v7958_v5, 0.0  ;;  %v7975_v60 = vld [vmem:[#allocation2 + $0x52] sm:$0xff] }
 0x172   : > { %2454 = vst.msk [vmem:[#allocation3 + $0x140] sm:$0xff] %vm301_vm0, %v2351_v29  ;;  %2276 = vst.msk [vmem:[#allocation2 + $0x71] sm:$0xff] %vm301_vm0, %v7915_v54  ;;  %v7955_v29 = vld [vmem:[#allocation2 + $0x61] sm:$0xff]  ;;  %v2356_v49 = vmax.f32 %v7961_v2, 0.0  ;;  %v2577_v22 = vld [vmem:[#allocation3 + $0x50] sm:$0xff] }
 0x173   : > { %2330 = vst.msk [vmem:[#allocation3 + $0x60] sm:$0xff] %vm301_vm0, %v2322_v7  ;;  %2298 = vst.msk [vmem:[#allocation3 + $0x20] sm:$0xff] %vm301_vm0, %v2290_v50 }
 0x174   : > { %2362 = vst.msk [vmem:[#allocation3 + $0xa0] sm:$0xff] %vm301_vm0, %v2354_v42  ;;  %2393 = vst.msk [vmem:[#allocation3 + $0xd8] sm:$0xff] %vm301_vm0, %v2290_v50 }
 0x175   : > { %2425 = vst.msk [vmem:[#allocation3 + $0x118] sm:$0xff] %vm301_vm0, %v2322_v7  ;;  %2457 = vst.msk [vmem:[#allocation3 + $0x158] sm:$0xff] %vm301_vm0, %v2354_v42 }
 0x176   : > { %2488 = vst.msk [vmem:[#allocation3 + $0x190] sm:$0xff] %vm301_vm0, %v2290_v50  ;;  %2520 = vst.msk [vmem:[#allocation3 + $0x1d0] sm:$0xff] %vm301_vm0, %v2322_v7  ;;  %v7969_v7 = vld [vmem:[#allocation2 + $0x51] sm:$0xff]  ;;  %v2324_v50 = vmax.f32 %v7955_v29, 0.0  ;;  %v2576_v15 = vld [vmem:[#allocation3 + $0x48] sm:$0xff] }
 0x177   : > { %2552 = vst.msk [vmem:[#allocation3 + $0x210] sm:$0xff] %vm301_vm0, %v2354_v42  ;;  %2329 = vst.msk [vmem:[#allocation3 + $0x58] sm:$0xff] %vm301_vm0, %v2321_v4  ;;  %v7972_v42 = vld [vmem:[#allocation2 + $0x50] sm:$0xff]  ;;  %v2323_v39 = vmax.f32 %v7969_v7, 0.0  ;;  %6636 = vmatmul.mubr.msk.f32.vlgmr.msra.gmra.mrb[8].mxu1 %vm301_vm0, %v2576_v15 }
 0x178   : > { %2297 = vst.msk [vmem:[#allocation3 + $0x18] sm:$0xff] %vm301_vm0, %v2289_v1  ;;  %2361 = vst.msk [vmem:[#allocation3 + $0x98] sm:$0xff] %vm301_vm0, %v2353_v6  ;;  %v7998_v13 = vld [vmem:[#allocation2 + $0x80] sm:$0xff]  ;;  %6648 = vmatpush3.msra.mxu1 %v7786_v20  ;;  %6638 = vmatprep.mubr.msk.f32.mxu1 %vm301_vm0, %v2577_v22 }
 0x179   : > { %2392 = vst.msk [vmem:[#allocation3 + $0xd0] sm:$0xff] %vm301_vm0, %v2289_v1  ;;  %2424 = vst.msk [vmem:[#allocation3 + $0x110] sm:$0xff] %vm301_vm0, %v2321_v4  ;;  %v8007_v15 = vld [vmem:[#allocation2 + $0x71] sm:$0xff] }
 0x17a   : > { %2456 = vst.msk [vmem:[#allocation3 + $0x150] sm:$0xff] %vm301_vm0, %v2353_v6  ;;  %2487 = vst.msk [vmem:[#allocation3 + $0x188] sm:$0xff] %vm301_vm0, %v2289_v1  ;;  %v2291_v1 = vmax.f32 %v7972_v42, 0.0  ;;  %v2325_v14 = vmax.f32 %v8007_v15, 0.0  ;;  %v2579_v22 = vld [vmem:[#allocation3 + $0x60] sm:$0xff] }
 0x17b   : > { %2519 = vst.msk [vmem:[#allocation3 + $0x1c8] sm:$0xff] %vm301_vm0, %v2321_v4  ;;  %2551 = vst.msk [vmem:[#allocation3 + $0x208] sm:$0xff] %vm301_vm0, %v2353_v6  ;;  %v2355_v4 = vmax.f32 %v7975_v60, 0.0  ;;  %v6105_v6 = vld [vmem:[%s8863_s3 + $0x10] sm:$0xff] }
 0x17c   : > { %2332 = vst.msk [vmem:[#allocation3 + $0x70] sm:$0xff] %vm301_vm0, %v2324_v50  ;;  %2300 = vst.msk [vmem:[#allocation3 + $0x30] sm:$0xff] %vm301_vm0, %v2292_v37  ;;  %6661 = vmatprep.subr.mxu1 %v6105_v6 }
 0x17d   : > { %2364 = vst.msk [vmem:[#allocation3 + $0xb0] sm:$0xff] %vm301_vm0, %v2356_v49  ;;  %2395 = vst.msk [vmem:[#allocation3 + $0xe8] sm:$0xff] %vm301_vm0, %v2292_v37 }
 0x17e   : > { %2427 = vst.msk [vmem:[#allocation3 + $0x128] sm:$0xff] %vm301_vm0, %v2324_v50  ;;  %2459 = vst.msk [vmem:[#allocation3 + $0x168] sm:$0xff] %vm301_vm0, %v2356_v49 }
 0x17f   : > { %2490 = vst.msk [vmem:[#allocation3 + $0x1a0] sm:$0xff] %vm301_vm0, %v2292_v37  ;;  %2522 = vst.msk [vmem:[#allocation3 + $0x1e0] sm:$0xff] %vm301_vm0, %v2324_v50  ;;  %v8011_v37 = vld [vmem:[#allocation2 + $0x72] sm:$0xff]  ;;  %v2389_v50 = vmax.f32 %v7998_v13, 0.0 }
 0x180   : > { %2554 = vst.msk [vmem:[#allocation3 + $0x220] sm:$0xff] %vm301_vm0, %v2356_v49  ;;  %2331 = vst.msk [vmem:[#allocation3 + $0x68] sm:$0xff] %vm301_vm0, %v2323_v39  ;;  %v8009_v49 = vld [vmem:[#allocation2 + $0x70] sm:$0xff] }
 0x181   : > { %2299 = vst.msk [vmem:[#allocation3 + $0x28] sm:$0xff] %vm301_vm0, %v2291_v1  ;;  %2363 = vst.msk [vmem:[#allocation3 + $0xa8] sm:$0xff] %vm301_vm0, %v2355_v4 }
 0x182   : > { %2394 = vst.msk [vmem:[#allocation3 + $0xe0] sm:$0xff] %vm301_vm0, %v2291_v1  ;;  %2426 = vst.msk [vmem:[#allocation3 + $0x120] sm:$0xff] %vm301_vm0, %v2323_v39 }
 0x183   : > { %2458 = vst.msk [vmem:[#allocation3 + $0x160] sm:$0xff] %vm301_vm0, %v2355_v4  ;;  %2489 = vst.msk [vmem:[#allocation3 + $0x198] sm:$0xff] %vm301_vm0, %v2291_v1  ;;  %v2293_v1 = vmax.f32 %v8009_v49, 0.0  ;;  %v2572_v33 = vld [vmem:[#allocation3 + $0x30] sm:$0xff] }
 0x184   : > { %2521 = vst.msk [vmem:[#allocation3 + $0x1d8] sm:$0xff] %vm301_vm0, %v2323_v39  ;;  %2553 = vst.msk [vmem:[#allocation3 + $0x218] sm:$0xff] %vm301_vm0, %v2355_v4  ;;  %v2357_v39 = vmax.f32 %v8011_v37, 0.0  ;;  %v2578_v4 = vld [vmem:[#allocation3 + $0x58] sm:$0xff] }
 0x185   : > { %2397 = vst.msk [vmem:[#allocation3 + $0xf8] sm:$0xff] %vm301_vm0, %v2389_v50  ;;  %2492 = vst.msk [vmem:[#allocation3 + $0x1b0] sm:$0xff] %vm301_vm0, %v2389_v50  ;;  %6639 = vmatmul.mubr.msk.f32.gmra.mrb[10].mxu1 %vm301_vm0, %v2578_v4  ;;  %v2581_v50 = vld [vmem:[#allocation3 + $0x70] sm:$0xff]  ;;  %v8032_v4 = vld [vmem:[#allocation2 + $0x81] sm:$0xff] }
 0x186   : > { %2333 = vst.msk [vmem:[#allocation3 + $0x78] sm:$0xff] %vm301_vm0, %v2325_v14  ;;  %2301 = vst.msk [vmem:[#allocation3 + $0x38] sm:$0xff] %vm301_vm0, %v2293_v1  ;;  %6641 = vmatprep.mubr.msk.f32.mxu1 %vm301_vm0, %v2579_v22  ;;  %v2421_v11 = vmax.f32 %v8032_v4, 0.0 }
 0x187   : > { %2365 = vst.msk [vmem:[#allocation3 + $0xb8] sm:$0xff] %vm301_vm0, %v2357_v39  ;;  %2396 = vst.msk [vmem:[#allocation3 + $0xf0] sm:$0xff] %vm301_vm0, %v2293_v1  ;;  %v2580_v20 = vld [vmem:[#allocation3 + $0x68] sm:$0xff] }
 0x188   : > { %2428 = vst.msk [vmem:[#allocation3 + $0x130] sm:$0xff] %vm301_vm0, %v2325_v14  ;;  %2460 = vst.msk [vmem:[#allocation3 + $0x170] sm:$0xff] %vm301_vm0, %v2357_v39 }
 0x189   : > { %2491 = vst.msk [vmem:[#allocation3 + $0x1a8] sm:$0xff] %vm301_vm0, %v2293_v1  ;;  %2523 = vst.msk [vmem:[#allocation3 + $0x1e8] sm:$0xff] %vm301_vm0, %v2325_v14  ;;  %6642 = vmatmul.mubr.msk.f32.gmra.mrb[12].mxu1 %vm301_vm0, %v2580_v20  ;;  %v8040_v14 = vld [vmem:[#allocation2 + $0x82] sm:$0xff]  ;;  %v2568_v20 = vld [vmem:[#allocation3 + $0x10] sm:$0xff] }
 0x18a   : > { %2555 = vst.msk [vmem:[#allocation3 + $0x228] sm:$0xff] %vm301_vm0, %v2357_v39  ;;  %6644 = vmatprep.mubr.msk.f32.mxu1 %vm301_vm0, %v2581_v50  ;;  %2429 = vst.msk [vmem:[#allocation3 + $0x138] sm:$0xff] %vm301_vm0, %v2421_v11  ;;  %v2567_v1 = vld [vmem:[#allocation3 + $0x8] sm:$0xff]  ;;  %v6114_v39 = vld [vmem:[%s8863_s3 + $0x18] sm:$0xff]  ;;  %v2453_v22 = vmax.f32 %v8040_v14, 0.0 }
 0x18b   : > { %2524 = vst.msk [vmem:[#allocation3 + $0x1f0] sm:$0xff] %vm301_vm0, %v2421_v11  ;;  %v4385_v11 = vld [vmem:[#allocation2 + $0x91] sm:$0xff]  ;;  %v2570_v50 = vld [vmem:[#allocation3 + $0x20] sm:$0xff] }
 0x18c   : > { %2461 = vst.msk [vmem:[#allocation3 + $0x178] sm:$0xff] %vm301_vm0, %v2453_v22  ;;  %2556 = vst.msk [vmem:[#allocation3 + $0x230] sm:$0xff] %vm301_vm0, %v2453_v22  ;;  %v8056_v22 = vld [vmem:[#allocation3 + $0x238] sm:$0xff] }
 0x18d   : > { %v2582_v12 = vld [vmem:[#allocation3 + $0x78] sm:$0xff] }
 0x18e   : > { %6645 = vmatmul.mubr.msk.f32.gmra.mrb[14].mxu1 %vm301_vm0, %v2582_v12  ;;  %v2569_v12 = vld [vmem:[#allocation3 + $0x18] sm:$0xff] }
 0x18f   : > { %6649 = vmatprep.mubr.msk.f32.mxu1 %vm301_vm0, %v7798_v8  ;;  %v4401_v8 = vmax.f32 %v4385_v11, 0.0  ;;  %v2573_v11 = vld [vmem:[#allocation3 + $0x38] sm:$0xff] }
 0x191   : > { %4409 = vst.msk [vmem:[#allocation3 + $0x1f8] sm:$0xff] %vm301_vm0, %v4401_v8  ;;  %v6123_v8 = vld [vmem:[%s8863_s3 + $0x20] sm:$0xff] }
 0x192   : > { %6650 = vmatmul.mubr.msk.f32.vlgmr.msra.gmra.mrb[8].mxu1 %vm301_vm0, %v2567_v1  ;;  %v2571_v1 = vld [vmem:[#allocation3 + $0x28] sm:$0xff] }
 0x193   : > { %6662 = vmatpush3.msra.mxu1 %v6105_v6  ;;  %6652 = vmatprep.mubr.msk.f32.mxu1 %vm301_vm0, %v2568_v20  ;;  %v4417_v6 = vld [vmem:[#allocation2 + $0x92] sm:$0xff] }
 0x194   : > { %6675 = vmatprep.subr.mxu1 %v6114_v39  ;;  %v4433_v20 = vmax.f32 %v4417_v6, 0.0  ;;  %v2847_v6 = vld [vmem:[#allocation3 + $0xa0] sm:$0xff] }
 0x196   : > { %6653 = vmatmul.mubr.msk.f32.gmra.mrb[10].mxu1 %vm301_vm0, %v2569_v12  ;;  %4441 = vst.msk [vmem:[#allocation3 + $0x238] sm:$0xff] %vm301_vm0, %v4433_v20  ;;  %v2844_v12 = vld [vmem:[#allocation3 + $0x88] sm:$0xff]  ;;  %v2850_v20 = vld [vmem:[#allocation3 + $0xb8] sm:$0xff] }
 0x197   : > { %6655 = vmatprep.mubr.msk.f32.mxu1 %vm301_vm0, %v2570_v50  ;;  %v2845_v50 = vld [vmem:[#allocation3 + $0x90] sm:$0xff] }
 0x19a   : > { %6656 = vmatmul.mubr.msk.f32.gmra.mrb[12].mxu1 %vm301_vm0, %v2571_v1  ;;  %v2848_v1 = vld [vmem:[#allocation3 + $0xa8] sm:$0xff] }
 0x19b   : > { %6658 = vmatprep.mubr.msk.f32.mxu1 %vm301_vm0, %v2572_v33  ;;  %v2846_v33 = vld [vmem:[#allocation3 + $0x98] sm:$0xff] }
 0x19e   : > { %6659 = vmatmul.mubr.msk.f32.gmra.mrb[14].mxu1 %vm301_vm0, %v2573_v11  ;;  %v2990_v11 = vld [vmem:[#allocation3 + $0xc0] sm:$0xff] }
 0x19f   : > { %6663 = vmatprep.mubr.msk.f32.mxu1 %vm301_vm0, %v7803_v35  ;;  %v2849_v35 = vld [vmem:[#allocation3 + $0xb0] sm:$0xff] }
 0x1a2   : > { %6664 = vmatmul.mubr.msk.f32.vlgmr.msra.gmra.mrb[8].mxu1 %vm301_vm0, %v2844_v12  ;;  %v6132_v12 = vld [vmem:[%s8863_s3 + $0x28] sm:$0xff] }
 0x1a3   : > { %6676 = vmatpush3.msra.mxu1 %v6114_v39  ;;  %6666 = vmatprep.mubr.msk.f32.mxu1 %vm301_vm0, %v2845_v50  ;;  %v2991_v39 = vld [vmem:[#allocation3 + $0xc8] sm:$0xff]  ;;  %v2992_v50 = vld [vmem:[#allocation3 + $0xd0] sm:$0xff] }
 0x1a4   : > { %6689 = vmatprep.subr.mxu1 %v6123_v8 }
 0x1a6   : > { %6667 = vmatmul.mubr.msk.f32.gmra.mrb[10].mxu1 %vm301_vm0, %v2846_v33  ;;  %v2993_v33 = vld [vmem:[#allocation3 + $0xd8] sm:$0xff] }
 0x1a7   : > { %6669 = vmatprep.mubr.msk.f32.mxu1 %vm301_vm0, %v2847_v6  ;;  %v2994_v6 = vld [vmem:[#allocation3 + $0xe0] sm:$0xff] }
 0x1aa   : > { %6670 = vmatmul.mubr.msk.f32.gmra.mrb[12].mxu1 %vm301_vm0, %v2848_v1  ;;  %v2995_v1 = vld [vmem:[#allocation3 + $0xe8] sm:$0xff] }
 0x1ab   : > { %6672 = vmatprep.mubr.msk.f32.mxu1 %vm301_vm0, %v2849_v35  ;;  %v2996_v35 = vld [vmem:[#allocation3 + $0xf0] sm:$0xff] }
 0x1ae   : > { %6673 = vmatmul.mubr.msk.f32.gmra.mrb[14].mxu1 %vm301_vm0, %v2850_v20  ;;  %v2997_v20 = vld [vmem:[#allocation3 + $0xf8] sm:$0xff] }
 0x1af   : > { %6677 = vmatprep.mubr.msk.f32.mxu1 %vm301_vm0, %v2990_v11  ;;  %v3137_v11 = vld [vmem:[#allocation3 + $0x100] sm:$0xff] }
 0x1b2   : > { %6678 = vmatmul.mubr.msk.f32.vlgmr.msra.gmra.mrb[8].mxu1 %vm301_vm0, %v2991_v39  ;;  %v6141_v39 = vld [vmem:[%s8863_s3 + $0x30] sm:$0xff] }
 0x1b3   : > { %6690 = vmatpush3.msra.mxu1 %v6123_v8  ;;  %6680 = vmatprep.mubr.msk.f32.mxu1 %vm301_vm0, %v2992_v50  ;;  %v3138_v8 = vld [vmem:[#allocation3 + $0x108] sm:$0xff]  ;;  %v3139_v50 = vld [vmem:[#allocation3 + $0x110] sm:$0xff] }
 0x1b4   : > { %6703 = vmatprep.subr.mxu1 %v6132_v12 }
 0x1b6   : > { %6681 = vmatmul.mubr.msk.f32.gmra.mrb[10].mxu1 %vm301_vm0, %v2993_v33  ;;  %v3140_v33 = vld [vmem:[#allocation3 + $0x118] sm:$0xff] }
 0x1b7   : > { %6683 = vmatprep.mubr.msk.f32.mxu1 %vm301_vm0, %v2994_v6  ;;  %v3141_v6 = vld [vmem:[#allocation3 + $0x120] sm:$0xff] }
 0x1ba   : > { %6684 = vmatmul.mubr.msk.f32.gmra.mrb[12].mxu1 %vm301_vm0, %v2995_v1  ;;  %v3142_v1 = vld [vmem:[#allocation3 + $0x128] sm:$0xff] }
 0x1bb   : > { %6686 = vmatprep.mubr.msk.f32.mxu1 %vm301_vm0, %v2996_v35  ;;  %v3143_v35 = vld [vmem:[#allocation3 + $0x130] sm:$0xff] }
 0x1be   : > { %6687 = vmatmul.mubr.msk.f32.gmra.mrb[14].mxu1 %vm301_vm0, %v2997_v20  ;;  %v3144_v20 = vld [vmem:[#allocation3 + $0x138] sm:$0xff] }
 0x1bf   : > { %6691 = vmatprep.mubr.msk.f32.mxu1 %vm301_vm0, %v3137_v11  ;;  %v3284_v11 = vld [vmem:[#allocation3 + $0x140] sm:$0xff] }
 0x1c2   : > { %6692 = vmatmul.mubr.msk.f32.vlgmr.msra.gmra.mrb[8].mxu1 %vm301_vm0, %v3138_v8  ;;  %v6150_v8 = vld [vmem:[%s8863_s3 + $0x38] sm:$0xff] }
 0x1c3   : > { %6704 = vmatpush3.msra.mxu1 %v6132_v12  ;;  %6694 = vmatprep.mubr.msk.f32.mxu1 %vm301_vm0, %v3139_v50  ;;  %v3285_v12 = vld [vmem:[#allocation3 + $0x148] sm:$0xff]  ;;  %v3286_v50 = vld [vmem:[#allocation3 + $0x150] sm:$0xff] }
 0x1c4   : > { %6717 = vmatprep.subr.mxu1 %v6141_v39 }
 0x1c6   : > { %6695 = vmatmul.mubr.msk.f32.gmra.mrb[10].mxu1 %vm301_vm0, %v3140_v33  ;;  %v3287_v33 = vld [vmem:[#allocation3 + $0x158] sm:$0xff] }
 0x1c7   : > { %6697 = vmatprep.mubr.msk.f32.mxu1 %vm301_vm0, %v3141_v6  ;;  %v3288_v6 = vld [vmem:[#allocation3 + $0x160] sm:$0xff] }
 0x1ca   : > { %6698 = vmatmul.mubr.msk.f32.gmra.mrb[12].mxu1 %vm301_vm0, %v3142_v1  ;;  %v3289_v1 = vld [vmem:[#allocation3 + $0x168] sm:$0xff] }
 0x1cb   : > { %6700 = vmatprep.mubr.msk.f32.mxu1 %vm301_vm0, %v3143_v35  ;;  %v3290_v35 = vld [vmem:[#allocation3 + $0x170] sm:$0xff] }
 0x1ce   : > { %6701 = vmatmul.mubr.msk.f32.gmra.mrb[14].mxu1 %vm301_vm0, %v3144_v20  ;;  %v3291_v20 = vld [vmem:[#allocation3 + $0x178] sm:$0xff] }
 0x1cf   : > { %6705 = vmatprep.mubr.msk.f32.mxu1 %vm301_vm0, %v3284_v11  ;;  %v3431_v11 = vld [vmem:[#allocation3 + $0x180] sm:$0xff] }
 0x1d2   : > { %6706 = vmatmul.mubr.msk.f32.vlgmr.msra.gmra.mrb[8].mxu1 %vm301_vm0, %v3285_v12  ;;  %v6159_v12 = vld [vmem:[%s8863_s3 + $0x40] sm:$0xff] }
 0x1d3   : > { %6718 = vmatpush3.msra.mxu1 %v6141_v39  ;;  %6708 = vmatprep.mubr.msk.f32.mxu1 %vm301_vm0, %v3286_v50  ;;  %v3432_v39 = vld [vmem:[#allocation3 + $0x188] sm:$0xff]  ;;  %v3433_v50 = vld [vmem:[#allocation3 + $0x190] sm:$0xff] }
 0x1d4   : > { %6731 = vmatprep.subr.mxu1 %v6150_v8 }
 0x1d6   : > { %6709 = vmatmul.mubr.msk.f32.gmra.mrb[10].mxu1 %vm301_vm0, %v3287_v33  ;;  %v3434_v33 = vld [vmem:[#allocation3 + $0x198] sm:$0xff] }
 0x1d7   : > { %6711 = vmatprep.mubr.msk.f32.mxu1 %vm301_vm0, %v3288_v6  ;;  %v3435_v6 = vld [vmem:[#allocation3 + $0x1a0] sm:$0xff] }
 0x1da   : > { %6712 = vmatmul.mubr.msk.f32.gmra.mrb[12].mxu1 %vm301_vm0, %v3289_v1  ;;  %v3436_v1 = vld [vmem:[#allocation3 + $0x1a8] sm:$0xff] }
 0x1db   : > { %6714 = vmatprep.mubr.msk.f32.mxu1 %vm301_vm0, %v3290_v35  ;;  %v3437_v35 = vld [vmem:[#allocation3 + $0x1b0] sm:$0xff] }
 0x1de   : > { %6715 = vmatmul.mubr.msk.f32.gmra.mrb[14].mxu1 %vm301_vm0, %v3291_v20  ;;  %v3578_v20 = vld [vmem:[#allocation3 + $0x1c0] sm:$0xff] }
 0x1df   : > { %6719 = vmatprep.mubr.msk.f32.mxu1 %vm301_vm0, %v3431_v11  ;;  %v3580_v11 = vld [vmem:[#allocation3 + $0x1d0] sm:$0xff] }
 0x1e2   : > { %6720 = vmatmul.mubr.msk.f32.vlgmr.msra.gmra.mrb[8].mxu1 %vm301_vm0, %v3432_v39  ;;  %v3581_v39 = vld [vmem:[#allocation3 + $0x1d8] sm:$0xff] }
 0x1e3   : > { %6732 = vmatpush3.msra.mxu1 %v6150_v8  ;;  %6722 = vmatprep.mubr.msk.f32.mxu1 %vm301_vm0, %v3433_v50  ;;  %v3579_v8 = vld [vmem:[#allocation3 + $0x1c8] sm:$0xff]  ;;  %v3582_v50 = vld [vmem:[#allocation3 + $0x1e0] sm:$0xff] }
 0x1e4   : > { %6745 = vmatprep.subr.mxu1 %v6159_v12 }
 0x1e6   : > { %6723 = vmatmul.mubr.msk.f32.gmra.mrb[10].mxu1 %vm301_vm0, %v3434_v33  ;;  %v3583_v33 = vld [vmem:[#allocation3 + $0x1e8] sm:$0xff] }
 0x1e7   : > { %6725 = vmatprep.mubr.msk.f32.mxu1 %vm301_vm0, %v3435_v6  ;;  %v3725_v6 = vld [vmem:[#allocation3 + $0x200] sm:$0xff] }
 0x1ea   : > { %6726 = vmatmul.mubr.msk.f32.gmra.mrb[12].mxu1 %vm301_vm0, %v3436_v1  ;;  %v3727_v1 = vld [vmem:[#allocation3 + $0x210] sm:$0xff] }
 0x1eb   : > { %6728 = vmatprep.mubr.msk.f32.mxu1 %vm301_vm0, %v3437_v35  ;;  %v3728_v35 = vld [vmem:[#allocation3 + $0x218] sm:$0xff] }
 0x1ee   : > { %6729 = vmatmul.mubr.msk.f32.gmra.mrb[14].mxu1 %vm301_vm0, %v7849_v48  ;;  %v3584_v48 = vld [vmem:[#allocation3 + $0x1f0] sm:$0xff] }
 0x1ef   : > { %6733 = vmatprep.mubr.msk.f32.mxu1 %vm301_vm0, %v3578_v20  ;;  %v3729_v20 = vld [vmem:[#allocation3 + $0x220] sm:$0xff] }
 0x1f2   : > { %6734 = vmatmul.mubr.msk.f32.vlgmr.msra.gmra.mrb[8].mxu1 %vm301_vm0, %v3579_v8  ;;  %v3730_v8 = vld [vmem:[#allocation3 + $0x228] sm:$0xff] }
 0x1f3   : > { %6746 = vmatpush3.msra.mxu1 %v6159_v12  ;;  %6736 = vmatprep.mubr.msk.f32.mxu1 %vm301_vm0, %v3580_v11  ;;  %v3726_v12 = vld [vmem:[#allocation3 + $0x208] sm:$0xff]  ;;  %v3731_v11 = vld [vmem:[#allocation3 + $0x230] sm:$0xff] }
 0x1f6   : > { %6737 = vmatmul.mubr.msk.f32.gmra.mrb[10].mxu1 %vm301_vm0, %v3581_v39 }
 0x1f7   : > { %6739 = vmatprep.mubr.msk.f32.mxu1 %vm301_vm0, %v3582_v50 }
 0x1fa   : > { %6740 = vmatmul.mubr.msk.f32.gmra.mrb[12].mxu1 %vm301_vm0, %v3583_v33  ;;  %v2313_v33 = vadd.f32 %v7929_v58, %v7932_v40 }
 0x1fb   : > { %6742 = vmatprep.mubr.msk.f32.mxu1 %vm301_vm0, %v3584_v48  ;;  %v2315_v48 = vadd.f32 %v7969_v7, %v7972_v42 }
 0x1fe   : > { %6743 = vmatmul.mubr.msk.f32.gmra.mrb[14].mxu1 %vm301_vm0, %v8051_v10  ;;  %v2311_v10 = vadd.f32 %v7888_v23, %v7891_v18 }
 0x1ff   : > { %6747 = vmatprep.mubr.msk.f32.mxu1 %vm301_vm0, %v3725_v6 }
 0x200   : > { %v2343_v39 = vadd.f32 %v7894_v38, %v2311_v10  ;;  %v2314_v10 = vadd.f32 %v7918_v45, %v7921_v28 }
 0x202   : > { %6748 = vmatmul.mubr.msk.f32.vlgmr.msra.gmra.mrb[8].mxu1 %vm301_vm0, %v3726_v12  ;;  %v2375_v50 = vadd.f32 %v2343_v39, %v7882_v19  ;;  %v2374_v12 = vadd.f32 %v7891_v18, %v7342_v31  ;;  %v2317_v18 = vadd.f32 %v8007_v15, %v8009_v49 }
 0x203   : > { %6750 = vmatprep.mubr.msk.f32.mxu1 %vm301_vm0, %v3727_v1  ;;  %v2345_v1 = vadd.f32 %v7936_v51, %v2313_v33 }
 0x204   : > { %v2407_v6 = vadd.f32 %v2375_v50, %v7880_v3 }
 0x205   : > { %v2377_v39 = vadd.f32 %v2345_v1, %v7921_v28  ;;  %v2349_v1 = vadd.f32 %v8011_v37, %v2317_v18 }
 0x206   : > { %6751 = vmatmul.mubr.msk.f32.gmra.mrb[10].mxu1 %vm301_vm0, %v3728_v35  ;;  %v2347_v35 = vadd.f32 %v7975_v60, %v2315_v48 }
 0x207   : > { %6753 = vmatprep.mubr.msk.f32.mxu1 %vm301_vm0, %v3729_v20  ;;  %v2439_v20 = vadd.f32 %v2407_v6, %v7884_v9  ;;  %v2316_v6 = vadd.f32 %v7955_v29, %v7958_v5 }
 0x208   : > { %v2379_v31 = vadd.f32 %v2347_v35, %v7958_v5 }
 0x209   : > { %v2471_v50 = vadd.f32 %v2439_v20, %v7932_v40 }
 0x20a   : > { %6754 = vmatmul.mubr.msk.f32.gmra.mrb[12].mxu1 %vm301_vm0, %v3730_v8  ;;  %v2406_v8 = vadd.f32 %v2374_v12, %v7888_v23  ;;  %v2346_v23 = vadd.f32 %v7923_v16, %v2314_v10  ;;  %v2409_v12 = vadd.f32 %v2377_v39, %v7918_v45  ;;  %v2381_v39 = vadd.f32 %v7998_v13, %v2349_v1 }
 0x20b   : > { %6756 = vmatprep.mubr.msk.f32.mxu1 %vm301_vm0, %v3731_v11  ;;  %v2503_v35 = vadd.f32 %v2471_v50, %v7929_v58 }
 0x20c   : > { %v2438_v33 = vadd.f32 %v2406_v8, %v7894_v38  ;;  %v2348_v8 = vadd.f32 %v7961_v2, %v2316_v6  ;;  %v8185_v6 = vstv %s6170_s14  ;;  %s292_s14 = scalar_lea.vmem %s8867_s7, %s6262_s21 }
 0x20e   : > { %6757 = vmatmul.mubr.msk.f32.gmra.mrb[14].mxu1 %vm301_vm0, %v8056_v22  ;;  %v2312_v22 = vadd.f32 %v7880_v3, %v7882_v19  ;;  %v2470_v20 = vadd.f32 %v2438_v33, %v7882_v19 }
 0x210   : > { %v2344_v11 = vadd.f32 %v7884_v9, %v2312_v22  ;;  %v2411_v22 = vadd.f32 %v2379_v31, %v7955_v29  ;;  %v2535_v31 = vadd.f32 %v2503_v35, %v7936_v51  ;;  %v2502_v18 = vadd.f32 %v2470_v20, %v7880_v3  ;;  %v8194_v3 = vld [vmem:[%s8865_s5 + $0x2] ss:$0 sm:$0xff] }
 0x212   : > { %v2376_v48 = vadd.f32 %v2344_v11, %v7932_v40  ;;  %v2378_v40 = vadd.f32 %v2346_v23, %v7972_v42  ;;  %v2441_v11 = vadd.f32 %v2409_v12, %v7923_v16  ;;  %v2443_v10 = vadd.f32 %v2411_v22, %v7961_v2 }
 0x213   : > { %v2413_v23 = vadd.f32 %v8032_v4, %v2381_v39  ;;  %v8188_v12 = vmul.f32 %v2535_v31, %v7729_v57  ;;  %v2534_v22 = vadd.f32 %v2502_v18, %v7884_v9  ;;  %v3891_v9 = vmul.f32 %v8185_v6, %v7831_v56 }
 0x214   : > { %v2408_v38 = vadd.f32 %v2376_v48, %v7929_v58  ;;  %v2410_v19 = vadd.f32 %v2378_v40, %v7969_v7  ;;  %v2380_v58 = vadd.f32 %v2348_v8, %v8009_v49  ;;  %v2473_v33 = vadd.f32 %v2441_v11, %v7972_v42 }
 0x215   : > { %v2475_v48 = vadd.f32 %v2443_v10, %v8009_v49  ;;  %v2445_v20 = vadd.f32 %v8040_v14, %v2413_v23  ;;  %v8206_v40 = vstv %s6171_s15  ;;  %v3890_v11 = vmul.f32 %v8185_v6, %v7836_v55 }
 0x216   : > { %v2440_v50 = vadd.f32 %v2408_v38, %v7936_v51  ;;  %v2442_v42 = vadd.f32 %v2410_v19, %v7975_v60  ;;  %v2412_v49 = vadd.f32 %v2380_v58, %v8007_v15  ;;  %v2505_v1 = vadd.f32 %v2473_v33, %v7969_v7  ;;  %v7106_v33 = vld [vmem:[#allocation2 + $0x90] sm:$0xff] }
 0x217   : > { %v2507_v35 = vadd.f32 %v2475_v48, %v8007_v15  ;;  %v3909_v7 = vmul.f32 %v8206_v40, %v8188_v12  ;;  %v8217_v15 = vmul.f32 %v2534_v22, %v7712_v34  ;;  %v2477_v48 = vadd.f32 %v7106_v33, %v2445_v20 }
 0x218   : > { %v2472_v51 = vadd.f32 %v2440_v50, %v7921_v28  ;;  %v2474_v31 = vadd.f32 %v2442_v42, %v7958_v5  ;;  %v2444_v18 = vadd.f32 %v2412_v49, %v8011_v37  ;;  %v2537_v19 = vadd.f32 %v2505_v1, %v7975_v60 }
 0x219   : > { %v2539_v58 = vadd.f32 %v2507_v35, %v8011_v37  ;;  %v3893_v22 = vmul.f32 %v8185_v6, %v7851_v0  ;;  %v3892_v5 = vmul.f32 %v8185_v6, %v7855_v17  ;;  %v3908_v60 = vmul.f32 %v8206_v40, %v8217_v15 }
 0x21a   : > { %v2504_v39 = vadd.f32 %v2472_v51, %v7918_v45  ;;  %v2506_v1 = vadd.f32 %v2474_v31, %v7955_v29  ;;  %v2476_v35 = vadd.f32 %v2444_v18, %v7998_v13  ;;  %v3895_v13 = vmul.f32 %v8185_v6, %v7872_v61 }
 0x21c   : > { %v2536_v49 = vadd.f32 %v2504_v39, %v7923_v16  ;;  %v3894_v39 = vmul.f32 %v8185_v6, %v7877_v63  ;;  %v2508_v33 = vadd.f32 %v2476_v35, %v8032_v4 }
 0x2d5   : > { %v8202_v38 = vpop.f32.mrb[8].mxu1 }
 0x2d6   : > { %v3881_v28 = vadd.f32 %v8202_v38, %v8194_v3  ;;  %v8210_v8 = vpop.f32.mrb[9].mxu1 }
 0x2d7   : > { %v3880_v10 = vadd.f32 %v8194_v3, %v8210_v8 }
 0x2d8   : > { %v3899_v50 = vadd.f32 %v3891_v9, %v3881_v28  ;;  %v8245_v9 = vmul.f32 %v2537_v19, %v7731_v25  ;;  %v8248_v28 = vmul.f32 %v2539_v58, %v7745_v62  ;;  %v8263_v19 = vmul.f32 %v2536_v49, %v7714_v43 }
 0x2d9   : > { %v3898_v23 = vadd.f32 %v3890_v11, %v3880_v10  ;;  %v8226_v57 = vpop.f32.mrb[10].mxu1  ;;  %v7107_v11 = vld [vmem:[#allocation2 + $0x91] sm:$0xff]  ;;  %v2538_v58 = vadd.f32 %v2506_v1, %v7961_v2  ;;  %v3896_v49 = vmul.f32 %v8185_v6, %v7915_v54 }
 0x2da   : > { %v3883_v45 = vadd.f32 %v8226_v57, %v8194_v3  ;;  %v8232_v51 = vpop.f32.mrb[11].mxu1  ;;  %v3917_v42 = vadd.f32 %v3909_v7, %v3899_v50  ;;  %v2509_v7 = vadd.f32 %v7107_v11, %v2477_v48 }
 0x2db   : > { %v3882_v37 = vadd.f32 %v8194_v3, %v8232_v51  ;;  %v3916_v31 = vadd.f32 %v3908_v60, %v3898_v23  ;;  %v7108_v23 = vld [vmem:[#allocation2 + $0x92] sm:$0xff] }
 0x2dc   : > { %v3901_v20 = vadd.f32 %v3893_v22, %v3883_v45  ;;  %3934 = vrot.lane.b32.xlu1 %v3917_v42, %s7142_s19  ;;  %v3911_v22 = vmul.f32 %v8206_v40, %v8245_v9  ;;  %v3913_v45 = vmul.f32 %v8206_v40, %v8248_v28 }
 0x2dd   : > { %v3900_v10 = vadd.f32 %v3892_v5, %v3882_v37  ;;  %v8250_v50 = vpop.f32.mrb[12].mxu1  ;;  %v2541_v5 = vadd.f32 %v7108_v23, %v2509_v7  ;;  %v3897_v37 = vmul.f32 %v8185_v6, %v7903_v27  ;;  %v3910_v7 = vmul.f32 %v8206_v40, %v8263_v19 }
 0x2de   : > { %v3885_v16 = vadd.f32 %v8250_v50, %v8194_v3  ;;  %v8256_v29 = vpop.f32.mrb[13].mxu1  ;;  %v3919_v1 = vadd.f32 %v3911_v22, %v3901_v20  ;;  %v2061_v6 = vmul.f32 %v7397_v52, %v7321_v24  ;;  %v8313_v22 = vpop.permute.xlu0 %2041 }
 0x2df   : > { %v3884_v18 = vadd.f32 %v8194_v3, %v8256_v29  ;;  %v8295_v20 = vmul.f32 %v2541_v5, %v7788_v26 }
 0x2e0   : > { %v3903_v48 = vadd.f32 %v3895_v13, %v3885_v16  ;;  %3932 = vrot.lane.b32.xlu1 %v3916_v31, %s7142_s19  ;;  %v8287_v16 = vmul.f32 %v2538_v58, %v7747_v59  ;;  %v2540_v13 = vadd.f32 %v2508_v33, %v8040_v14  ;;  %v3918_v31 = vadd.f32 %v3910_v7, %v3900_v10 }
 0x2e1   : > { %v3902_v42 = vadd.f32 %v3894_v39, %v3884_v18  ;;  %v8272_v60 = vpop.f32.mrb[14].mxu1  ;;  %v3915_v18 = vmul.f32 %v8206_v40, %v8295_v20 }
 0x2e2   : > { %v3887_v2 = vadd.f32 %v8272_v60, %v8194_v3  ;;  %v8278_v4 = vpop.f32.mrb[15].mxu1  ;;  %v3921_v35 = vadd.f32 %v3913_v45, %v3903_v48  ;;  %v3912_v14 = vmul.f32 %v8206_v40, %v8287_v16  ;;  %v8304_v58 = vmul.f32 %v2540_v13, %v7759_v47  ;;  %v2075_v45 = vpop.permute.xlu0 %2074 }
 0x2e3   : > { %v3886_v11 = vadd.f32 %v8194_v3, %v8278_v4  ;;  %v2044_v13 = vadd.f32 %v7814_v46, %v8313_v22 }
 0x2e4   : > { %v3905_v39 = vadd.f32 %v3897_v37, %v3887_v2  ;;  %3938 = vrot.lane.b32.xlu1 %v3919_v1, %s7142_s19  ;;  %3942 = vrot.lane.b32.xlu0 %v3921_v35, %s7142_s19  ;;  %v3920_v33 = vadd.f32 %v3912_v14, %v3902_v42  ;;  %v3914_v10 = vmul.f32 %v8206_v40, %v8304_v58  ;;  %v2071_v42 = vpop.permute.xlu1 %2070 }
 0x2e5   : > { %v3904_v3 = vadd.f32 %v3896_v49, %v3886_v11  ;;  %v2045_v40 = vadd.f32 %v7811_v36, %v8313_v22  ;;  %v2047_v14 = vadd.f32 %v7823_v53, %v8313_v22 }
 0x2e6   : > { %v3923_v52 = vadd.f32 %v3915_v18, %v3905_v39  ;;  %v2077_v23 = vpop.permute.xlu0 %2076 }
 0x2e7   : > { %v3922_v48 = vadd.f32 %v3914_v10, %v3904_v3  ;;  %v2094_v3 = vadd.f32 %v2071_v42, %v2044_v13  ;;  %v2046_v10 = vadd.f32 %v7826_v21, %v8313_v22 }
 0x2e8   : > { %3936 = vrot.lane.b32.xlu1 %v3918_v31, %s7142_s19  ;;  %2084 = vrot.lane.b32.xlu0 %v2061_v6, %s7142_s19  ;;  %v2073_v2 = vpop.permute.xlu1 %2072  ;;  %v6176_v6 = vld [vmem:[%s8864_s4 + $0x8] sm:$0xff] }
 0x2e9   : > { %6759 = vmatprep.subr.mxu0 %v6176_v6  ;;  %v2096_v13 = vadd.f32 %v2075_v45, %v2046_v10  ;;  %v2050_v45 = vadd.f32 %v7869_v41, %v8313_v22 }
 0x2ea   : > { %v2079_v5 = vpop.permute.xlu0 %2078  ;;  %6760 = vmatpush3.msra.mxu0 %v6176_v6 }
 0x2ec   : > { %3940 = vrot.lane.b32.xlu1 %v3920_v33, %s7142_s19  ;;  %3946 = vrot.lane.b32.xlu0 %v3923_v52, %s7142_s19  ;;  %v2125_v1 = vpop.permute.xlu1 %2124 }
 0x2ee   : > { %v2081_v37 = vpop.permute.xlu0 %2080 }
 0x2f0   : > { %3944 = vrot.lane.b32.xlu1 %v3922_v48, %s7142_s19  ;;  %v2129_v11 = vpop.permute.xlu1 %2128 }
 0x2f2   : > { %v2083_v49 = vpop.permute.xlu0 %2082 }
 0x2f4   : > { %2134 = vrot.lane.b32.xlu1 %v7796_v30, %s7142_s19  ;;  %v2095_v30 = vadd.f32 %v2073_v2, %v2045_v40  ;;  %v2133_v39 = vpop.permute.xlu1 %2132  ;;  %v2097_v2 = vadd.f32 %v2077_v23, %v2047_v14  ;;  %v2049_v40 = vadd.f32 %v7841_v44, %v8313_v22  ;;  %v4459_v44 = vld [vmem:[#allocation3 + $0x40] sm:$0xff] }
 0x2f5   : > { %6761 = vmatprep.mubr.msk.f32.mxu0 %vm301_vm0, %v4459_v44 }
 0x2f6   : > { %v2121_v35 = vpop.permute.xlu0 %2120 }
 0x2f7   : > { %v2144_v48 = vadd.f32 %v2121_v35, %v2094_v3  ;;  %v2146_v3 = vadd.f32 %v2125_v1, %v2096_v13  ;;  %v8352_v1 = vld [vmem:[%s8864_s4] sm:$0xff] }
 0x2f8   : > { %6773 = vmatprep.subr.mxu0 %v8352_v1  ;;  %v8911_v13 = vld [vmem:[#allocation27_spill] sm:$0xff] }
 0x2fa   : > { %v2123_v7 = vpop.permute.xlu0 %2122 }
 0x2fb   : > { %v2145_v31 = vadd.f32 %v2123_v7, %v2095_v30 }
 0x2fe   : > { %v2127_v18 = vpop.permute.xlu0 %2126 }
 0x2ff   : > { %v2147_v6 = vadd.f32 %v2127_v18, %v2097_v2 }
 0x302   : > { %v2131_v30 = vpop.permute.xlu0 %2130 }
 0x34e   : > { %v3935_v33 = vpop.permute.xlu1 %3934 }
 0x34f   : > { %v8324_v52 = vadd.f32 %v3935_v33, %v2145_v31  ;;  %v2099_v31 = vadd.f32 %v2081_v37, %v2049_v40  ;;  %v2048_v33 = vadd.f32 %v7846_v32, %v8313_v22 }
 0x351   : > { %4132 = vrot.lane.b32.xlu0 %v8324_v52, %s7143_s22  ;;  %v2149_v21 = vadd.f32 %v2131_v30, %v2099_v31  ;;  %v2098_v53 = vadd.f32 %v2079_v5, %v2048_v33  ;;  %v3983_v33 = vstv %s6174_s27 }
 0x352   : > { %v3933_v42 = vpop.permute.xlu1 %3932 }
 0x353   : > { %v8332_v7 = vadd.f32 %v3933_v42, %v2144_v48  ;;  %v2148_v5 = vadd.f32 %v2129_v11, %v2098_v53  ;;  %v2100_v48 = vadd.f32 %v2083_v49, %v2050_v45  ;;  %v2051_v53 = vadd.f32 %v8911_v13, %v8313_v22 }
 0x354   : > { %v3985_v22 = vmul.f32 %v3983_v33, %v7831_v56  ;;  %v3986_v45 = vmul.f32 %v3983_v33, %v7855_v17  ;;  %v3988_v56 = vmul.f32 %v3983_v33, %v7877_v63 }
 0x355   : > { %4130 = vrot.lane.b32.xlu1 %v8332_v7, %s7143_s22  ;;  %v2150_v2 = vadd.f32 %v2133_v39, %v2100_v48  ;;  %v5773_v48 = vstv %s6258_s8  ;;  %s6259_s8 = sld [smem:[#allocation4 + $0x281]] }
 0x356   : > { %v3939_v23 = vpop.permute.xlu1 %3938  ;;  %v3943_v14 = vpop.permute.xlu0 %3942 }
 0x357   : > { %v8338_v35 = vadd.f32 %v3939_v23, %v2147_v6  ;;  %v8345_v18 = vadd.f32 %v3943_v14, %v2149_v21  ;;  %v6173_v6 = vld [vmem:[%s8865_s5 + $0x4] ss:$0 sm:$0xff]  ;;  %v3987_v14 = vmul.f32 %v3983_v33, %v7851_v0  ;;  %v3990_v0 = vmul.f32 %v3983_v33, %v7915_v54 }
 0x359   : > { %4136 = vrot.lane.b32.xlu0 %v8338_v35, %s7143_s22 }
 0x35a   : > { %v3937_v37 = vpop.permute.xlu1 %3936  ;;  %v2085_v40 = vpop.permute.xlu0 %2084 }
 0x35b   : > { %v8347_v10 = vadd.f32 %v3937_v37, %v2146_v3  ;;  %v2101_v11 = vadd.f32 %v2085_v40, %v2051_v53  ;;  %v3984_v3 = vmul.f32 %v3983_v33, %v7836_v55  ;;  %v3989_v37 = vmul.f32 %v3983_v33, %v7872_v61 }
 0x35c   : > { %v3991_v55 = vmul.f32 %v3983_v33, %v7903_v27  ;;  %v8918_v33 = vld [vmem:[#allocation12_spill] sm:$0xff] }
 0x35d   : > { %4140 = vrot.lane.b32.xlu0 %v8345_v18, %s7143_s22  ;;  %4134 = vrot.lane.b32.xlu1 %v8347_v10, %s7143_s22 }
 0x35e   : > { %v3941_v44 = vpop.permute.xlu1 %3940  ;;  %v3947_v31 = vpop.permute.xlu0 %3946 }
 0x35f   : > { %v8359_v21 = vadd.f32 %v3941_v44, %v2148_v5  ;;  %v4033_v5 = vstv %s6175_s30  ;;  %v5775_v44 = vmul.f32 %v5773_v48, %v8324_v52  ;;  %v2171_v52 = vstv %s6086_s9 }
 0x360   : > { %v4035_v17 = vmul.f32 %v4033_v5, %v8188_v12  ;;  %v4034_v61 = vmul.f32 %v4033_v5, %v8217_v15  ;;  %v4037_v63 = vmul.f32 %v4033_v5, %v8245_v9  ;;  %v4036_v27 = vmul.f32 %v4033_v5, %v8263_v19 }
 0x361   : > { %4138 = vrot.lane.b32.xlu1 %v8359_v21, %s7143_s22  ;;  %v4039_v54 = vmul.f32 %v4033_v5, %v8248_v28  ;;  %v4038_v12 = vmul.f32 %v4033_v5, %v8287_v16  ;;  %v4041_v15 = vmul.f32 %v4033_v5, %v8295_v20  ;;  %v4040_v9 = vmul.f32 %v4033_v5, %v8304_v58  ;;  %v8922_v5 = vld [vmem:[#allocation20_spill] sm:$0xff] }
 0x362   : > { %v3945_v42 = vpop.permute.xlu1 %3944  ;;  %v5774_v19 = vmul.f32 %v5773_v48, %v8332_v7  ;;  %v5777_v28 = vmul.f32 %v5773_v48, %v8338_v35  ;;  %v5776_v16 = vmul.f32 %v5773_v48, %v8347_v10  ;;  %v5779_v20 = vmul.f32 %v5773_v48, %v8345_v18  ;;  %v6085_v35 = vld [vmem:[%s8865_s5 + $0x3] ss:$0 sm:$0xff] }
 0x363   : > { %v8365_v49 = vadd.f32 %v3945_v42, %v2150_v2  ;;  %v5778_v58 = vmul.f32 %v5773_v48, %v8359_v21  ;;  %v8912_v10 = vld [vmem:[#allocation7_spill] sm:$0xff]  ;;  %v8913_v21 = vld [vmem:[#allocation9_spill] sm:$0xff]  ;;  %v8914_v42 = vld [vmem:[#allocation8_spill] sm:$0xff] }
 0x364   : > { %v2172_v2 = vmul.f32 %v2171_v52, %v8912_v10  ;;  %v2174_v40 = vmul.f32 %v2171_v52, %v8913_v21  ;;  %v2173_v53 = vmul.f32 %v2171_v52, %v8914_v42 }
 0x365   : > { %4142 = vrot.lane.b32.xlu1 %v8365_v49, %s7143_s22  ;;  %v5780_v18 = vmul.f32 %v5773_v48, %v8365_v49  ;;  %v8917_v49 = vld [vmem:[#allocation13_spill] sm:$0xff] }
 0x366   : > { %v2135_v30 = vpop.permute.xlu1 %2134 }
 0x367   : > { %v2151_v39 = vadd.f32 %v2135_v30, %v2101_v11  ;;  %v8915_v11 = vld [vmem:[#allocation11_spill] sm:$0xff] }
 0x368   : > { %v2176_v30 = vmul.f32 %v2171_v52, %v8915_v11 }
 0x369   : > { %v3963_v23 = vadd.f32 %v3947_v31, %v2151_v39  ;;  %3971 = vrot.lane.b32.xlu1 %v6173_v6, %s7142_s19  ;;  %v8916_v6 = vld [vmem:[#allocation10_spill] sm:$0xff]  ;;  %v2178_v31 = vmul.f32 %v2171_v52, %v8917_v49 }
 0x36a   : > { %v2175_v39 = vmul.f32 %v2171_v52, %v8916_v6 }
 0x36b   : > { %4144 = vrot.lane.b32.xlu0 %v3963_v23, %s7143_s22  ;;  %v5781_v7 = vmul.f32 %v5773_v48, %v3963_v23  ;;  %v2177_v23 = vmul.f32 %v2171_v52, %v8918_v33 }
 0x36d   : > { %4002 = vrot.lane.b32.xlu1 %v3985_v22, %s7142_s19  ;;  %v2221_v22 = vstv %s6087_s13 }
 0x36f   : > { %4000 = vrot.lane.b32.xlu0 %v3984_v3, %s7142_s19  ;;  %v8919_v3 = vld [vmem:[#allocation14_spill] sm:$0xff] }
 0x371   : > { %4006 = vrot.lane.b32.xlu1 %v3987_v14, %s7142_s19  ;;  %v2222_v14 = vmul.f32 %v2221_v22, %v8919_v3 }
 0x373   : > { %4004 = vrot.lane.b32.xlu0 %v3986_v45, %s7142_s19  ;;  %v2179_v45 = vmul.f32 %v2171_v52, %v7321_v24  ;;  %v8924_v24 = vld [vmem:[#allocation21_spill] sm:$0xff] }
 0x375   : > { %4010 = vrot.lane.b32.xlu1 %v3989_v37, %s7142_s19  ;;  %v8920_v37 = vld [vmem:[#allocation15_spill] sm:$0xff] }
 0x377   : > { %4008 = vrot.lane.b32.xlu0 %v3988_v56, %s7142_s19  ;;  %v2224_v56 = vmul.f32 %v2221_v22, %v8920_v37 }
 0x379   : > { %4014 = vrot.lane.b32.xlu1 %v3991_v55, %s7142_s19  ;;  %v8921_v55 = vld [vmem:[#allocation17_spill] sm:$0xff] }
 0x37b   : > { %4012 = vrot.lane.b32.xlu0 %v3990_v0, %s7142_s19  ;;  %v2223_v0 = vmul.f32 %v2221_v22, %v8921_v55 }
 0x37d   : > { %4052 = vrot.lane.b32.xlu1 %v4035_v17, %s7142_s19  ;;  %v2226_v17 = vmul.f32 %v2221_v22, %v8922_v5 }
 0x37f   : > { %4050 = vrot.lane.b32.xlu0 %v4034_v61, %s7142_s19  ;;  %v8923_v61 = vld [vmem:[#allocation18_spill] sm:$0xff] }
 0x381   : > { %4056 = vrot.lane.b32.xlu1 %v4037_v63, %s7142_s19  ;;  %v2225_v63 = vmul.f32 %v2221_v22, %v8923_v61 }
 0x383   : > { %4054 = vrot.lane.b32.xlu0 %v4036_v27, %s7142_s19  ;;  %v2228_v27 = vmul.f32 %v2221_v22, %v8924_v24 }
 0x385   : > { %4060 = vrot.lane.b32.xlu1 %v4039_v54, %s7142_s19  ;;  %v8925_v54 = vld [vmem:[#allocation19_spill] sm:$0xff] }
 0x387   : > { %4058 = vrot.lane.b32.xlu0 %v4038_v12, %s7142_s19  ;;  %v2227_v12 = vmul.f32 %v2221_v22, %v8925_v54 }
 0x389   : > { %4064 = vrot.lane.b32.xlu1 %v4041_v15, %s7142_s19  ;;  %v8926_v15 = vld [vmem:[#allocation22_spill] sm:$0xff] }
 0x38a   : > { %v2229_v48 = vmul.f32 %v2221_v22, %v8926_v15 }
 0x38b   : > { %4062 = vrot.lane.b32.xlu0 %v4040_v9, %s7142_s19 }
 0x38d   : > { %5792 = vrot.lane.b32.xlu1 %v5775_v44, %s7143_s22 }
 0x38f   : > { %5790 = vrot.lane.b32.xlu0 %v5774_v19, %s7143_s22 }
 0x391   : > { %5796 = vrot.lane.b32.xlu1 %v5777_v28, %s7143_s22 }
 0x393   : > { %5794 = vrot.lane.b32.xlu0 %v5776_v16, %s7143_s22 }
 0x395   : > { %5800 = vrot.lane.b32.xlu1 %v5779_v20, %s7143_s22 }
 0x397   : > { %5798 = vrot.lane.b32.xlu0 %v5778_v58, %s7143_s22 }
 0x399   : > { %5804 = vrot.lane.b32.xlu1 %v5781_v7, %s7143_s22 }
 0x39b   : > { %2159 = vrot.lane.b32.xlu0 %v6085_v35, %s7144_s12 }
 0x39d   : > { %2188 = vrot.lane.b32.xlu1 %v2172_v2, %s7144_s12 }
 0x39f   : > { %5802 = vrot.lane.b32.xlu0 %v5780_v18, %s7143_s22 }
 0x3a1   : > { %2192 = vrot.lane.b32.xlu1 %v2174_v40, %s7144_s12 }
 0x3a3   : > { %2190 = vrot.lane.b32.xlu0 %v2173_v53, %s7144_s12 }
 0x3a5   : > { %2196 = vrot.lane.b32.xlu1 %v2176_v30, %s7144_s12 }
 0x3a7   : > { %2194 = vrot.lane.b32.xlu0 %v2175_v39, %s7144_s12  ;;  %v8927_v39 = vld [vmem:[#allocation23_spill] sm:$0xff] }
 0x3a9   : > { %2200 = vrot.lane.b32.xlu1 %v2178_v31, %s7144_s12 }
 0x3ab   : > { %2198 = vrot.lane.b32.xlu0 %v2177_v23, %s7144_s12 }
 0x3ad   : > { %2238 = vrot.lane.b32.xlu1 %v2222_v14, %s7144_s12 }
 0x3af   : > { %2202 = vrot.lane.b32.xlu0 %v2179_v45, %s7144_s12 }
 0x3b1   : > { %2242 = vrot.lane.b32.xlu1 %v2224_v56, %s7144_s12 }
 0x3b3   : > { %2240 = vrot.lane.b32.xlu0 %v2223_v0, %s7144_s12 }
 0x3b5   : > { %2246 = vrot.lane.b32.xlu1 %v2226_v17, %s7144_s12 }
 0x3b7   : > { %2244 = vrot.lane.b32.xlu0 %v2225_v63, %s7144_s12 }
 0x3b9   : > { %2250 = vrot.lane.b32.xlu1 %v2228_v27, %s7144_s12 }
 0x3bb   : > { %2248 = vrot.lane.b32.xlu0 %v2227_v12, %s7144_s12 }
 0x3bf   : > { %2252 = vrot.lane.b32.xlu0 %v2229_v48, %s7144_s12 }
 0x3c3   : > { %v4133_v9 = vpop.permute.xlu0 %4132 }
 0x3c4   : > { %4155 = vst.msk [vmem:[#allocation2 + $0x21] sm:$0xff] %vm301_vm0, %v4133_v9 }
 0x3c7   : > { %v4131_v44 = vpop.permute.xlu1 %4130 }
 0x3c8   : > { %4154 = vst.msk [vmem:[#allocation2 + $0x11] sm:$0xff] %vm301_vm0, %v4131_v44 }
 0x3cb   : > { %v4137_v19 = vpop.permute.xlu0 %4136  ;;  %v8459_v28 = vld [vmem:[#allocation2 + $0x21] sm:$0xff] }
 0x3cc   : > { %v4164_v16 = vld [vmem:[#allocation2 + $0x20] sm:$0xff]  ;;  %4157 = vst.msk [vmem:[#allocation2 + $0x41] sm:$0xff] %vm301_vm0, %v4137_v19  ;;  %v4204_v58 = vmax.f32 %v8459_v28, 0.0 }
 0x3cd   : > { %v8461_v20 = vld [vmem:[#allocation2 + $0x22] sm:$0xff]  ;;  %v4172_v52 = vmax.f32 %v4164_v16, 0.0  ;;  %v4196_v35 = vadd.f32 %v8459_v28, %v4164_v16 }
 0x3ce   : > { %v4236_v7 = vmax.f32 %v8461_v20, 0.0  ;;  %4212 = vst.msk [vmem:[#allocation3 + $0x50] sm:$0xff] %vm301_vm0, %v4204_v58  ;;  %4307 = vst.msk [vmem:[#allocation3 + $0x108] sm:$0xff] %vm301_vm0, %v4204_v58 }
 0x3cf   : > { %4180 = vst.msk [vmem:[#allocation3 + $0x10] sm:$0xff] %vm301_vm0, %v4172_v52  ;;  %4275 = vst.msk [vmem:[#allocation3 + $0xc8] sm:$0xff] %vm301_vm0, %v4172_v52  ;;  %v8477_v10 = vadd.f32 %v8461_v20, %v4196_v35  ;;  %v4141_v2 = vpop.permute.xlu0 %4140  ;;  %v4135_v18 = vpop.permute.xlu1 %4134  ;;  %v4187_v21 = vld [vmem:[#allocation2 + $0x11] sm:$0xff] }
 0x3d0   : > { %4244 = vst.msk [vmem:[#allocation3 + $0x90] sm:$0xff] %vm301_vm0, %v4236_v7  ;;  %4339 = vst.msk [vmem:[#allocation3 + $0x148] sm:$0xff] %vm301_vm0, %v4236_v7  ;;  %v4163_v40 = vld [vmem:[#allocation2 + $0x10] sm:$0xff]  ;;  %v4203_v53 = vmax.f32 %v4187_v21, 0.0 }
 0x3d1   : > { %4370 = vst.msk [vmem:[#allocation3 + $0x180] sm:$0xff] %vm301_vm0, %v4172_v52  ;;  %4402 = vst.msk [vmem:[#allocation3 + $0x1c0] sm:$0xff] %vm301_vm0, %v4204_v58  ;;  %v4219_v42 = vld [vmem:[#allocation2 + $0x12] sm:$0xff]  ;;  %v4171_v11 = vmax.f32 %v4163_v40, 0.0  ;;  %v4195_v6 = vadd.f32 %v4187_v21, %v4163_v40  ;;  %v4258_v49 = vadd.f32 %v8927_v39, %v4163_v40 }
 0x3d2   : > { %4434 = vst.msk [vmem:[#allocation3 + $0x200] sm:$0xff] %vm301_vm0, %v4236_v7  ;;  %4159 = vst.msk [vmem:[#allocation2 + $0x61] sm:$0xff] %vm301_vm0, %v4141_v2  ;;  %v4235_v30 = vmax.f32 %v4219_v42, 0.0 }
 0x3d3   : > { %4156 = vst.msk [vmem:[#allocation2 + $0x31] sm:$0xff] %vm301_vm0, %v4135_v18  ;;  %4211 = vst.msk [vmem:[#allocation3 + $0x48] sm:$0xff] %vm301_vm0, %v4203_v53  ;;  %v4227_v31 = vadd.f32 %v4219_v42, %v4195_v6  ;;  %v4139_v33 = vpop.permute.xlu1 %4138  ;;  %v8488_v23 = vld [vmem:[#allocation2 + $0x41] sm:$0xff]  ;;  %v4290_v14 = vadd.f32 %v4258_v49, %v4187_v21 }
 0x3d4   : > { %4179 = vst.msk [vmem:[#allocation3 + $0x8] sm:$0xff] %vm301_vm0, %v4171_v11  ;;  %4243 = vst.msk [vmem:[#allocation3 + $0x88] sm:$0xff] %vm301_vm0, %v4235_v30  ;;  %v8490_v22 = vld [vmem:[#allocation2 + $0x40] sm:$0xff]  ;;  %v4206_v45 = vmax.f32 %v8488_v23, 0.0 }
 0x3d5   : > { %4274 = vst.msk [vmem:[#allocation3 + $0xc0] sm:$0xff] %vm301_vm0, %v4171_v11  ;;  %4306 = vst.msk [vmem:[#allocation3 + $0x100] sm:$0xff] %vm301_vm0, %v4203_v53  ;;  %v8492_v3 = vld [vmem:[#allocation2 + $0x42] sm:$0xff]  ;;  %v4174_v37 = vmax.f32 %v8490_v22, 0.0  ;;  %v4259_v55 = vadd.f32 %v4227_v31, %v4164_v16  ;;  %v4322_v0 = vadd.f32 %v4290_v14, %v4219_v42  ;;  %v4198_v5 = vadd.f32 %v8488_v23, %v8490_v22  ;;  %v4461_v40 = vld [vmem:[#allocation3 + $0x50] sm:$0xff] }
 0x3d6   : > { %4338 = vst.msk [vmem:[#allocation3 + $0x140] sm:$0xff] %vm301_vm0, %v4235_v30  ;;  %4158 = vst.msk [vmem:[#allocation2 + $0x51] sm:$0xff] %vm301_vm0, %v4139_v33  ;;  %v4238_v56 = vmax.f32 %v8492_v3, 0.0 }
 0x3d7   : > { %4214 = vst.msk [vmem:[#allocation3 + $0x60] sm:$0xff] %vm301_vm0, %v4206_v45  ;;  %4182 = vst.msk [vmem:[#allocation3 + $0x20] sm:$0xff] %vm301_vm0, %v4174_v37  ;;  %v4291_v17 = vadd.f32 %v4259_v55, %v8459_v28  ;;  %v4143_v61 = vpop.permute.xlu1 %4142  ;;  %v4354_v54 = vadd.f32 %v4322_v0, %v4164_v16  ;;  %v8515_v12 = vadd.f32 %v8492_v3, %v4198_v5  ;;  %v8530_v16 = vld [vmem:[%s8864_s4 + $0x10] sm:$0xff] }
 0x3d8   : > { %4246 = vst.msk [vmem:[#allocation3 + $0xa0] sm:$0xff] %vm301_vm0, %v4238_v56  ;;  %4277 = vst.msk [vmem:[#allocation3 + $0xd8] sm:$0xff] %vm301_vm0, %v4174_v37 }
 0x3d9   : > { %4309 = vst.msk [vmem:[#allocation3 + $0x118] sm:$0xff] %vm301_vm0, %v4206_v45  ;;  %4341 = vst.msk [vmem:[#allocation3 + $0x158] sm:$0xff] %vm301_vm0, %v4238_v56  ;;  %v8512_v24 = vld [vmem:[#allocation2 + $0x61] sm:$0xff]  ;;  %v4323_v52 = vadd.f32 %v4291_v17, %v8461_v20  ;;  %v4386_v21 = vadd.f32 %v4354_v54, %v8459_v28 }
 0x3da   : > { %4372 = vst.msk [vmem:[#allocation3 + $0x190] sm:$0xff] %vm301_vm0, %v4174_v37  ;;  %4404 = vst.msk [vmem:[#allocation3 + $0x1d0] sm:$0xff] %vm301_vm0, %v4206_v45  ;;  %v8510_v63 = vld [vmem:[#allocation2 + $0x31] sm:$0xff]  ;;  %v4208_v48 = vmax.f32 %v8512_v24, 0.0  ;;  %v8520_v44 = vld [vmem:[#allocation2 + $0x60] sm:$0xff] }
 0x3db   : > { %4436 = vst.msk [vmem:[#allocation3 + $0x210] sm:$0xff] %vm301_vm0, %v4238_v56  ;;  %v4165_v27 = vld [vmem:[#allocation2 + $0x30] sm:$0xff]  ;;  %4160 = vst.msk [vmem:[#allocation2 + $0x71] sm:$0xff] %vm301_vm0, %v4143_v61  ;;  %v4205_v15 = vmax.f32 %v8510_v63, 0.0  ;;  %v8524_v58 = vld [vmem:[#allocation2 + $0x62] sm:$0xff]  ;;  %v4176_v35 = vmax.f32 %v8520_v44, 0.0  ;;  %v8550_v11 = vadd.f32 %v8512_v24, %v8520_v44  ;;  %v8553_v30 = vpop.permute.xlu1 %3971 }
 0x3dc   : > { %v4173_v9 = vmax.f32 %v4165_v27, 0.0  ;;  %v8522_v19 = vld [vmem:[#allocation2 + $0x32] sm:$0xff]  ;;  %v4460_v7 = vld [vmem:[#allocation3 + $0x48] sm:$0xff]  ;;  %v4240_v18 = vmax.f32 %v8524_v58, 0.0  ;;  %4216 = vst.msk [vmem:[#allocation3 + $0x70] sm:$0xff] %vm301_vm0, %v4208_v48  ;;  %4311 = vst.msk [vmem:[#allocation3 + $0x128] sm:$0xff] %vm301_vm0, %v4208_v48  ;;  %v4355_v28 = vadd.f32 %v4323_v52, %v4165_v27  ;;  %v4197_v42 = vadd.f32 %v8510_v63, %v4165_v27 }
 0x3dd   : > { %v4237_v2 = vmax.f32 %v8522_v19, 0.0  ;;  %6762 = vmatmul.mubr.msk.f32.vlgmr.msra.gmra.mrb[8].mxu0 %vm301_vm0, %v4460_v7  ;;  %4213 = vst.msk [vmem:[#allocation3 + $0x58] sm:$0xff] %vm301_vm0, %v4205_v15  ;;  %4308 = vst.msk [vmem:[#allocation3 + $0x110] sm:$0xff] %vm301_vm0, %v4205_v15  ;;  %v4260_v53 = vadd.f32 %v8477_v10, %v4165_v27  ;;  %v8556_v6 = vld [vmem:[#allocation2 + $0x51] sm:$0xff]  ;;  %v4145_v10 = vpop.permute.xlu0 %4144 }
 0x3de   : > { %4181 = vst.msk [vmem:[#allocation3 + $0x18] sm:$0xff] %vm301_vm0, %v4173_v9  ;;  %4276 = vst.msk [vmem:[#allocation3 + $0xd0] sm:$0xff] %vm301_vm0, %v4173_v9  ;;  %6764 = vmatprep.mubr.msk.f32.mxu0 %vm301_vm0, %v4461_v40  ;;  %6774 = vmatpush3.msra.mxu0 %v8352_v1  ;;  %v8558_v39 = vld [vmem:[#allocation2 + $0x50] sm:$0xff]  ;;  %v8572_v1 = vadd.f32 %v4386_v21, %v8461_v20  ;;  %v4207_v31 = vmax.f32 %v8556_v6, 0.0  ;;  %v4387_v45 = vadd.f32 %v4355_v28, %v8510_v63  ;;  %v4463_v7 = vld [vmem:[#allocation3 + $0x60] sm:$0xff] }
 0x3df   : > { %4371 = vst.msk [vmem:[#allocation3 + $0x188] sm:$0xff] %vm301_vm0, %v4173_v9  ;;  %4403 = vst.msk [vmem:[#allocation3 + $0x1c8] sm:$0xff] %vm301_vm0, %v4205_v15  ;;  %v8562_v49 = vld [vmem:[#allocation2 + $0x52] sm:$0xff]  ;;  %6787 = vmatprep.subr.mxu0 %v8530_v16  ;;  %v4175_v33 = vmax.f32 %v8558_v39, 0.0  ;;  %v8580_v37 = vpop.permute.xlu1 %4002  ;;  %v4229_v0 = vadd.f32 %v8522_v19, %v4197_v42  ;;  %v4292_v5 = vadd.f32 %v4260_v53, %v8510_v63 }
 0x3e0   : > { %4406 = vst.msk [vmem:[#allocation3 + $0x1e0] sm:$0xff] %vm301_vm0, %v4208_v48  ;;  %4184 = vst.msk [vmem:[#allocation3 + $0x30] sm:$0xff] %vm301_vm0, %v4176_v35  ;;  %v4239_v14 = vmax.f32 %v8562_v49, 0.0  ;;  %v4199_v17 = vadd.f32 %v8556_v6, %v8558_v39  ;;  %v8607_v48 = vadd.f32 %v4387_v45, %v8522_v19  ;;  %v4232_v42 = vadd.f32 %v8524_v58, %v8550_v11 }
 0x3e1   : > { %4245 = vst.msk [vmem:[#allocation3 + $0x98] sm:$0xff] %vm301_vm0, %v4237_v2  ;;  %4248 = vst.msk [vmem:[#allocation3 + $0xb0] sm:$0xff] %vm301_vm0, %v4240_v18  ;;  %v8604_v63 = vpop.permute.xlu0 %4000  ;;  %v4261_v9 = vadd.f32 %v4229_v0, %v8490_v22 }
 0x3e2   : > { %4279 = vst.msk [vmem:[#allocation3 + $0xe8] sm:$0xff] %vm301_vm0, %v4176_v35  ;;  %4340 = vst.msk [vmem:[#allocation3 + $0x150] sm:$0xff] %vm301_vm0, %v4237_v2  ;;  %v8583_v56 = vld [vmem:[#allocation2 + $0x71] sm:$0xff] }
 0x3e3   : > { %4343 = vst.msk [vmem:[#allocation3 + $0x168] sm:$0xff] %vm301_vm0, %v4240_v18  ;;  %4374 = vst.msk [vmem:[#allocation3 + $0x1a0] sm:$0xff] %vm301_vm0, %v4176_v35  ;;  %v8585_v20 = vld [vmem:[#allocation2 + $0x70] sm:$0xff]  ;;  %v4209_v61 = vmax.f32 %v8583_v56, 0.0  ;;  %v4324_v35 = vadd.f32 %v4292_v5, %v8522_v19  ;;  %v8627_v21 = vpop.permute.xlu1 %4006  ;;  %v4293_v40 = vadd.f32 %v4261_v9, %v8488_v23 }
 0x3e4   : > { %4435 = vst.msk [vmem:[#allocation3 + $0x208] sm:$0xff] %vm301_vm0, %v4237_v2  ;;  %4438 = vst.msk [vmem:[#allocation3 + $0x220] sm:$0xff] %vm301_vm0, %v4240_v18  ;;  %v8587_v55 = vld [vmem:[#allocation2 + $0x72] sm:$0xff]  ;;  %v4177_v27 = vmax.f32 %v8585_v20, 0.0  ;;  %v4201_v52 = vadd.f32 %v8583_v56, %v8585_v20  ;;  %v4231_v2 = vadd.f32 %v8562_v49, %v4199_v17  ;;  %v4262_v18 = vadd.f32 %v8515_v12, %v8558_v39 }
 0x3e5   : > { %4161 = vst.msk [vmem:[#allocation2 + $0x81] sm:$0xff] %vm301_vm0, %v4145_v10  ;;  %4215 = vst.msk [vmem:[#allocation3 + $0x68] sm:$0xff] %vm301_vm0, %v4207_v31  ;;  %v4241_v54 = vmax.f32 %v8587_v55, 0.0  ;;  %v4462_v15 = vld [vmem:[#allocation3 + $0x58] sm:$0xff]  ;;  %v4356_v53 = vadd.f32 %v4324_v35, %v8490_v22  ;;  %v4325_v45 = vadd.f32 %v4293_v40, %v8492_v3  ;;  %v4264_v0 = vadd.f32 %v4232_v42, %v8585_v20  ;;  %v4465_v22 = vld [vmem:[#allocation3 + $0x70] sm:$0xff] }
 0x3e6   : > { %4310 = vst.msk [vmem:[#allocation3 + $0x120] sm:$0xff] %vm301_vm0, %v4207_v31  ;;  %4405 = vst.msk [vmem:[#allocation3 + $0x1d8] sm:$0xff] %vm301_vm0, %v4207_v31  ;;  %6765 = vmatmul.mubr.msk.f32.gmra.mrb[10].mxu0 %vm301_vm0, %v4462_v15  ;;  %v4233_v28 = vadd.f32 %v8587_v55, %v4201_v52  ;;  %v4263_v19 = vadd.f32 %v4231_v2, %v8520_v44  ;;  %v4294_v10 = vadd.f32 %v4262_v18, %v8556_v6  ;;  %v8636_v31 = vpop.permute.xlu0 %4004  ;;  %v4450_v2 = vld [vmem:[#allocation3] sm:$0xff] }
 0x3e7   : > { %4183 = vst.msk [vmem:[#allocation3 + $0x28] sm:$0xff] %vm301_vm0, %v4175_v33  ;;  %4247 = vst.msk [vmem:[#allocation3 + $0xa8] sm:$0xff] %vm301_vm0, %v4239_v14  ;;  %6767 = vmatprep.mubr.msk.f32.mxu0 %vm301_vm0, %v4463_v7  ;;  %v8641_v11 = vpop.permute.xlu1 %4010  ;;  %v4388_v9 = vadd.f32 %v4356_v53, %v8488_v23  ;;  %v4296_v23 = vadd.f32 %v4264_v0, %v8583_v56 }
 0x3e8   : > { %4278 = vst.msk [vmem:[#allocation3 + $0xe0] sm:$0xff] %vm301_vm0, %v4175_v33  ;;  %4342 = vst.msk [vmem:[#allocation3 + $0x160] sm:$0xff] %vm301_vm0, %v4239_v14  ;;  %v4295_v52 = vadd.f32 %v4263_v19, %v8512_v24 }
 0x3e9   : > { %4373 = vst.msk [vmem:[#allocation3 + $0x198] sm:$0xff] %vm301_vm0, %v4175_v33  ;;  %4437 = vst.msk [vmem:[#allocation3 + $0x218] sm:$0xff] %vm301_vm0, %v4239_v14  ;;  %v4328_v19 = vadd.f32 %v4296_v23, %v8587_v55 }
 0x3ea   : > { %4217 = vst.msk [vmem:[#allocation3 + $0x78] sm:$0xff] %vm301_vm0, %v4209_v61  ;;  %4185 = vst.msk [vmem:[#allocation3 + $0x38] sm:$0xff] %vm301_vm0, %v4177_v27  ;;  %v4009_v7 = vpop.permute.xlu0 %4008  ;;  %v4327_v42 = vadd.f32 %v4295_v52, %v8524_v58 }
 0x3eb   : > { %4249 = vst.msk [vmem:[#allocation3 + $0xb8] sm:$0xff] %vm301_vm0, %v4241_v54  ;;  %4280 = vst.msk [vmem:[#allocation3 + $0xf0] sm:$0xff] %vm301_vm0, %v4177_v27 }
 0x3ec   : > { %4312 = vst.msk [vmem:[#allocation3 + $0x130] sm:$0xff] %vm301_vm0, %v4209_v61  ;;  %4344 = vst.msk [vmem:[#allocation3 + $0x170] sm:$0xff] %vm301_vm0, %v4241_v54  ;;  %v4257_v12 = vld [vmem:[#allocation2 + $0x80] sm:$0xff]  ;;  %v4464_v5 = vld [vmem:[#allocation3 + $0x68] sm:$0xff] }
 0x3ed   : > { %4375 = vst.msk [vmem:[#allocation3 + $0x1a8] sm:$0xff] %vm301_vm0, %v4177_v27  ;;  %4407 = vst.msk [vmem:[#allocation3 + $0x1e8] sm:$0xff] %vm301_vm0, %v4209_v61  ;;  %v4289_v33 = vld [vmem:[#allocation2 + $0x81] sm:$0xff]  ;;  %v4273_v17 = vmax.f32 %v4257_v12, 0.0  ;;  %6768 = vmatmul.mubr.msk.f32.gmra.mrb[12].mxu0 %vm301_vm0, %v4464_v5  ;;  %v4265_v15 = vadd.f32 %v4257_v12, %v4233_v28  ;;  %v8657_v28 = vadd.f32 %v4388_v9, %v8492_v3 }
 0x3ee   : > { %4439 = vst.msk [vmem:[#allocation3 + $0x228] sm:$0xff] %vm301_vm0, %v4241_v54  ;;  %v4321_v14 = vld [vmem:[#allocation2 + $0x82] sm:$0xff]  ;;  %v4305_v61 = vmax.f32 %v4289_v33, 0.0  ;;  %v4357_v54 = vadd.f32 %v4325_v45, %v8558_v39  ;;  %6770 = vmatprep.mubr.msk.f32.mxu0 %vm301_vm0, %v4465_v22  ;;  %v4326_v39 = vadd.f32 %v4294_v10, %v8562_v49  ;;  %v4015_v10 = vpop.permute.xlu1 %4014  ;;  %v3975_v3 = vadd.f32 %v8202_v38, %v8553_v30 }
 0x3ef   : > { %v4337_v27 = vmax.f32 %v4321_v14, 0.0  ;;  %4281 = vst.msk [vmem:[#allocation3 + $0xf8] sm:$0xff] %vm301_vm0, %v4273_v17  ;;  %4376 = vst.msk [vmem:[#allocation3 + $0x1b0] sm:$0xff] %vm301_vm0, %v4273_v17  ;;  %v4297_v40 = vadd.f32 %v4289_v33, %v4265_v15  ;;  %v4013_v17 = vpop.permute.xlu0 %4012  ;;  %v4451_v22 = vld [vmem:[#allocation3 + $0x8] sm:$0xff]  ;;  %v3976_v9 = vadd.f32 %v8553_v30, %v8232_v51 }
 0x3f0   : > { %4313 = vst.msk [vmem:[#allocation3 + $0x138] sm:$0xff] %vm301_vm0, %v4305_v61  ;;  %4408 = vst.msk [vmem:[#allocation3 + $0x1f0] sm:$0xff] %vm301_vm0, %v4305_v61  ;;  %v4389_v18 = vadd.f32 %v4357_v54, %v8556_v6  ;;  %v4358_v53 = vadd.f32 %v4326_v39, %v8520_v44  ;;  %v4359_v6 = vadd.f32 %v4327_v42, %v8585_v20  ;;  %v6202_v20 = vld [vmem:[%s8864_s4 + $0x18] sm:$0xff] }
 0x3f1   : > { %4345 = vst.msk [vmem:[#allocation3 + $0x178] sm:$0xff] %vm301_vm0, %v4337_v27  ;;  %4440 = vst.msk [vmem:[#allocation3 + $0x230] sm:$0xff] %vm301_vm0, %v4337_v27  ;;  %v4466_v35 = vld [vmem:[#allocation3 + $0x78] sm:$0xff]  ;;  %v8666_v0 = vadd.f32 %v4321_v14, %v4297_v40  ;;  %v4360_v44 = vadd.f32 %v4328_v19, %v4257_v12  ;;  %v4025_v27 = vadd.f32 %v8580_v37, %v3975_v3  ;;  %v4727_v19 = vld [vmem:[#allocation3 + $0x80] sm:$0xff] }
 0x3f2   : > { %6771 = vmatmul.mubr.msk.f32.gmra.mrb[14].mxu0 %vm301_vm0, %v4466_v35  ;;  %v8664_v45 = vadd.f32 %v4389_v18, %v8562_v49  ;;  %v4390_v5 = vadd.f32 %v4358_v53, %v8512_v24  ;;  %v4391_v61 = vadd.f32 %v4359_v6, %v8583_v56  ;;  %v3974_v49 = vadd.f32 %v8553_v30, %v8210_v8  ;;  %v4452_v56 = vld [vmem:[#allocation3 + $0x10] sm:$0xff]  ;;  %v4053_v12 = vpop.permute.xlu1 %4052  ;;  %v4453_v39 = vld [vmem:[#allocation3 + $0x18] sm:$0xff]  ;;  %v4455_v18 = vld [vmem:[#allocation3 + $0x28] sm:$0xff] }
 0x3f3   : > { %6775 = vmatprep.mubr.msk.f32.mxu0 %vm301_vm0, %v4450_v2  ;;  %v4392_v54 = vadd.f32 %v4360_v44, %v4289_v33  ;;  %v3977_v24 = vadd.f32 %v8226_v57, %v8553_v30  ;;  %v4075_v15 = vadd.f32 %v4053_v12, %v4025_v27  ;;  %v4051_v33 = vpop.permute.xlu0 %4050  ;;  %v3978_v35 = vadd.f32 %v8553_v30, %v8256_v29  ;;  %v6220_v12 = vld [vmem:[%s8864_s4 + $0x28] sm:$0xff] }
 0x3f4   : > { %v8681_v38 = vadd.f32 %v4390_v5, %v8524_v58  ;;  %v8687_v37 = vadd.f32 %v4391_v61, %v8587_v55  ;;  %v4024_v8 = vadd.f32 %v8604_v63, %v3974_v49  ;;  %v4454_v55 = vld [vmem:[#allocation3 + $0x20] sm:$0xff]  ;;  %v4026_v63 = vadd.f32 %v8636_v31, %v3976_v9  ;;  %v4456_v31 = vld [vmem:[#allocation3 + $0x30] sm:$0xff]  ;;  %v4457_v5 = vld [vmem:[#allocation3 + $0x38] sm:$0xff] }
 0x3f5   : > { %v8692_v58 = vadd.f32 %v4392_v54, %v4321_v14  ;;  %v4027_v57 = vadd.f32 %v8627_v21, %v3977_v24  ;;  %4092 = vrot.lane.b32.xlu0 %v4075_v15, %s7142_s19  ;;  %v3979_v14 = vadd.f32 %v8250_v50, %v8553_v30  ;;  %v4028_v50 = vadd.f32 %v4009_v7, %v3978_v35  ;;  %v4728_v49 = vld [vmem:[#allocation3 + $0x88] sm:$0xff]  ;;  %v4733_v54 = vld [vmem:[#allocation3 + $0xb0] sm:$0xff]  ;;  %v4734_v24 = vld [vmem:[#allocation3 + $0xb8] sm:$0xff] }
 0x3f6   : > { %6776 = vmatmul.mubr.msk.f32.vlgmr.msra.gmra.mrb[8].mxu0 %vm301_vm0, %v4451_v22  ;;  %v4074_v52 = vadd.f32 %v4051_v33, %v4024_v8  ;;  %v3981_v42 = vadd.f32 %v8272_v60, %v8553_v30  ;;  %v3980_v6 = vadd.f32 %v8553_v30, %v8278_v4  ;;  %v6211_v4 = vld [vmem:[%s8864_s4 + $0x20] sm:$0xff]  ;;  %v4729_v30 = vld [vmem:[#allocation3 + $0x90] sm:$0xff]  ;;  %v4732_v22 = vld [vmem:[#allocation3 + $0xa8] sm:$0xff] }
 0x3f7   : > { %6788 = vmatpush3.msra.mxu0 %v8530_v16  ;;  %6778 = vmatprep.mubr.msk.f32.mxu0 %vm301_vm0, %v4452_v56  ;;  %v4057_v16 = vpop.permute.xlu1 %4056  ;;  %v4055_v21 = vpop.permute.xlu0 %4054  ;;  %v4029_v51 = vadd.f32 %v8641_v11, %v3979_v14  ;;  %v4875_v56 = vld [vmem:[#allocation3 + $0xc8] sm:$0xff]  ;;  %v4876_v8 = vld [vmem:[#allocation3 + $0xd0] sm:$0xff]  ;;  %v4877_v15 = vld [vmem:[#allocation3 + $0xd8] sm:$0xff] }
 0x3f8   : > { %6801 = vmatprep.subr.mxu0 %v6202_v20  ;;  %v4077_v23 = vadd.f32 %v4057_v16, %v4027_v57  ;;  %4090 = vrot.lane.b32.xlu1 %v4074_v52, %s7142_s19  ;;  %v4076_v2 = vadd.f32 %v4055_v21, %v4026_v63  ;;  %v4031_v29 = vadd.f32 %v4015_v10, %v3981_v42  ;;  %v4730_v10 = vld [vmem:[#allocation3 + $0x98] sm:$0xff]  ;;  %v4878_v33 = vld [vmem:[#allocation3 + $0xe0] sm:$0xff]  ;;  %v4879_v57 = vld [vmem:[#allocation3 + $0xe8] sm:$0xff] }
 0x3f9   : > { %v4030_v44 = vadd.f32 %v4013_v17, %v3980_v6  ;;  %v4731_v17 = vld [vmem:[#allocation3 + $0xa0] sm:$0xff]  ;;  %v4880_v9 = vld [vmem:[#allocation3 + $0xf0] sm:$0xff]  ;;  %v4881_v52 = vld [vmem:[#allocation3 + $0xf8] sm:$0xff] }
 0x3fa   : > { %6779 = vmatmul.mubr.msk.f32.gmra.mrb[10].mxu0 %vm301_vm0, %v4453_v39  ;;  %4096 = vrot.lane.b32.xlu0 %v4077_v23, %s7142_s19  ;;  %v5021_v39 = vld [vmem:[#allocation3 + $0x100] sm:$0xff]  ;;  %v6229_v16 = vld [vmem:[%s8864_s4 + $0x30] sm:$0xff]  ;;  %v5024_v14 = vld [vmem:[#allocation3 + $0x118] sm:$0xff] }
 0x3fb   : > { %6781 = vmatprep.mubr.msk.f32.mxu0 %vm301_vm0, %v4454_v55  ;;  %v4061_v40 = vpop.permute.xlu1 %4060  ;;  %v4059_v11 = vpop.permute.xlu0 %4058  ;;  %v5022_v55 = vld [vmem:[#allocation3 + $0x108] sm:$0xff]  ;;  %v5023_v63 = vld [vmem:[#allocation3 + $0x110] sm:$0xff]  ;;  %v5025_v23 = vld [vmem:[#allocation3 + $0x120] sm:$0xff] }
 0x3fc   : > { %v4079_v53 = vadd.f32 %v4061_v40, %v4029_v51  ;;  %4094 = vrot.lane.b32.xlu1 %v4076_v2, %s7142_s19  ;;  %v4078_v3 = vadd.f32 %v4059_v11, %v4028_v50  ;;  %v5026_v21 = vld [vmem:[#allocation3 + $0x128] sm:$0xff]  ;;  %v5027_v51 = vld [vmem:[#allocation3 + $0x130] sm:$0xff]  ;;  %v5028_v35 = vld [vmem:[#allocation3 + $0x138] sm:$0xff] }
 0x3fd   : > { %v5168_v2 = vld [vmem:[#allocation3 + $0x140] sm:$0xff]  ;;  %v5170_v40 = vld [vmem:[#allocation3 + $0x150] sm:$0xff]  ;;  %v5171_v50 = vld [vmem:[#allocation3 + $0x158] sm:$0xff] }
 0x3fe   : > { %6782 = vmatmul.mubr.msk.f32.gmra.mrb[12].mxu0 %vm301_vm0, %v4455_v18  ;;  %4100 = vrot.lane.b32.xlu0 %v4079_v53, %s7142_s19  ;;  %v5169_v18 = vld [vmem:[#allocation3 + $0x148] sm:$0xff]  ;;  %v5172_v42 = vld [vmem:[#allocation3 + $0x160] sm:$0xff]  ;;  %v5174_v11 = vld [vmem:[#allocation3 + $0x170] sm:$0xff] }
 0x3ff   : > { %6784 = vmatprep.mubr.msk.f32.mxu0 %vm301_vm0, %v4456_v31  ;;  %v4065_v7 = vpop.permute.xlu1 %4064  ;;  %v4063_v61 = vpop.permute.xlu0 %4062  ;;  %v6238_v31 = vld [vmem:[%s8864_s4 + $0x38] sm:$0xff]  ;;  %v5173_v53 = vld [vmem:[#allocation3 + $0x168] sm:$0xff] }
 0x400   : > { %v4081_v60 = vadd.f32 %v4065_v7, %v4031_v29  ;;  %4098 = vrot.lane.b32.xlu1 %v4078_v3, %s7142_s19  ;;  %v4080_v27 = vadd.f32 %v4063_v61, %v4030_v44  ;;  %v5315_v29 = vld [vmem:[#allocation3 + $0x180] sm:$0xff]  ;;  %v5316_v6 = vld [vmem:[#allocation3 + $0x188] sm:$0xff]  ;;  %v5318_v7 = vld [vmem:[#allocation3 + $0x198] sm:$0xff] }
 0x401   : > { %v6247_v3 = vld [vmem:[%s8864_s4 + $0x40] sm:$0xff]  ;;  %v5321_v61 = vld [vmem:[#allocation3 + $0x1b0] sm:$0xff] }
 0x402   : > { %6785 = vmatmul.mubr.msk.f32.gmra.mrb[14].mxu0 %vm301_vm0, %v4457_v5  ;;  %4104 = vrot.lane.b32.xlu0 %v4081_v60, %s7142_s19  ;;  %v5317_v5 = vld [vmem:[#allocation3 + $0x190] sm:$0xff]  ;;  %v5319_v44 = vld [vmem:[#allocation3 + $0x1a0] sm:$0xff]  ;;  %v5320_v60 = vld [vmem:[#allocation3 + $0x1a8] sm:$0xff] }
 0x403   : > { %6789 = vmatprep.mubr.msk.f32.mxu0 %vm301_vm0, %v4727_v19  ;;  %v5175_v19 = vld [vmem:[#allocation3 + $0x178] sm:$0xff] }
 0x404   : > { %4102 = vrot.lane.b32.xlu1 %v4080_v27, %s7142_s19  ;;  %v5322_v27 = vld [vmem:[#allocation3 + $0x1b8] sm:$0xff] }
 0x406   : > { %6790 = vmatmul.mubr.msk.f32.vlgmr.msra.gmra.mrb[8].mxu0 %vm301_vm0, %v4728_v49  ;;  %v5462_v49 = vld [vmem:[#allocation3 + $0x1c0] sm:$0xff] }
 0x407   : > { %6802 = vmatpush3.msra.mxu0 %v6202_v20  ;;  %6792 = vmatprep.mubr.msk.f32.mxu0 %vm301_vm0, %v4729_v30  ;;  %v4874_v20 = vld [vmem:[#allocation3 + $0xc0] sm:$0xff]  ;;  %v5464_v30 = vld [vmem:[#allocation3 + $0x1d0] sm:$0xff] }
 0x408   : > { %6815 = vmatprep.subr.mxu0 %v6211_v4 }
 0x40a   : > { %6793 = vmatmul.mubr.msk.f32.gmra.mrb[10].mxu0 %vm301_vm0, %v4730_v10  ;;  %v5465_v10 = vld [vmem:[#allocation3 + $0x1d8] sm:$0xff] }
 0x40b   : > { %6795 = vmatprep.mubr.msk.f32.mxu0 %vm301_vm0, %v4731_v17  ;;  %v5466_v17 = vld [vmem:[#allocation3 + $0x1e0] sm:$0xff] }
 0x40e   : > { %6796 = vmatmul.mubr.msk.f32.gmra.mrb[12].mxu0 %vm301_vm0, %v4732_v22  ;;  %v5467_v22 = vld [vmem:[#allocation3 + $0x1e8] sm:$0xff] }
 0x40f   : > { %6798 = vmatprep.mubr.msk.f32.mxu0 %vm301_vm0, %v4733_v54  ;;  %v5468_v54 = vld [vmem:[#allocation3 + $0x1f0] sm:$0xff] }
 0x412   : > { %6799 = vmatmul.mubr.msk.f32.gmra.mrb[14].mxu0 %vm301_vm0, %v4734_v24  ;;  %v5469_v24 = vld [vmem:[#allocation3 + $0x1f8] sm:$0xff] }
 0x413   : > { %6803 = vmatprep.mubr.msk.f32.mxu0 %vm301_vm0, %v4874_v20  ;;  %v5609_v20 = vld [vmem:[#allocation3 + $0x200] sm:$0xff] }
 0x416   : > { %6804 = vmatmul.mubr.msk.f32.vlgmr.msra.gmra.mrb[8].mxu0 %vm301_vm0, %v4875_v56  ;;  %v5610_v56 = vld [vmem:[#allocation3 + $0x208] sm:$0xff] }
 0x417   : > { %6816 = vmatpush3.msra.mxu0 %v6211_v4  ;;  %6806 = vmatprep.mubr.msk.f32.mxu0 %vm301_vm0, %v4876_v8  ;;  %v5463_v4 = vld [vmem:[#allocation3 + $0x1c8] sm:$0xff]  ;;  %v5612_v8 = vld [vmem:[#allocation3 + $0x218] sm:$0xff] }
 0x418   : > { %6829 = vmatprep.subr.mxu0 %v6220_v12 }
 0x41a   : > { %6807 = vmatmul.mubr.msk.f32.gmra.mrb[10].mxu0 %vm301_vm0, %v4877_v15  ;;  %v5613_v15 = vld [vmem:[#allocation3 + $0x220] sm:$0xff] }
 0x41b   : > { %6809 = vmatprep.mubr.msk.f32.mxu0 %vm301_vm0, %v4878_v33  ;;  %v5614_v33 = vld [vmem:[#allocation3 + $0x228] sm:$0xff] }
 0x41e   : > { %6810 = vmatmul.mubr.msk.f32.gmra.mrb[12].mxu0 %vm301_vm0, %v4879_v57  ;;  %v5615_v57 = vld [vmem:[#allocation3 + $0x230] sm:$0xff] }
 0x41f   : > { %6812 = vmatprep.mubr.msk.f32.mxu0 %vm301_vm0, %v4880_v9  ;;  %v5616_v9 = vld [vmem:[#allocation3 + $0x238] sm:$0xff] }
 0x422   : > { %6813 = vmatmul.mubr.msk.f32.gmra.mrb[14].mxu0 %vm301_vm0, %v4881_v52  ;;  %v5791_v52 = vpop.permute.xlu0 %5790 }
 0x423   : > { %6817 = vmatprep.mubr.msk.f32.mxu0 %vm301_vm0, %v5021_v39  ;;  %v5793_v39 = vpop.permute.xlu1 %5792 }
 0x426   : > { %6818 = vmatmul.mubr.msk.f32.vlgmr.msra.gmra.mrb[8].mxu0 %vm301_vm0, %v5022_v55  ;;  %v5795_v55 = vpop.permute.xlu0 %5794 }
 0x427   : > { %6830 = vmatpush3.msra.mxu0 %v6220_v12  ;;  %6820 = vmatprep.mubr.msk.f32.mxu0 %vm301_vm0, %v5023_v63  ;;  %v5611_v12 = vld [vmem:[#allocation3 + $0x210] sm:$0xff]  ;;  %v8928_v63 = vld [vmem:[#allocation16_spill] sm:$0xff] }
 0x428   : > { %6843 = vmatprep.subr.mxu0 %v6229_v16 }
 0x42a   : > { %6821 = vmatmul.mubr.msk.f32.gmra.mrb[10].mxu0 %vm301_vm0, %v5024_v14  ;;  %v4443_v14 = vmul.f32 %v8607_v48, %v8928_v63 }
 0x42b   : > { %6823 = vmatprep.mubr.msk.f32.mxu0 %vm301_vm0, %v5025_v23  ;;  %v7109_v23 = vld [vmem:[#allocation2 + $0x90] sm:$0xff] }
 0x42e   : > { %6824 = vmatmul.mubr.msk.f32.gmra.mrb[12].mxu0 %vm301_vm0, %v5026_v21  ;;  %v4361_v21 = vadd.f32 %v7109_v23, %v8666_v0 }
 0x42f   : > { %6826 = vmatprep.mubr.msk.f32.mxu0 %vm301_vm0, %v5027_v51 }
 0x432   : > { %6827 = vmatmul.mubr.msk.f32.gmra.mrb[14].mxu0 %vm301_vm0, %v5028_v35  ;;  %v4442_v35 = vmul.f32 %v8572_v1, %v7712_v34 }
 0x433   : > { %6831 = vmatprep.mubr.msk.f32.mxu0 %vm301_vm0, %v5168_v2 }
 0x436   : > { %6832 = vmatmul.mubr.msk.f32.vlgmr.msra.gmra.mrb[8].mxu0 %vm301_vm0, %v5169_v18 }
 0x437   : > { %6844 = vmatpush3.msra.mxu0 %v6229_v16  ;;  %6834 = vmatprep.mubr.msk.f32.mxu0 %vm301_vm0, %v5170_v40  ;;  %v6257_v16 = vld [vmem:[%s8865_s5 + $0x5] ss:$0 sm:$0xff]  ;;  %v5797_v40 = vpop.permute.xlu1 %5796 }
 0x438   : > { %6857 = vmatprep.subr.mxu0 %v6238_v31 }
 0x43a   : > { %6835 = vmatmul.mubr.msk.f32.gmra.mrb[10].mxu0 %vm301_vm0, %v5171_v50 }
 0x43b   : > { %6837 = vmatprep.mubr.msk.f32.mxu0 %vm301_vm0, %v5172_v42  ;;  %v5799_v42 = vpop.permute.xlu0 %5798 }
 0x43e   : > { %6838 = vmatmul.mubr.msk.f32.gmra.mrb[12].mxu0 %vm301_vm0, %v5173_v53 }
 0x43f   : > { %6840 = vmatprep.mubr.msk.f32.mxu0 %vm301_vm0, %v5174_v11 }
 0x442   : > { %6841 = vmatmul.mubr.msk.f32.gmra.mrb[14].mxu0 %vm301_vm0, %v5175_v19  ;;  %v4445_v19 = vmul.f32 %v8664_v45, %v7731_v25  ;;  %v4447_v25 = vmul.f32 %v8687_v37, %v7745_v62  ;;  %v5801_v45 = vpop.permute.xlu1 %5800 }
 0x443   : > { %6845 = vmatprep.mubr.msk.f32.mxu0 %vm301_vm0, %v5315_v29  ;;  %v7110_v29 = vld [vmem:[#allocation2 + $0x91] sm:$0xff] }
 0x444   : > { %v4393_v48 = vadd.f32 %v7110_v29, %v4361_v21 }
 0x446   : > { %6846 = vmatmul.mubr.msk.f32.vlgmr.msra.gmra.mrb[8].mxu0 %vm301_vm0, %v5316_v6 }
 0x447   : > { %6858 = vmatpush3.msra.mxu0 %v6238_v31  ;;  %6848 = vmatprep.mubr.msk.f32.mxu0 %vm301_vm0, %v5317_v5  ;;  %v5823_v31 = vstv %s6259_s8  ;;  %v4444_v5 = vmul.f32 %v8657_v28, %v7714_v43  ;;  %v4446_v28 = vmul.f32 %v8681_v38, %v7747_v59  ;;  %v4448_v59 = vmul.f32 %v8692_v58, %v7759_v47 }
 0x448   : > { %6871 = vmatprep.subr.mxu0 %v6247_v3  ;;  %v5825_v11 = vmul.f32 %v5823_v31, %v4443_v14  ;;  %v5824_v0 = vmul.f32 %v5823_v31, %v4442_v35  ;;  %v5829_v37 = vmul.f32 %v5823_v31, %v4447_v25  ;;  %v8929_v25 = vld [vmem:[#allocation24_spill] sm:$0xff] }
 0x449   : > { %v5826_v43 = vmul.f32 %v5823_v31, %v4444_v5  ;;  %v5830_v21 = vmul.f32 %v5823_v31, %v4448_v59 }
 0x44a   : > { %6849 = vmatmul.mubr.msk.f32.gmra.mrb[10].mxu0 %vm301_vm0, %v5318_v7 }
 0x44b   : > { %6851 = vmatprep.mubr.msk.f32.mxu0 %vm301_vm0, %v5319_v44 }
 0x44e   : > { %6852 = vmatmul.mubr.msk.f32.gmra.mrb[12].mxu0 %vm301_vm0, %v5320_v60 }
 0x44f   : > { %6854 = vmatprep.mubr.msk.f32.mxu0 %vm301_vm0, %v5321_v61 }
 0x452   : > { %6855 = vmatmul.mubr.msk.f32.gmra.mrb[14].mxu0 %vm301_vm0, %v5322_v27  ;;  %v5827_v27 = vmul.f32 %v5823_v31, %v4445_v19 }
 0x453   : > { %6859 = vmatprep.mubr.msk.f32.mxu0 %vm301_vm0, %v5462_v49  ;;  %v7111_v49 = vld [vmem:[#allocation2 + $0x92] sm:$0xff] }
 0x456   : > { %6860 = vmatmul.mubr.msk.f32.vlgmr.msra.gmra.mrb[8].mxu0 %vm301_vm0, %v5463_v4  ;;  %v4425_v4 = vadd.f32 %v7111_v49, %v4393_v48 }
 0x457   : > { %6872 = vmatpush3.msra.mxu0 %v6247_v3  ;;  %6862 = vmatprep.mubr.msk.f32.mxu0 %vm301_vm0, %v5464_v30 }
 0x458   : > { %v4449_v62 = vmul.f32 %v4425_v4, %v7788_v26 }
 0x45a   : > { %6863 = vmatmul.mubr.msk.f32.gmra.mrb[10].mxu0 %vm301_vm0, %v5465_v10  ;;  %v5831_v23 = vmul.f32 %v5823_v31, %v4449_v62 }
 0x45b   : > { %6865 = vmatprep.mubr.msk.f32.mxu0 %vm301_vm0, %v5466_v17  ;;  %v8809_v17 = vpop.permute.xlu0 %2159 }
 0x45e   : > { %6866 = vmatmul.mubr.msk.f32.gmra.mrb[12].mxu0 %vm301_vm0, %v5467_v22 }
 0x45f   : > { %6868 = vmatprep.mubr.msk.f32.mxu0 %vm301_vm0, %v5468_v54  ;;  %v5803_v63 = vpop.permute.xlu0 %5802 }
 0x462   : > { %6869 = vmatmul.mubr.msk.f32.gmra.mrb[14].mxu0 %vm301_vm0, %v5469_v24 }
 0x463   : > { %6873 = vmatprep.mubr.msk.f32.mxu0 %vm301_vm0, %v5609_v20  ;;  %v2191_v47 = vpop.permute.xlu0 %2190 }
 0x466   : > { %6874 = vmatmul.mubr.msk.f32.vlgmr.msra.gmra.mrb[8].mxu0 %vm301_vm0, %v5610_v56 }
 0x467   : > { %6876 = vmatprep.mubr.msk.f32.mxu0 %vm301_vm0, %v5611_v12 }
 0x46a   : > { %6877 = vmatmul.mubr.msk.f32.gmra.mrb[10].mxu0 %vm301_vm0, %v5612_v8 }
 0x46b   : > { %6879 = vmatprep.mubr.msk.f32.mxu0 %vm301_vm0, %v5613_v15 }
 0x46e   : > { %6880 = vmatmul.mubr.msk.f32.gmra.mrb[12].mxu0 %vm301_vm0, %v5614_v33  ;;  %v5828_v33 = vmul.f32 %v5823_v31, %v4446_v28 }
 0x46f   : > { %6882 = vmatprep.mubr.msk.f32.mxu0 %vm301_vm0, %v5615_v57 }
 0x472   : > { %6883 = vmatmul.mubr.msk.f32.gmra.mrb[14].mxu0 %vm301_vm0, %v5616_v9 }
 0x539   : > { %v6875_v51 = vpop.f32.mrb[8].mxu0 }
 0x53a   : > { %v5765_v2 = vadd.f32 %v6875_v51, %v6257_v16  ;;  %v5709_v18 = vpop.f32.mrb[9].mxu0 }
 0x53b   : > { %v5764_v50 = vadd.f32 %v6257_v16, %v5709_v18 }
 0x53c   : > { %v5815_v53 = vadd.f32 %v5793_v39, %v5765_v2  ;;  %v2195_v2 = vpop.permute.xlu0 %2194 }
 0x53d   : > { %v5814_v6 = vadd.f32 %v5791_v52, %v5764_v50  ;;  %v6878_v3 = vpop.f32.mrb[10].mxu0  ;;  %v5805_v52 = vpop.permute.xlu1 %5804 }
 0x53e   : > { %v5767_v34 = vadd.f32 %v6878_v3, %v6257_v16  ;;  %v5719_v1 = vpop.f32.mrb[11].mxu0  ;;  %v5833_v7 = vadd.f32 %v5825_v11, %v5815_v53 }
 0x53f   : > { %v5766_v44 = vadd.f32 %v6257_v16, %v5719_v1  ;;  %v5832_v60 = vadd.f32 %v5824_v0, %v5814_v6 }
 0x540   : > { %v5817_v61 = vadd.f32 %v5797_v40, %v5767_v34  ;;  %5850 = vrot.lane.b32.xlu0 %v5833_v7, %s7144_s12  ;;  %v2199_v18 = vpop.permute.xlu0 %2198 }
 0x541   : > { %v5816_v30 = vadd.f32 %v5795_v55, %v5766_v44  ;;  %v6881_v10 = vpop.f32.mrb[12].mxu0  ;;  %5848 = vrot.lane.b32.xlu1 %v5832_v60, %s7144_s12  ;;  %v2189_v58 = vpop.permute.xlu1 %2188  ;;  %v2162_v60 = vadd.f32 %v7814_v46, %v8809_v17 }
 0x542   : > { %v5769_v22 = vadd.f32 %v6881_v10, %v6257_v16  ;;  %v5729_v54 = vpop.f32.mrb[13].mxu0  ;;  %v5835_v24 = vadd.f32 %v5827_v27, %v5817_v61  ;;  %v2163_v61 = vadd.f32 %v7811_v36, %v8809_v17 }
 0x543   : > { %v5768_v20 = vadd.f32 %v6257_v16, %v5729_v54  ;;  %v5834_v56 = vadd.f32 %v5826_v43, %v5816_v30  ;;  %v2212_v49 = vadd.f32 %v2189_v58, %v2162_v60  ;;  %v8930_v43 = vld [vmem:[#allocation25_spill] sm:$0xff] }
 0x544   : > { %v5819_v12 = vadd.f32 %v5801_v45, %v5769_v22  ;;  %5854 = vrot.lane.b32.xlu0 %v5835_v24, %s7144_s12  ;;  %v2203_v50 = vpop.permute.xlu0 %2202  ;;  %v2213_v27 = vadd.f32 %v2191_v47, %v2163_v61  ;;  %v2165_v45 = vadd.f32 %v8929_v25, %v8809_v17  ;;  %v2164_v28 = vadd.f32 %v8930_v43, %v8809_v17 }
 0x545   : > { %v5818_v8 = vadd.f32 %v5799_v42, %v5768_v20  ;;  %v6884_v15 = vpop.f32.mrb[14].mxu0  ;;  %5852 = vrot.lane.b32.xlu1 %v5834_v56, %s7144_s12 }
 0x546   : > { %v5771_v38 = vadd.f32 %v6884_v15, %v6257_v16  ;;  %v5739_v57 = vpop.f32.mrb[15].mxu0  ;;  %v5837_v9 = vadd.f32 %v5829_v37, %v5819_v12  ;;  %v2215_v54 = vadd.f32 %v2195_v2, %v2165_v45  ;;  %v8931_v12 = vld [vmem:[#allocation26_spill] sm:$0xff]  ;;  %v2166_v15 = vadd.f32 %v7846_v32, %v8809_v17 }
 0x547   : > { %v5770_v39 = vadd.f32 %v6257_v16, %v5739_v57  ;;  %v5836_v55 = vadd.f32 %v5828_v33, %v5818_v8  ;;  %v2193_v16 = vpop.permute.xlu1 %2192  ;;  %v2167_v36 = vadd.f32 %v8931_v12, %v8809_v17  ;;  %v2168_v32 = vadd.f32 %v7869_v41, %v8809_v17 }
 0x548   : > { %v5821_v14 = vadd.f32 %v5805_v52, %v5771_v38  ;;  %5858 = vrot.lane.b32.xlu0 %v5837_v9, %s7144_s12  ;;  %v2241_v53 = vpop.permute.xlu0 %2240  ;;  %v2214_v20 = vadd.f32 %v2193_v16, %v2164_v28 }
 0x549   : > { %v5820_v26 = vadd.f32 %v5803_v63, %v5770_v39  ;;  %5856 = vrot.lane.b32.xlu1 %v5836_v55, %s7144_s12  ;;  %v2263_v30 = vadd.f32 %v2241_v53, %v2213_v27  ;;  %v2217_v38 = vadd.f32 %v2199_v18, %v2167_v36  ;;  %v2169_v55 = vadd.f32 %v8911_v13, %v8809_v17 }
 0x54a   : > { %v5839_v51 = vadd.f32 %v5831_v23, %v5821_v14 }
 0x54b   : > { %v5838_v35 = vadd.f32 %v5830_v21, %v5820_v26  ;;  %v2197_v40 = vpop.permute.xlu1 %2196 }
 0x54c   : > { %5862 = vrot.lane.b32.xlu0 %v5839_v51, %s7144_s12  ;;  %v2245_v19 = vpop.permute.xlu0 %2244  ;;  %v2216_v9 = vadd.f32 %v2197_v40, %v2166_v15  ;;  %v2219_v51 = vadd.f32 %v2203_v50, %v2169_v55 }
 0x54d   : > { %5860 = vrot.lane.b32.xlu1 %v5838_v35, %s7144_s12  ;;  %v2265_v62 = vadd.f32 %v2245_v19, %v2215_v54 }
 0x54f   : > { %v2201_v42 = vpop.permute.xlu1 %2200 }
 0x550   : > { %v2249_v48 = vpop.permute.xlu0 %2248  ;;  %v2218_v47 = vadd.f32 %v2201_v42, %v2168_v32 }
 0x551   : > { %v2267_v63 = vadd.f32 %v2249_v48, %v2217_v38 }
 0x553   : > { %v2239_v11 = vpop.permute.xlu1 %2238 }
 0x554   : > { %v2253_v6 = vpop.permute.xlu0 %2252  ;;  %v2262_v22 = vadd.f32 %v2239_v11, %v2212_v49 }
 0x555   : > { %v2269_v16 = vadd.f32 %v2253_v6, %v2219_v51 }
 0x557   : > { %v2243_v29 = vpop.permute.xlu1 %2242 }
 0x558   : > { %v4093_v0 = vpop.permute.xlu0 %4092  ;;  %v2264_v33 = vadd.f32 %v2243_v29, %v2214_v20 }
 0x559   : > { %v4115_v24 = vadd.f32 %v4093_v0, %v2263_v30 }
 0x55b   : > { %v2247_v31 = vpop.permute.xlu1 %2246 }
 0x55c   : > { %v4097_v34 = vpop.permute.xlu0 %4096  ;;  %v2266_v26 = vadd.f32 %v2247_v31, %v2216_v9 }
 0x55d   : > { %v4117_v57 = vadd.f32 %v4097_v34, %v2265_v62 }
 0x55f   : > { %v2251_v3 = vpop.permute.xlu1 %2250 }
 0x560   : > { %v4101_v7 = vpop.permute.xlu0 %4100  ;;  %v2268_v40 = vadd.f32 %v2251_v3, %v2218_v47 }
 0x561   : > { %v4119_v35 = vadd.f32 %v4101_v7, %v2267_v63 }
 0x563   : > { %v4091_v5 = vpop.permute.xlu1 %4090 }
 0x564   : > { %v4105_v4 = vpop.permute.xlu0 %4104  ;;  %v4114_v56 = vadd.f32 %v4091_v5, %v2262_v22 }
 0x565   : > { %v4121_v11 = vadd.f32 %v4105_v4, %v2269_v16 }
 0x567   : > { %v4095_v1 = vpop.permute.xlu1 %4094 }
 0x568   : > { %v4116_v52 = vadd.f32 %v4095_v1, %v2264_v33 }
 0x56b   : > { %v4099_v44 = vpop.permute.xlu1 %4098 }
 0x56c   : > { %v4118_v58 = vadd.f32 %v4099_v44, %v2266_v26 }
 0x56f   : > { %v4103_v10 = vpop.permute.xlu1 %4102 }
 0x570   : > { %v4120_v41 = vadd.f32 %v4103_v10, %v2268_v40 }
 0x5b2   : > { %v5851_v46 = vpop.permute.xlu0 %5850 }
 0x5b3   : > { %v5873_v37 = vadd.f32 %v5851_v46, %v4115_v24  ;;  %v5849_v8 = vpop.permute.xlu1 %5848 }
 0x5b4   : > { %v5872_v59 = vadd.f32 %v5849_v8, %v4114_v56 }
 0x5b5   : > { %5890 = vrot.lane.b32.xlu0 %v5873_v37, %s7145_s11 }
 0x5b6   : > { %v5855_v39 = vpop.permute.xlu0 %5854  ;;  %5888 = vrot.lane.b32.xlu1 %v5872_v59, %s7145_s11 }
 0x5b7   : > { %v5875_v14 = vadd.f32 %v5855_v39, %v4117_v57  ;;  %v5853_v23 = vpop.permute.xlu1 %5852 }
 0x5b8   : > { %v5874_v21 = vadd.f32 %v5853_v23, %v4116_v52 }
 0x5b9   : > { %5894 = vrot.lane.b32.xlu0 %v5875_v14, %s7145_s11 }
 0x5ba   : > { %v5859_v2 = vpop.permute.xlu0 %5858  ;;  %5892 = vrot.lane.b32.xlu1 %v5874_v21, %s7145_s11 }
 0x5bb   : > { %v5877_v13 = vadd.f32 %v5859_v2, %v4119_v35  ;;  %v5857_v18 = vpop.permute.xlu1 %5856 }
 0x5bc   : > { %v5876_v53 = vadd.f32 %v5857_v18, %v4118_v58 }
 0x5bd   : > { %5898 = vrot.lane.b32.xlu0 %v5877_v13, %s7145_s11 }
 0x5be   : > { %v5863_v17 = vpop.permute.xlu0 %5862  ;;  %5896 = vrot.lane.b32.xlu1 %v5876_v53, %s7145_s11 }
 0x5bf   : > { %v5879_v50 = vadd.f32 %v5863_v17, %v4121_v11  ;;  %v5861_v19 = vpop.permute.xlu1 %5860 }
 0x5c0   : > { %v5878_v42 = vadd.f32 %v5861_v19, %v4120_v41 }
 0x5c1   : > { %5902 = vrot.lane.b32.xlu0 %v5879_v50, %s7145_s11 }
 0x5c2   : > { %5900 = vrot.lane.b32.xlu1 %v5878_v42, %s7145_s11 }
 0x627   : > { %v5891_v29 = vpop.permute.xlu0 %5890 }
 0x628   : > { %5913 = vst.msk [vmem:[%s292_s14 + $0x8] sm:$0xff] %vm301_vm0, %v5891_v29  ;;  %v5889_v48 = vpop.permute.xlu1 %5888 }
 0x629   : > { %5912 = vst.msk [vmem:[%s292_s14] sm:$0xff] %vm301_vm0, %v5889_v48 }
 0x62b   : > { %v5895_v31 = vpop.permute.xlu0 %5894 }
 0x62c   : > { %5915 = vst.msk [vmem:[%s292_s14 + $0x18] sm:$0xff] %vm301_vm0, %v5895_v31  ;;  %v5893_v6 = vpop.permute.xlu1 %5892 }
 0x62d   : > { %5914 = vst.msk [vmem:[%s292_s14 + $0x10] sm:$0xff] %vm301_vm0, %v5893_v6 }
 0x62f   : > { %v5899_v3 = vpop.permute.xlu0 %5898 }
 0x630   : > { %5917 = vst.msk [vmem:[%s292_s14 + $0x28] sm:$0xff] %vm301_vm0, %v5899_v3  ;;  %v5897_v0 = vpop.permute.xlu1 %5896 }
 0x631   : > { %5916 = vst.msk [vmem:[%s292_s14 + $0x20] sm:$0xff] %vm301_vm0, %v5897_v0 }
 0x633   : > { %v5903_v5 = vpop.permute.xlu0 %5902 }
 0x634   : > { %5919 = vst.msk [vmem:[%s292_s14 + $0x38] sm:$0xff] %vm301_vm0, %v5903_v5  ;;  %v5901_v34 = vpop.permute.xlu1 %5900 }
 0x635   : > { %5918 = vst.msk [vmem:[%s292_s14 + $0x30] sm:$0xff] %vm301_vm0, %v5901_v34 }
 0x636 PF: > { %s18_s24 = sadd.s32 1, %s7137_s24  }
 0x637   : > { %p15_p1 = scmp.ge.s32.totalorder %s18_s24, 4  }
 0x639   :  { %17 = sbr.rel (!%p15_p1) target bundleno = 1 (0x1), region = 122 }
 0x640   :  { %5941 = vsyncpa [#allocation5], 1 }
 0x641   :  { %5943 = vsyncpa [#allocation5 + $0x1], 1 }

</bundles_post_ra>
